<compile_context>
chip_gen: v7x
topology: tpu7x:2x2x1
jax: 0.10.0
libtpu: 0.0.40
codegen_flags: <defaults>
</compile_context>

<pallas_src>
import math
import functools

import jax
import jax.numpy as jnp
from jax.experimental import pallas as pl
from jax.experimental.pallas import tpu as pltpu

PAD_IDX = 0
NEG_INF = -1e9        # finite "-inf": avoids NaN softmax on fully padded rows
LN_EPS = 1e-5         # PyTorch LayerNorm default
VMEM_LIMIT_BYTES = 48 * 1024 * 1024   # > v5e scoped default, < v7x physical


def _pick_tile(n, target, mult):
    """Largest tile <= target that is a multiple of `mult` and divides n;
    falls back to the full extent n (always a legal BlockSpec dim)."""
    if n <= target:
        return n
    t = (target // mult) * mult
    while t >= mult:
        if n % t == 0:
            return t
        t -= mult
    return n


def _row_tile(m, target):
    """Row tile for 2-D row-parallel kernels.  Returns (tile, padded_m):
    if m > target we use a fixed multiple-of-8 tile and pad m up to it so
    row pipelining always engages (no silent full-extent fallback)."""
    if m <= target:
        return m, m
    tm = (target // 8) * 8
    mp = ((m + tm - 1) // tm) * tm
    return tm, mp


def _col_tile(n, target):
    """Column tile (lane dim, multiple of 128) with padding, same idea."""
    if n <= target:
        return n, n
    tn = (target // 128) * 128
    np_ = ((n + tn - 1) // tn) * tn
    return tn, np_


def _layernorm(x, g, b):
    mean = jnp.mean(x, axis=-1, keepdims=True)
    var = jnp.mean((x - mean) ** 2, axis=-1, keepdims=True)
    return (x - mean) * jax.lax.rsqrt(var + LN_EPS) * g + b


# ----------------------------- Pallas kernels ------------------------------

def _mha_block_kernel(xq_ref, xkv_ref, kp_ref,
                      wq_ref, bq_ref, wk_ref, bk_ref, wv_ref, bv_ref,
                      wo_ref, bo_ref, g_ref, b_ref, o_ref,
                      *, nhead, scale, causal, q_tile):
    """One (batch, q-tile): full MHA + residual + LayerNorm, all heads fused."""
    xq_f32 = xq_ref[0].astype(jnp.float32)          # (tq, E) residual, f32
    xq_b = xq_ref[0].astype(jnp.bfloat16)
    xkv_b = xkv_ref[0].astype(jnp.bfloat16)         # (Sk, E)

    # QKV projections (bf16 MXU, f32 accumulation); scale folded into q,
    # q/k/v cast to bf16 once right after the bias add.
    q = ((jnp.dot(xq_b, wq_ref[...], preferred_element_type=jnp.float32)
          + bq_ref[...]) * scale).astype(jnp.bfloat16)
    k = (jnp.dot(xkv_b, wk_ref[...], preferred_element_type=jnp.float32)
         + bk_ref[...]).astype(jnp.bfloat16)
    v = (jnp.dot(xkv_b, wv_ref[...], preferred_element_type=jnp.float32)
         + bv_ref[...]).astype(jnp.bfloat16)

    tq, E = q.shape
    Sk = k.shape[0]
    Dh = E // nhead

    # Additive mask: key padding (shared by all heads / query rows) plus an
    # in-kernel causal triangle (no (Sq,Sk) mask is ever DMA'd).
    m = kp_ref[0]                                   # (1, Sk) f32
    if causal:
        q_off = pl.program_id(1) * q_tile
        rows = jax.lax.broadcasted_iota(jnp.int32, (tq, Sk), 0) + q_off
        cols = jax.lax.broadcasted_iota(jnp.int32, (tq, Sk), 1)
        m = m + jnp.where(rows >= cols, 0.0, NEG_INF)

    # Per-head attention; contexts concatenated into a lane-dense (tq, E) slab.
    ctx = []
    for h in range(nhead):
        lo = h * Dh
        qh = q[:, lo:lo + Dh]
        kh = k[:, lo:lo + Dh]
        vh = v[:, lo:lo + Dh]
        s = jax.lax.dot_general(qh, kh, (((1,), (1,)), ((), ())),
                                preferred_element_type=jnp.float32)
        s = s + m
        s = s - jnp.max(s, axis=-1, keepdims=True)
        p = jnp.exp(s)
        p = p * pl.reciprocal(jnp.sum(p, axis=-1, keepdims=True), approx=True)
        ctx.append(jnp.dot(p.astype(jnp.bfloat16), vh,
                           preferred_element_type=jnp.float32))
    ctx = jnp.concatenate(ctx, axis=-1).astype(jnp.bfloat16)   # (tq, E)

    # Single full-width output projection (K = E fills the MXU).
    proj = jnp.dot(ctx, wo_ref[...],
                   preferred_element_type=jnp.float32) + bo_ref[...]

    y = xq_f32 + proj                                # residual add (f32)
    o_ref[0] = _layernorm(y, g_ref[...], b_ref[...]).astype(o_ref.dtype)


def _ffn_block_kernel(x_ref, w1_ref, b1_ref, w2_ref, b2_ref, g_ref, b_ref, o_ref):
    """linear2(relu(linear1(x))) + residual + LayerNorm on a row tile."""
    x = x_ref[...].astype(jnp.float32)               # (tm, E)
    h = jnp.dot(x_ref[...].astype(jnp.bfloat16), w1_ref[...],
                preferred_element_type=jnp.float32) + b1_ref[...]
    h = jnp.maximum(h, 0.0)
    f = jnp.dot(h.astype(jnp.bfloat16), w2_ref[...],
                preferred_element_type=jnp.float32) + b2_ref[...]
    y = x + f
    o_ref[...] = _layernorm(y, g_ref[...], b_ref[...]).astype(o_ref.dtype)


def _ln_kernel(x_ref, g_ref, b_ref, o_ref):
    o_ref[...] = _layernorm(x_ref[...].astype(jnp.float32),
                            g_ref[...], b_ref[...]).astype(o_ref.dtype)


def _linear_kernel(x_ref, w_ref, b_ref, o_ref):
    o_ref[...] = (jnp.dot(x_ref[...].astype(jnp.bfloat16), w_ref[...],
                          preferred_element_type=jnp.float32)
                  + b_ref[...]).astype(o_ref.dtype)


# --------------------------- pallas_call wrappers ---------------------------

def mha_block(x_q, x_kv, p, ln, key_pad_mask, nhead, causal):
    """Fused MHA + residual + LayerNorm.  key_pad_mask: (B, 1, Sk) additive."""
    B, Sq, E = x_q.shape
    Sk = x_kv.shape[1]
    Dh = E // nhead
    tq = _pick_tile(Sq, 256, 8)                      # q-tiling (2nd parallel axis)
    nq = Sq // tq
    kern = functools.partial(_mha_block_kernel, nhead=nhead,
                             scale=1.0 / math.sqrt(Dh),
                             causal=causal, q_tile=tq)

    def wspec(shape):
        return pl.BlockSpec(shape, lambda b, qi: (0, 0))

    return pl.pallas_call(
        kern,
        out_shape=jax.ShapeDtypeStruct((B, Sq, E), jnp.bfloat16),
        grid=(B, nq),
        in_specs=[
            pl.BlockSpec((1, tq, E), lambda b, qi: (b, qi, 0)),   # x_q tile
            pl.BlockSpec((1, Sk, E), lambda b, qi: (b, 0, 0)),    # x_kv (full keys)
            pl.BlockSpec((1, 1, Sk), lambda b, qi: (b, 0, 0)),    # key-pad mask
            wspec((E, E)), wspec((1, E)),                         # wq, bq
            wspec((E, E)), wspec((1, E)),                         # wk, bk
            wspec((E, E)), wspec((1, E)),                         # wv, bv
            wspec((E, E)), wspec((1, E)),                         # wo, bo
            wspec((1, E)), wspec((1, E)),                         # ln gamma, beta
        ],
        out_specs=pl.BlockSpec((1, tq, E), lambda b, qi: (b, qi, 0)),
        compiler_params=pltpu.CompilerParams(
            dimension_semantics=("parallel", "parallel"),
            vmem_limit_bytes=VMEM_LIMIT_BYTES),
    )(x_q, x_kv, key_pad_mask,
      p["wq"], p["bq"].reshape(1, E), p["wk"], p["bk"].reshape(1, E),
      p["wv"], p["bv"].reshape(1, E), p["wo"], p["bo"].reshape(1, E),
      ln["g"].reshape(1, E), ln["b"].reshape(1, E))


def ffn_block(x3d, lp, ln):
    """Fused FFN + residual + LayerNorm, gridded over rows (B*S, padded)."""
    B, S, E = x3d.shape
    F = lp["w1"].shape[1]
    M = B * S
    tm, Mp = _row_tile(M, 512)

    x2d = x3d.reshape(M, E)
    if Mp != M:
        x2d = jnp.pad(x2d, ((0, Mp - M), (0, 0)))

    def wspec(shape):
        return pl.BlockSpec(shape, lambda i: (0, 0))

    out = pl.pallas_call(
        _ffn_block_kernel,
        out_shape=jax.ShapeDtypeStruct((Mp, E), jnp.bfloat16),
        grid=(Mp // tm,),
        in_specs=[
            pl.BlockSpec((tm, E), lambda i: (i, 0)),
            wspec((E, F)), wspec((1, F)),
            wspec((F, E)), wspec((1, E)),
            wspec((1, E)), wspec((1, E)),
        ],
        out_specs=pl.BlockSpec((tm, E), lambda i: (i, 0)),
        compiler_params=pltpu.CompilerParams(
            dimension_semantics=("parallel",),
            vmem_limit_bytes=VMEM_LIMIT_BYTES),
    )(x2d, lp["w1"], lp["b1"].reshape(1, F),
      lp["w2"], lp["b2"].reshape(1, E),
      ln["g"].reshape(1, E), ln["b"].reshape(1, E))
    if Mp != M:
        out = out[:M]
    return out.reshape(B, S, E)


def layernorm(x3d, lnp):
    """Plain LayerNorm (no residual stream), gridded over rows."""
    B, S, E = x3d.shape
    M = B * S
    tm, Mp = _row_tile(M, 512)
    x2d = x3d.reshape(M, E)
    if Mp != M:
        x2d = jnp.pad(x2d, ((0, Mp - M), (0, 0)))
    out = pl.pallas_call(
        _ln_kernel,
        out_shape=jax.ShapeDtypeStruct((Mp, E), jnp.bfloat16),
        grid=(Mp // tm,),
        in_specs=[pl.BlockSpec((tm, E), lambda i: (i, 0)),
                  pl.BlockSpec((1, E), lambda i: (0, 0)),
                  pl.BlockSpec((1, E), lambda i: (0, 0))],
        out_specs=pl.BlockSpec((tm, E), lambda i: (i, 0)),
        compiler_params=pltpu.CompilerParams(
            dimension_semantics=("parallel",)),
    )(x2d, lnp["g"].reshape(1, E), lnp["b"].reshape(1, E))
    if Mp != M:
        out = out[:M]
    return out.reshape(B, S, E)


def linear(x2d, w, b, tm_target=512, tn_target=1024):
    """Tiled linear (generator head): grid over rows and output columns,
    padded so tiling / lane-dense stores always engage."""
    M, K = x2d.shape
    N = w.shape[1]
    tm, Mp = _row_tile(M, tm_target)
    tn, Np = _col_tile(N, tn_target)
    if Mp != M:
        x2d = jnp.pad(x2d, ((0, Mp - M), (0, 0)))
    if Np != N:
        # TODO(synk): real code would pad the vocab head once at init time.
        w = jnp.pad(w, ((0, 0), (0, Np - N)))
        b = jnp.pad(b, (0, Np - N))
    out = pl.pallas_call(
        _linear_kernel,
        out_shape=jax.ShapeDtypeStruct((Mp, Np), jnp.float32),
        grid=(Mp // tm, Np // tn),
        in_specs=[pl.BlockSpec((tm, K), lambda i, j: (i, 0)),
                  pl.BlockSpec((K, tn), lambda i, j: (0, j)),
                  pl.BlockSpec((1, tn), lambda i, j: (0, j))],
        out_specs=pl.BlockSpec((tm, tn), lambda i, j: (i, j)),
        compiler_params=pltpu.CompilerParams(
            dimension_semantics=("parallel", "parallel"),
            vmem_limit_bytes=VMEM_LIMIT_BYTES),
    )(x2d, w, b.reshape(1, Np))
    return out[:M, :N]


# ----------------------------- model glue (JAX) ----------------------------

def pos_embedding_table(max_len, E):
    inv = jnp.exp(-jnp.arange(0, E, 2, dtype=jnp.float32)
                  * (math.log(10000.0) / E))
    pos = jnp.arange(max_len, dtype=jnp.float32)[:, None]
    pe = jnp.zeros((max_len, E), jnp.float32)
    pe = pe.at[:, 0::2].set(jnp.sin(pos * inv))
    pe = pe.at[:, 1::2].set(jnp.cos(pos * inv))
    return pe


def embed(tokens, table, pe, E):
    S = tokens.shape[1]
    # dropout: eval-mode identity
    return jnp.take(table, tokens, axis=0) * math.sqrt(E) + pe[:S][None]


def make_key_padding_masks(src_tokens, tgt_tokens):
    """Additive key-padding masks, (B, 1, S) each; causal part is in-kernel."""
    src_pad = jnp.where(src_tokens == PAD_IDX, NEG_INF,
                        0.0).astype(jnp.float32)[:, None, :]
    tgt_pad = jnp.where(tgt_tokens == PAD_IDX, NEG_INF,
                        0.0).astype(jnp.float32)[:, None, :]
    return src_pad, tgt_pad


def transformer_forward(params, src_indices, tgt_indices, cfg):
    E, H = cfg["emb_size"], cfg["nhead"]
    tgt_input = tgt_indices[:, :-1]
    src_pad_m, tgt_pad_m = make_key_padding_masks(src_indices, tgt_input)

    pe = pos_embedding_table(cfg["max_len"], E)
    # bf16 residual stream between kernels (math stays f32 inside kernels)
    x = embed(src_indices, params["src_emb"], pe, E).astype(jnp.bfloat16)
    y = embed(tgt_input, params["tgt_emb"], pe, E).astype(jnp.bfloat16)

    # encoder (post-norm layers + final norm)
    for lp in params["enc"]:
        x = mha_block(x, x, lp["self_attn"], lp["norm1"], src_pad_m, H,
                      causal=False)
        x = ffn_block(x, lp, lp["norm2"])
    memory = layernorm(x, params["enc_norm"])

    # decoder (post-norm layers + final norm)
    for lp in params["dec"]:
        y = mha_block(y, y, lp["self_attn"], lp["norm1"], tgt_pad_m, H,
                      causal=True)
        y = mha_block(y, memory, lp["cross_attn"], lp["norm2"], src_pad_m, H,
                      causal=False)
        y = ffn_block(y, lp, lp["norm3"])
    y = layernorm(y, params["dec_norm"])

    B, St, _ = y.shape
    logits = linear(y.reshape(B * St, E), params["gen_w"], params["gen_b"])
    return logits.reshape(B, St, cfg["tgt_vocab"])


def init_params(key, cfg):
    E, F = cfg["emb_size"], cfg["dim_feedforward"]
    keys = iter(jax.random.split(key, 256))
    bf = jnp.bfloat16

    def xav(shape, dtype=jnp.float32):
        a = math.sqrt(6.0 / (shape[0] + shape[1]))
        return jax.random.uniform(next(keys), shape, jnp.float32, -a, a).astype(dtype)

    def mha_p():
        return dict(wq=xav((E, E), bf), bq=jnp.zeros(E, jnp.float32),
                    wk=xav((E, E), bf), bk=jnp.zeros(E, jnp.float32),
                    wv=xav((E, E), bf), bv=jnp.zeros(E, jnp.float32),
                    wo=xav((E, E), bf), bo=jnp.zeros(E, jnp.float32))

    def ln_p():
        return dict(g=jnp.ones(E, jnp.float32), b=jnp.zeros(E, jnp.float32))

    def enc_layer():
        return dict(self_attn=mha_p(), norm1=ln_p(), norm2=ln_p(),
                    w1=xav((E, F), bf), b1=jnp.zeros(F, jnp.float32),
                    w2=xav((F, E), bf), b2=jnp.zeros(E, jnp.float32))

    def dec_layer():
        return dict(self_attn=mha_p(), cross_attn=mha_p(),
                    norm1=ln_p(), norm2=ln_p(), norm3=ln_p(),
                    w1=xav((E, F), bf), b1=jnp.zeros(F, jnp.float32),
                    w2=xav((F, E), bf), b2=jnp.zeros(E, jnp.float32))

    return dict(
        src_emb=xav((cfg["src_vocab"], E)),
        tgt_emb=xav((cfg["tgt_vocab"], E)),
        enc=[enc_layer() for _ in range(cfg["num_encoder_layers"])],
        dec=[dec_layer() for _ in range(cfg["num_decoder_layers"])],
        enc_norm=ln_p(), dec_norm=ln_p(),
        gen_w=xav((E, cfg["tgt_vocab"]), bf),
        gen_b=jnp.zeros(cfg["tgt_vocab"], jnp.float32),
    )


if __name__ == "__main__":
    cfg = dict(src_vocab=16, tgt_vocab=16, max_len=16,
               num_encoder_layers=2, num_decoder_layers=2,
               emb_size=32, nhead=4, dim_feedforward=64)
    # NOTE: with emb_size=32 every vreg/MXU tile is mostly lane padding; real
    # configs should use E (and vocab) as multiples of 128 for full utilization.

    key = jax.random.PRNGKey(0)
    pkey, skey, tkey = jax.random.split(key, 3)
    params = init_params(pkey, cfg)

    B, Ss, St = 2, 8, 8
    # tokens in [1, vocab) so nothing hits PAD_IDX in the demo batch
    src_indices = jax.random.randint(skey, (B, Ss), 1, cfg["src_vocab"],
                                     dtype=jnp.int32)
    tgt_indices = jax.random.randint(tkey, (B, St), 1, cfg["tgt_vocab"],
                                     dtype=jnp.int32)

    fwd = jax.jit(functools.partial(transformer_forward, cfg=cfg))
    out = fwd(params, src_indices, tgt_indices)
    out = jax.block_until_ready(out)

    assert out.shape == (B, St - 1, cfg["tgt_vocab"])
    assert bool(jnp.all(jnp.isfinite(out)))
    print("KERNEL_OK")
</pallas_src>

<mosaic_0001>
module attributes {stable_mosaic.version = 11 : i64} {
  func.func @_mha_block_kernel(%arg0: i32, %arg1: i32, %arg2: memref<1x8x32xbf16, #tpu.memory_space<vmem>>, %arg3: memref<1x8x32xbf16, #tpu.memory_space<vmem>>, %arg4: memref<1x1x8xf32, #tpu.memory_space<vmem>>, %arg5: memref<32x32xbf16, #tpu.memory_space<vmem>>, %arg6: memref<1x32xf32, #tpu.memory_space<vmem>>, %arg7: memref<32x32xbf16, #tpu.memory_space<vmem>>, %arg8: memref<1x32xf32, #tpu.memory_space<vmem>>, %arg9: memref<32x32xbf16, #tpu.memory_space<vmem>>, %arg10: memref<1x32xf32, #tpu.memory_space<vmem>>, %arg11: memref<32x32xbf16, #tpu.memory_space<vmem>>, %arg12: memref<1x32xf32, #tpu.memory_space<vmem>>, %arg13: memref<1x32xf32, #tpu.memory_space<vmem>>, %arg14: memref<1x32xf32, #tpu.memory_space<vmem>>, %arg15: memref<1x8x32xbf16, #tpu.memory_space<vmem>>) attributes {dimension_semantics = [#tpu.dimension_semantics<parallel>, #tpu.dimension_semantics<parallel>], iteration_bounds = array<i64: 2, 1>, scalar_prefetch = 0 : i64, scratch_operands = 0 : i64, tpu.core_type = #tpu.core_type<tc>, window_params = [{transform_indices = @transform_0, window_bounds = array<i64: 1, 8, 32>}, {transform_indices = @transform_1, window_bounds = array<i64: 1, 8, 32>}, {transform_indices = @transform_2, window_bounds = array<i64: 1, 1, 8>}, {pipeline_mode = #tpu.pipeline_mode<synchronous>, transform_indices = @transform_3, window_bounds = array<i64: 32, 32>}, {pipeline_mode = #tpu.pipeline_mode<synchronous>, transform_indices = @transform_4, window_bounds = array<i64: 1, 32>}, {pipeline_mode = #tpu.pipeline_mode<synchronous>, transform_indices = @transform_5, window_bounds = array<i64: 32, 32>}, {pipeline_mode = #tpu.pipeline_mode<synchronous>, transform_indices = @transform_6, window_bounds = array<i64: 1, 32>}, {pipeline_mode = #tpu.pipeline_mode<synchronous>, transform_indices = @transform_7, window_bounds = array<i64: 32, 32>}, {pipeline_mode = #tpu.pipeline_mode<synchronous>, transform_indices = @transform_8, window_bounds = array<i64: 1, 32>}, {pipeline_mode = #tpu.pipeline_mode<synchronous>, transform_indices = @transform_9, window_bounds = array<i64: 32, 32>}, {pipeline_mode = #tpu.pipeline_mode<synchronous>, transform_indices = @transform_10, window_bounds = array<i64: 1, 32>}, {pipeline_mode = #tpu.pipeline_mode<synchronous>, transform_indices = @transform_11, window_bounds = array<i64: 1, 32>}, {pipeline_mode = #tpu.pipeline_mode<synchronous>, transform_indices = @transform_12, window_bounds = array<i64: 1, 32>}, {transform_indices = @transform_13, window_bounds = array<i64: 1, 8, 32>}]} {
    %c0 = arith.constant 0 : index
    %c0_0 = arith.constant 0 : index
    %c0_1 = arith.constant 0 : index
    %0 = vector.load %arg2[%c0, %c0_0, %c0_1] : memref<1x8x32xbf16, #tpu.memory_space<vmem>>, vector<1x8x32xbf16>
    %1 = vector.shape_cast %0 : vector<1x8x32xbf16> to vector<8x32xbf16>
    %2 = arith.extf %1 : vector<8x32xbf16> to vector<8x32xf32>
    %c0_2 = arith.constant 0 : index
    %c0_3 = arith.constant 0 : index
    %c0_4 = arith.constant 0 : index
    %3 = vector.load %arg2[%c0_2, %c0_3, %c0_4] : memref<1x8x32xbf16, #tpu.memory_space<vmem>>, vector<1x8x32xbf16>
    %4 = vector.shape_cast %3 : vector<1x8x32xbf16> to vector<8x32xbf16>
    %c0_5 = arith.constant 0 : index
    %c0_6 = arith.constant 0 : index
    %c0_7 = arith.constant 0 : index
    %5 = vector.load %arg3[%c0_5, %c0_6, %c0_7] : memref<1x8x32xbf16, #tpu.memory_space<vmem>>, vector<1x8x32xbf16>
    %6 = vector.shape_cast %5 : vector<1x8x32xbf16> to vector<8x32xbf16>
    %c0_8 = arith.constant 0 : index
    %c0_9 = arith.constant 0 : index
    %7 = vector.load %arg5[%c0_8, %c0_9] : memref<32x32xbf16, #tpu.memory_space<vmem>>, vector<32x32xbf16>
    %cst = arith.constant dense<0.000000e+00> : vector<8x32xf32>
    %8 = tpu.matmul %4, %7, %cst {dimension_numbers = #tpu.dot_dimension_numbers<[1], [0], [0], [1], [0, 0, 1, 1], [], []>} : vector<8x32xbf16>, vector<32x32xbf16>, vector<8x32xf32> -> vector<8x32xf32>
    %c0_10 = arith.constant 0 : index
    %c0_11 = arith.constant 0 : index
    %9 = vector.load %arg6[%c0_10, %c0_11] : memref<1x32xf32, #tpu.memory_space<vmem>>, vector<1x32xf32>
    %10 = vector.broadcast %9 : vector<1x32xf32> to vector<8x32xf32>
    %11 = arith.addf %8, %10 : vector<8x32xf32>
    %cst_12 = arith.constant 0.353553385 : f32
    %12 = vector.broadcast %cst_12 : f32 to vector<8x32xf32>
    %13 = arith.mulf %11, %12 : vector<8x32xf32>
    %14 = arith.truncf %13 : vector<8x32xf32> to vector<8x32xbf16>
    %c0_13 = arith.constant 0 : index
    %c0_14 = arith.constant 0 : index
    %15 = vector.load %arg7[%c0_13, %c0_14] : memref<32x32xbf16, #tpu.memory_space<vmem>>, vector<32x32xbf16>
    %cst_15 = arith.constant dense<0.000000e+00> : vector<8x32xf32>
    %16 = tpu.matmul %6, %15, %cst_15 {dimension_numbers = #tpu.dot_dimension_numbers<[1], [0], [0], [1], [0, 0, 1, 1], [], []>} : vector<8x32xbf16>, vector<32x32xbf16>, vector<8x32xf32> -> vector<8x32xf32>
    %c0_16 = arith.constant 0 : index
    %c0_17 = arith.constant 0 : index
    %17 = vector.load %arg8[%c0_16, %c0_17] : memref<1x32xf32, #tpu.memory_space<vmem>>, vector<1x32xf32>
    %18 = vector.broadcast %17 : vector<1x32xf32> to vector<8x32xf32>
    %19 = arith.addf %16, %18 : vector<8x32xf32>
    %20 = arith.truncf %19 : vector<8x32xf32> to vector<8x32xbf16>
    %c0_18 = arith.constant 0 : index
    %c0_19 = arith.constant 0 : index
    %21 = vector.load %arg9[%c0_18, %c0_19] : memref<32x32xbf16, #tpu.memory_space<vmem>>, vector<32x32xbf16>
    %cst_20 = arith.constant dense<0.000000e+00> : vector<8x32xf32>
    %22 = tpu.matmul %6, %21, %cst_20 {dimension_numbers = #tpu.dot_dimension_numbers<[1], [0], [0], [1], [0, 0, 1, 1], [], []>} : vector<8x32xbf16>, vector<32x32xbf16>, vector<8x32xf32> -> vector<8x32xf32>
    %c0_21 = arith.constant 0 : index
    %c0_22 = arith.constant 0 : index
    %23 = vector.load %arg10[%c0_21, %c0_22] : memref<1x32xf32, #tpu.memory_space<vmem>>, vector<1x32xf32>
    %24 = vector.broadcast %23 : vector<1x32xf32> to vector<8x32xf32>
    %25 = arith.addf %22, %24 : vector<8x32xf32>
    %26 = arith.truncf %25 : vector<8x32xf32> to vector<8x32xbf16>
    %c0_23 = arith.constant 0 : index
    %c0_24 = arith.constant 0 : index
    %c0_25 = arith.constant 0 : index
    %27 = vector.load %arg4[%c0_23, %c0_24, %c0_25] : memref<1x1x8xf32, #tpu.memory_space<vmem>>, vector<1x1x8xf32>
    %28 = vector.shape_cast %27 : vector<1x1x8xf32> to vector<1x8xf32>
    %29 = vector.extract_strided_slice %14 {offsets = [0, 0], sizes = [8, 8], strides = [1, 1]} : vector<8x32xbf16> to vector<8x8xbf16>
    %30 = vector.extract_strided_slice %20 {offsets = [0, 0], sizes = [8, 8], strides = [1, 1]} : vector<8x32xbf16> to vector<8x8xbf16>
    %31 = vector.extract_strided_slice %26 {offsets = [0, 0], sizes = [8, 8], strides = [1, 1]} : vector<8x32xbf16> to vector<8x8xbf16>
    %cst_26 = arith.constant dense<0.000000e+00> : vector<8x8xf32>
    %32 = tpu.matmul %29, %30, %cst_26 {dimension_numbers = #tpu.dot_dimension_numbers<[1], [1], [0], [0], [0, 0, 1, 0], [], []>} : vector<8x8xbf16>, vector<8x8xbf16>, vector<8x8xf32> -> vector<8x8xf32>
    %33 = vector.broadcast %28 : vector<1x8xf32> to vector<8x8xf32>
    %34 = arith.addf %32, %33 : vector<8x8xf32>
    %cst_27 = arith.constant dense<0xFF800000> : vector<8xf32>
    %35 = vector.multi_reduction <maximumf>, %34, %cst_27 [1] : vector<8x8xf32> to vector<8xf32>
    %36 = vector.shape_cast %35 : vector<8xf32> to vector<8x1xf32>
    %37 = vector.broadcast %36 : vector<8x1xf32> to vector<8x8xf32>
    %38 = arith.subf %34, %37 : vector<8x8xf32>
    %39 = math.exp %38 : vector<8x8xf32>
    %cst_28 = arith.constant dense<0.000000e+00> : vector<8xf32>
    %40 = vector.multi_reduction <add>, %39, %cst_28 [1] : vector<8x8xf32> to vector<8xf32>
    %41 = vector.shape_cast %40 : vector<8xf32> to vector<8x1xf32>
    %42 = tpu.reciprocal %41 {approx = true} : vector<8x1xf32> -> vector<8x1xf32>
    %43 = vector.broadcast %42 : vector<8x1xf32> to vector<8x8xf32>
    %44 = arith.mulf %39, %43 : vector<8x8xf32>
    %45 = arith.truncf %44 : vector<8x8xf32> to vector<8x8xbf16>
    %cst_29 = arith.constant dense<0.000000e+00> : vector<8x8xf32>
    %46 = tpu.matmul %45, %31, %cst_29 {dimension_numbers = #tpu.dot_dimension_numbers<[1], [0], [0], [1], [0, 0, 1, 1], [], []>} : vector<8x8xbf16>, vector<8x8xbf16>, vector<8x8xf32> -> vector<8x8xf32>
    %47 = vector.extract_strided_slice %14 {offsets = [0, 8], sizes = [8, 8], strides = [1, 1]} : vector<8x32xbf16> to vector<8x8xbf16>
    %48 = vector.extract_strided_slice %20 {offsets = [0, 8], sizes = [8, 8], strides = [1, 1]} : vector<8x32xbf16> to vector<8x8xbf16>
    %49 = vector.extract_strided_slice %26 {offsets = [0, 8], sizes = [8, 8], strides = [1, 1]} : vector<8x32xbf16> to vector<8x8xbf16>
    %cst_30 = arith.constant dense<0.000000e+00> : vector<8x8xf32>
    %50 = tpu.matmul %47, %48, %cst_30 {dimension_numbers = #tpu.dot_dimension_numbers<[1], [1], [0], [0], [0, 0, 1, 0], [], []>} : vector<8x8xbf16>, vector<8x8xbf16>, vector<8x8xf32> -> vector<8x8xf32>
    %51 = vector.broadcast %28 : vector<1x8xf32> to vector<8x8xf32>
    %52 = arith.addf %50, %51 : vector<8x8xf32>
    %cst_31 = arith.constant dense<0xFF800000> : vector<8xf32>
    %53 = vector.multi_reduction <maximumf>, %52, %cst_31 [1] : vector<8x8xf32> to vector<8xf32>
    %54 = vector.shape_cast %53 : vector<8xf32> to vector<8x1xf32>
    %55 = vector.broadcast %54 : vector<8x1xf32> to vector<8x8xf32>
    %56 = arith.subf %52, %55 : vector<8x8xf32>
    %57 = math.exp %56 : vector<8x8xf32>
    %cst_32 = arith.constant dense<0.000000e+00> : vector<8xf32>
    %58 = vector.multi_reduction <add>, %57, %cst_32 [1] : vector<8x8xf32> to vector<8xf32>
    %59 = vector.shape_cast %58 : vector<8xf32> to vector<8x1xf32>
    %60 = tpu.reciprocal %59 {approx = true} : vector<8x1xf32> -> vector<8x1xf32>
    %61 = vector.broadcast %60 : vector<8x1xf32> to vector<8x8xf32>
    %62 = arith.mulf %57, %61 : vector<8x8xf32>
    %63 = arith.truncf %62 : vector<8x8xf32> to vector<8x8xbf16>
    %cst_33 = arith.constant dense<0.000000e+00> : vector<8x8xf32>
    %64 = tpu.matmul %63, %49, %cst_33 {dimension_numbers = #tpu.dot_dimension_numbers<[1], [0], [0], [1], [0, 0, 1, 1], [], []>} : vector<8x8xbf16>, vector<8x8xbf16>, vector<8x8xf32> -> vector<8x8xf32>
    %65 = vector.extract_strided_slice %14 {offsets = [0, 16], sizes = [8, 8], strides = [1, 1]} : vector<8x32xbf16> to vector<8x8xbf16>
    %66 = vector.extract_strided_slice %20 {offsets = [0, 16], sizes = [8, 8], strides = [1, 1]} : vector<8x32xbf16> to vector<8x8xbf16>
    %67 = vector.extract_strided_slice %26 {offsets = [0, 16], sizes = [8, 8], strides = [1, 1]} : vector<8x32xbf16> to vector<8x8xbf16>
    %cst_34 = arith.constant dense<0.000000e+00> : vector<8x8xf32>
    %68 = tpu.matmul %65, %66, %cst_34 {dimension_numbers = #tpu.dot_dimension_numbers<[1], [1], [0], [0], [0, 0, 1, 0], [], []>} : vector<8x8xbf16>, vector<8x8xbf16>, vector<8x8xf32> -> vector<8x8xf32>
    %69 = vector.broadcast %28 : vector<1x8xf32> to vector<8x8xf32>
    %70 = arith.addf %68, %69 : vector<8x8xf32>
    %cst_35 = arith.constant dense<0xFF800000> : vector<8xf32>
    %71 = vector.multi_reduction <maximumf>, %70, %cst_35 [1] : vector<8x8xf32> to vector<8xf32>
    %72 = vector.shape_cast %71 : vector<8xf32> to vector<8x1xf32>
    %73 = vector.broadcast %72 : vector<8x1xf32> to vector<8x8xf32>
    %74 = arith.subf %70, %73 : vector<8x8xf32>
    %75 = math.exp %74 : vector<8x8xf32>
    %cst_36 = arith.constant dense<0.000000e+00> : vector<8xf32>
    %76 = vector.multi_reduction <add>, %75, %cst_36 [1] : vector<8x8xf32> to vector<8xf32>
    %77 = vector.shape_cast %76 : vector<8xf32> to vector<8x1xf32>
    %78 = tpu.reciprocal %77 {approx = true} : vector<8x1xf32> -> vector<8x1xf32>
    %79 = vector.broadcast %78 : vector<8x1xf32> to vector<8x8xf32>
    %80 = arith.mulf %75, %79 : vector<8x8xf32>
    %81 = arith.truncf %80 : vector<8x8xf32> to vector<8x8xbf16>
    %cst_37 = arith.constant dense<0.000000e+00> : vector<8x8xf32>
    %82 = tpu.matmul %81, %67, %cst_37 {dimension_numbers = #tpu.dot_dimension_numbers<[1], [0], [0], [1], [0, 0, 1, 1], [], []>} : vector<8x8xbf16>, vector<8x8xbf16>, vector<8x8xf32> -> vector<8x8xf32>
    %83 = vector.extract_strided_slice %14 {offsets = [0, 24], sizes = [8, 8], strides = [1, 1]} : vector<8x32xbf16> to vector<8x8xbf16>
    %84 = vector.extract_strided_slice %20 {offsets = [0, 24], sizes = [8, 8], strides = [1, 1]} : vector<8x32xbf16> to vector<8x8xbf16>
    %85 = vector.extract_strided_slice %26 {offsets = [0, 24], sizes = [8, 8], strides = [1, 1]} : vector<8x32xbf16> to vector<8x8xbf16>
    %cst_38 = arith.constant dense<0.000000e+00> : vector<8x8xf32>
    %86 = tpu.matmul %83, %84, %cst_38 {dimension_numbers = #tpu.dot_dimension_numbers<[1], [1], [0], [0], [0, 0, 1, 0], [], []>} : vector<8x8xbf16>, vector<8x8xbf16>, vector<8x8xf32> -> vector<8x8xf32>
    %87 = vector.broadcast %28 : vector<1x8xf32> to vector<8x8xf32>
    %88 = arith.addf %86, %87 : vector<8x8xf32>
    %cst_39 = arith.constant dense<0xFF800000> : vector<8xf32>
    %89 = vector.multi_reduction <maximumf>, %88, %cst_39 [1] : vector<8x8xf32> to vector<8xf32>
    %90 = vector.shape_cast %89 : vector<8xf32> to vector<8x1xf32>
    %91 = vector.broadcast %90 : vector<8x1xf32> to vector<8x8xf32>
    %92 = arith.subf %88, %91 : vector<8x8xf32>
    %93 = math.exp %92 : vector<8x8xf32>
    %cst_40 = arith.constant dense<0.000000e+00> : vector<8xf32>
    %94 = vector.multi_reduction <add>, %93, %cst_40 [1] : vector<8x8xf32> to vector<8xf32>
    %95 = vector.shape_cast %94 : vector<8xf32> to vector<8x1xf32>
    %96 = tpu.reciprocal %95 {approx = true} : vector<8x1xf32> -> vector<8x1xf32>
    %97 = vector.broadcast %96 : vector<8x1xf32> to vector<8x8xf32>
    %98 = arith.mulf %93, %97 : vector<8x8xf32>
    %99 = arith.truncf %98 : vector<8x8xf32> to vector<8x8xbf16>
    %cst_41 = arith.constant dense<0.000000e+00> : vector<8x8xf32>
    %100 = tpu.matmul %99, %85, %cst_41 {dimension_numbers = #tpu.dot_dimension_numbers<[1], [0], [0], [1], [0, 0, 1, 1], [], []>} : vector<8x8xbf16>, vector<8x8xbf16>, vector<8x8xf32> -> vector<8x8xf32>
    %101 = tpu.concatenate %46, %64, %82, %100 in 1 : vector<8x8xf32>, vector<8x8xf32>, vector<8x8xf32>, vector<8x8xf32> -> vector<8x32xf32>
    %102 = arith.truncf %101 : vector<8x32xf32> to vector<8x32xbf16>
    %c0_42 = arith.constant 0 : index
    %c0_43 = arith.constant 0 : index
    %103 = vector.load %arg11[%c0_42, %c0_43] : memref<32x32xbf16, #tpu.memory_space<vmem>>, vector<32x32xbf16>
    %cst_44 = arith.constant dense<0.000000e+00> : vector<8x32xf32>
    %104 = tpu.matmul %102, %103, %cst_44 {dimension_numbers = #tpu.dot_dimension_numbers<[1], [0], [0], [1], [0, 0, 1, 1], [], []>} : vector<8x32xbf16>, vector<32x32xbf16>, vector<8x32xf32> -> vector<8x32xf32>
    %c0_45 = arith.constant 0 : index
    %c0_46 = arith.constant 0 : index
    %105 = vector.load %arg12[%c0_45, %c0_46] : memref<1x32xf32, #tpu.memory_space<vmem>>, vector<1x32xf32>
    %106 = vector.broadcast %105 : vector<1x32xf32> to vector<8x32xf32>
    %107 = arith.addf %104, %106 : vector<8x32xf32>
    %108 = arith.addf %2, %107 : vector<8x32xf32>
    %c0_47 = arith.constant 0 : index
    %c0_48 = arith.constant 0 : index
    %109 = vector.load %arg13[%c0_47, %c0_48] : memref<1x32xf32, #tpu.memory_space<vmem>>, vector<1x32xf32>
    %c0_49 = arith.constant 0 : index
    %c0_50 = arith.constant 0 : index
    %110 = vector.load %arg14[%c0_49, %c0_50] : memref<1x32xf32, #tpu.memory_space<vmem>>, vector<1x32xf32>
    %cst_51 = arith.constant dense<0.000000e+00> : vector<8xf32>
    %111 = vector.multi_reduction <add>, %108, %cst_51 [1] : vector<8x32xf32> to vector<8xf32>
    %112 = vector.shape_cast %111 : vector<8xf32> to vector<8x1xf32>
    %cst_52 = arith.constant 3.200000e+01 : f32
    %113 = vector.broadcast %cst_52 : f32 to vector<8x1xf32>
    %114 = arith.divf %112, %113 : vector<8x1xf32>
    %115 = vector.broadcast %114 : vector<8x1xf32> to vector<8x32xf32>
    %116 = arith.subf %108, %115 : vector<8x32xf32>
    %117 = arith.mulf %116, %116 : vector<8x32xf32>
    %cst_53 = arith.constant dense<0.000000e+00> : vector<8xf32>
    %118 = vector.multi_reduction <add>, %117, %cst_53 [1] : vector<8x32xf32> to vector<8xf32>
    %119 = vector.shape_cast %118 : vector<8xf32> to vector<8x1xf32>
    %cst_54 = arith.constant 3.200000e+01 : f32
    %120 = vector.broadcast %cst_54 : f32 to vector<8x1xf32>
    %121 = arith.divf %119, %120 : vector<8x1xf32>
    %122 = vector.broadcast %114 : vector<8x1xf32> to vector<8x32xf32>
    %123 = arith.subf %108, %122 : vector<8x32xf32>
    %cst_55 = arith.constant 9.99999974E-6 : f32
    %124 = vector.broadcast %cst_55 : f32 to vector<8x1xf32>
    %125 = arith.addf %121, %124 : vector<8x1xf32>
    %126 = math.rsqrt %125 : vector<8x1xf32>
    %127 = vector.broadcast %126 : vector<8x1xf32> to vector<8x32xf32>
    %128 = arith.mulf %123, %127 : vector<8x32xf32>
    %129 = vector.broadcast %109 : vector<1x32xf32> to vector<8x32xf32>
    %130 = arith.mulf %128, %129 : vector<8x32xf32>
    %131 = vector.broadcast %110 : vector<1x32xf32> to vector<8x32xf32>
    %132 = arith.addf %130, %131 : vector<8x32xf32>
    %133 = arith.truncf %132 : vector<8x32xf32> to vector<8x32xbf16>
    %c0_56 = arith.constant 0 : index
    %c0_57 = arith.constant 0 : index
    %c0_58 = arith.constant 0 : index
    %134 = vector.load %arg15[%c0_56, %c0_57, %c0_58] : memref<1x8x32xbf16, #tpu.memory_space<vmem>>, vector<1x8x32xbf16>
    %135 = vector.shape_cast %134 : vector<1x8x32xbf16> to vector<8x32xbf16>
    %136 = vector.shape_cast %133 : vector<8x32xbf16> to vector<1x8x32xbf16>
    tpu.vector_store %arg15[%c0_56, %c0_57, %c0_58], %136 {strides = array<i32>} : memref<1x8x32xbf16, #tpu.memory_space<vmem>>, vector<1x8x32xbf16>,
    return
  }
  func.func @transform_0(%arg0: i32, %arg1: i32) -> (i32, i32, i32) {
    %c0_i32 = arith.constant 0 : i32
    %c0_i32_0 = arith.constant 0 : i32
    return %arg0, %arg1, %c0_i32 : i32, i32, i32
  }
  func.func @transform_1(%arg0: i32, %arg1: i32) -> (i32, i32, i32) {
    %c0_i32 = arith.constant 0 : i32
    %c0_i32_0 = arith.constant 0 : i32
    %c0_i32_1 = arith.constant 0 : i32
    return %arg0, %c0_i32, %c0_i32_0 : i32, i32, i32
  }
  func.func @transform_2(%arg0: i32, %arg1: i32) -> (i32, i32, i32) {
    %c0_i32 = arith.constant 0 : i32
    %c0_i32_0 = arith.constant 0 : i32
    %c0_i32_1 = arith.constant 0 : i32
    return %arg0, %c0_i32, %c0_i32_0 : i32, i32, i32
  }
  func.func @transform_3(%arg0: i32, %arg1: i32) -> (i32, i32) {
    %c0_i32 = arith.constant 0 : i32
    %c0_i32_0 = arith.constant 0 : i32
    %c0_i32_1 = arith.constant 0 : i32
    return %c0_i32, %c0_i32_0 : i32, i32
  }
  func.func @transform_4(%arg0: i32, %arg1: i32) -> (i32, i32) {
    %c0_i32 = arith.constant 0 : i32
    %c0_i32_0 = arith.constant 0 : i32
    %c0_i32_1 = arith.constant 0 : i32
    return %c0_i32, %c0_i32_0 : i32, i32
  }
  func.func @transform_5(%arg0: i32, %arg1: i32) -> (i32, i32) {
    %c0_i32 = arith.constant 0 : i32
    %c0_i32_0 = arith.constant 0 : i32
    %c0_i32_1 = arith.constant 0 : i32
    return %c0_i32, %c0_i32_0 : i32, i32
  }
  func.func @transform_6(%arg0: i32, %arg1: i32) -> (i32, i32) {
    %c0_i32 = arith.constant 0 : i32
    %c0_i32_0 = arith.constant 0 : i32
    %c0_i32_1 = arith.constant 0 : i32
    return %c0_i32, %c0_i32_0 : i32, i32
  }
  func.func @transform_7(%arg0: i32, %arg1: i32) -> (i32, i32) {
    %c0_i32 = arith.constant 0 : i32
    %c0_i32_0 = arith.constant 0 : i32
    %c0_i32_1 = arith.constant 0 : i32
    return %c0_i32, %c0_i32_0 : i32, i32
  }
  func.func @transform_8(%arg0: i32, %arg1: i32) -> (i32, i32) {
    %c0_i32 = arith.constant 0 : i32
    %c0_i32_0 = arith.constant 0 : i32
    %c0_i32_1 = arith.constant 0 : i32
    return %c0_i32, %c0_i32_0 : i32, i32
  }
  func.func @transform_9(%arg0: i32, %arg1: i32) -> (i32, i32) {
    %c0_i32 = arith.constant 0 : i32
    %c0_i32_0 = arith.constant 0 : i32
    %c0_i32_1 = arith.constant 0 : i32
    return %c0_i32, %c0_i32_0 : i32, i32
  }
  func.func @transform_10(%arg0: i32, %arg1: i32) -> (i32, i32) {
    %c0_i32 = arith.constant 0 : i32
    %c0_i32_0 = arith.constant 0 : i32
    %c0_i32_1 = arith.constant 0 : i32
    return %c0_i32, %c0_i32_0 : i32, i32
  }
  func.func @transform_11(%arg0: i32, %arg1: i32) -> (i32, i32) {
    %c0_i32 = arith.constant 0 : i32
    %c0_i32_0 = arith.constant 0 : i32
    %c0_i32_1 = arith.constant 0 : i32
    return %c0_i32, %c0_i32_0 : i32, i32
  }
  func.func @transform_12(%arg0: i32, %arg1: i32) -> (i32, i32) {
    %c0_i32 = arith.constant 0 : i32
    %c0_i32_0 = arith.constant 0 : i32
    %c0_i32_1 = arith.constant 0 : i32
    return %c0_i32, %c0_i32_0 : i32, i32
  }
  func.func @transform_13(%arg0: i32, %arg1: i32) -> (i32, i32, i32) {
    %c0_i32 = arith.constant 0 : i32
    %c0_i32_0 = arith.constant 0 : i32
    return %arg0, %arg1, %c0_i32 : i32, i32, i32
  }
}

module attributes {stable_mosaic.version = 11 : i64} {
  func.func @_ffn_block_kernel(%arg0: i32, %arg1: memref<16x32xbf16, #tpu.memory_space<vmem>>, %arg2: memref<32x64xbf16, #tpu.memory_space<vmem>>, %arg3: memref<1x64xf32, #tpu.memory_space<vmem>>, %arg4: memref<64x32xbf16, #tpu.memory_space<vmem>>, %arg5: memref<1x32xf32, #tpu.memory_space<vmem>>, %arg6: memref<1x32xf32, #tpu.memory_space<vmem>>, %arg7: memref<1x32xf32, #tpu.memory_space<vmem>>, %arg8: memref<16x32xbf16, #tpu.memory_space<vmem>>) attributes {dimension_semantics = [#tpu.dimension_semantics<parallel>], iteration_bounds = array<i64: 1>, scalar_prefetch = 0 : i64, scratch_operands = 0 : i64, tpu.core_type = #tpu.core_type<tc>, window_params = [{transform_indices = @transform_0, window_bounds = array<i64: 16, 32>}, {pipeline_mode = #tpu.pipeline_mode<synchronous>, transform_indices = @transform_1, window_bounds = array<i64: 32, 64>}, {pipeline_mode = #tpu.pipeline_mode<synchronous>, transform_indices = @transform_2, window_bounds = array<i64: 1, 64>}, {pipeline_mode = #tpu.pipeline_mode<synchronous>, transform_indices = @transform_3, window_bounds = array<i64: 64, 32>}, {pipeline_mode = #tpu.pipeline_mode<synchronous>, transform_indices = @transform_4, window_bounds = array<i64: 1, 32>}, {pipeline_mode = #tpu.pipeline_mode<synchronous>, transform_indices = @transform_5, window_bounds = array<i64: 1, 32>}, {pipeline_mode = #tpu.pipeline_mode<synchronous>, transform_indices = @transform_6, window_bounds = array<i64: 1, 32>}, {transform_indices = @transform_7, window_bounds = array<i64: 16, 32>}]} {
    %c0 = arith.constant 0 : index
    %c0_0 = arith.constant 0 : index
    %0 = vector.load %arg1[%c0, %c0_0] : memref<16x32xbf16, #tpu.memory_space<vmem>>, vector<16x32xbf16>
    %1 = arith.extf %0 : vector<16x32xbf16> to vector<16x32xf32>
    %c0_1 = arith.constant 0 : index
    %c0_2 = arith.constant 0 : index
    %2 = vector.load %arg1[%c0_1, %c0_2] : memref<16x32xbf16, #tpu.memory_space<vmem>>, vector<16x32xbf16>
    %c0_3 = arith.constant 0 : index
    %c0_4 = arith.constant 0 : index
    %3 = vector.load %arg2[%c0_3, %c0_4] : memref<32x64xbf16, #tpu.memory_space<vmem>>, vector<32x64xbf16>
    %cst = arith.constant dense<0.000000e+00> : vector<16x64xf32>
    %4 = tpu.matmul %2, %3, %cst {dimension_numbers = #tpu.dot_dimension_numbers<[1], [0], [0], [1], [0, 0, 1, 1], [], []>} : vector<16x32xbf16>, vector<32x64xbf16>, vector<16x64xf32> -> vector<16x64xf32>
    %c0_5 = arith.constant 0 : index
    %c0_6 = arith.constant 0 : index
    %5 = vector.load %arg3[%c0_5, %c0_6] : memref<1x64xf32, #tpu.memory_space<vmem>>, vector<1x64xf32>
    %6 = vector.broadcast %5 : vector<1x64xf32> to vector<16x64xf32>
    %7 = arith.addf %4, %6 : vector<16x64xf32>
    %cst_7 = arith.constant 0.000000e+00 : f32
    %8 = vector.broadcast %cst_7 : f32 to vector<16x64xf32>
    %9 = arith.maximumf %7, %8 : vector<16x64xf32>
    %10 = arith.truncf %9 : vector<16x64xf32> to vector<16x64xbf16>
    %c0_8 = arith.constant 0 : index
    %c0_9 = arith.constant 0 : index
    %11 = vector.load %arg4[%c0_8, %c0_9] : memref<64x32xbf16, #tpu.memory_space<vmem>>, vector<64x32xbf16>
    %cst_10 = arith.constant dense<0.000000e+00> : vector<16x32xf32>
    %12 = tpu.matmul %10, %11, %cst_10 {dimension_numbers = #tpu.dot_dimension_numbers<[1], [0], [0], [1], [0, 0, 1, 1], [], []>} : vector<16x64xbf16>, vector<64x32xbf16>, vector<16x32xf32> -> vector<16x32xf32>
    %c0_11 = arith.constant 0 : index
    %c0_12 = arith.constant 0 : index
    %13 = vector.load %arg5[%c0_11, %c0_12] : memref<1x32xf32, #tpu.memory_space<vmem>>, vector<1x32xf32>
    %14 = vector.broadcast %13 : vector<1x32xf32> to vector<16x32xf32>
    %15 = arith.addf %12, %14 : vector<16x32xf32>
    %16 = arith.addf %1, %15 : vector<16x32xf32>
    %c0_13 = arith.constant 0 : index
    %c0_14 = arith.constant 0 : index
    %17 = vector.load %arg6[%c0_13, %c0_14] : memref<1x32xf32, #tpu.memory_space<vmem>>, vector<1x32xf32>
    %c0_15 = arith.constant 0 : index
    %c0_16 = arith.constant 0 : index
    %18 = vector.load %arg7[%c0_15, %c0_16] : memref<1x32xf32, #tpu.memory_space<vmem>>, vector<1x32xf32>
    %cst_17 = arith.constant dense<0.000000e+00> : vector<16xf32>
    %19 = vector.multi_reduction <add>, %16, %cst_17 [1] : vector<16x32xf32> to vector<16xf32>
    %20 = vector.shape_cast %19 : vector<16xf32> to vector<16x1xf32>
    %cst_18 = arith.constant 3.200000e+01 : f32
    %21 = vector.broadcast %cst_18 : f32 to vector<16x1xf32>
    %22 = arith.divf %20, %21 : vector<16x1xf32>
    %23 = vector.broadcast %22 : vector<16x1xf32> to vector<16x32xf32>
    %24 = arith.subf %16, %23 : vector<16x32xf32>
    %25 = arith.mulf %24, %24 : vector<16x32xf32>
    %cst_19 = arith.constant dense<0.000000e+00> : vector<16xf32>
    %26 = vector.multi_reduction <add>, %25, %cst_19 [1] : vector<16x32xf32> to vector<16xf32>
    %27 = vector.shape_cast %26 : vector<16xf32> to vector<16x1xf32>
    %cst_20 = arith.constant 3.200000e+01 : f32
    %28 = vector.broadcast %cst_20 : f32 to vector<16x1xf32>
    %29 = arith.divf %27, %28 : vector<16x1xf32>
    %30 = vector.broadcast %22 : vector<16x1xf32> to vector<16x32xf32>
    %31 = arith.subf %16, %30 : vector<16x32xf32>
    %cst_21 = arith.constant 9.99999974E-6 : f32
    %32 = vector.broadcast %cst_21 : f32 to vector<16x1xf32>
    %33 = arith.addf %29, %32 : vector<16x1xf32>
    %34 = math.rsqrt %33 : vector<16x1xf32>
    %35 = vector.broadcast %34 : vector<16x1xf32> to vector<16x32xf32>
    %36 = arith.mulf %31, %35 : vector<16x32xf32>
    %37 = vector.broadcast %17 : vector<1x32xf32> to vector<16x32xf32>
    %38 = arith.mulf %36, %37 : vector<16x32xf32>
    %39 = vector.broadcast %18 : vector<1x32xf32> to vector<16x32xf32>
    %40 = arith.addf %38, %39 : vector<16x32xf32>
    %41 = arith.truncf %40 : vector<16x32xf32> to vector<16x32xbf16>
    %c0_22 = arith.constant 0 : index
    %c0_23 = arith.constant 0 : index
    %42 = vector.load %arg8[%c0_22, %c0_23] : memref<16x32xbf16, #tpu.memory_space<vmem>>, vector<16x32xbf16>
    tpu.vector_store %arg8[%c0_22, %c0_23], %41 {strides = array<i32>} : memref<16x32xbf16, #tpu.memory_space<vmem>>, vector<16x32xbf16>,
    return
  }
  func.func @transform_0(%arg0: i32) -> (i32, i32) {
    %c0_i32 = arith.constant 0 : i32
    %c0_i32_0 = arith.constant 0 : i32
    return %arg0, %c0_i32 : i32, i32
  }
  func.func @transform_1(%arg0: i32) -> (i32, i32) {
    %c0_i32 = arith.constant 0 : i32
    %c0_i32_0 = arith.constant 0 : i32
    %c0_i32_1 = arith.constant 0 : i32
    return %c0_i32, %c0_i32_0 : i32, i32
  }
  func.func @transform_2(%arg0: i32) -> (i32, i32) {
    %c0_i32 = arith.constant 0 : i32
    %c0_i32_0 = arith.constant 0 : i32
    %c0_i32_1 = arith.constant 0 : i32
    return %c0_i32, %c0_i32_0 : i32, i32
  }
  func.func @transform_3(%arg0: i32) -> (i32, i32) {
    %c0_i32 = arith.constant 0 : i32
    %c0_i32_0 = arith.constant 0 : i32
    %c0_i32_1 = arith.constant 0 : i32
    return %c0_i32, %c0_i32_0 : i32, i32
  }
  func.func @transform_4(%arg0: i32) -> (i32, i32) {
    %c0_i32 = arith.constant 0 : i32
    %c0_i32_0 = arith.constant 0 : i32
    %c0_i32_1 = arith.constant 0 : i32
    return %c0_i32, %c0_i32_0 : i32, i32
  }
  func.func @transform_5(%arg0: i32) -> (i32, i32) {
    %c0_i32 = arith.constant 0 : i32
    %c0_i32_0 = arith.constant 0 : i32
    %c0_i32_1 = arith.constant 0 : i32
    return %c0_i32, %c0_i32_0 : i32, i32
  }
  func.func @transform_6(%arg0: i32) -> (i32, i32) {
    %c0_i32 = arith.constant 0 : i32
    %c0_i32_0 = arith.constant 0 : i32
    %c0_i32_1 = arith.constant 0 : i32
    return %c0_i32, %c0_i32_0 : i32, i32
  }
  func.func @transform_7(%arg0: i32) -> (i32, i32) {
    %c0_i32 = arith.constant 0 : i32
    %c0_i32_0 = arith.constant 0 : i32
    return %arg0, %c0_i32 : i32, i32
  }
}

module attributes {stable_mosaic.version = 11 : i64} {
  func.func @_ln_kernel(%arg0: i32, %arg1: memref<16x32xbf16, #tpu.memory_space<vmem>>, %arg2: memref<1x32xf32, #tpu.memory_space<vmem>>, %arg3: memref<1x32xf32, #tpu.memory_space<vmem>>, %arg4: memref<16x32xbf16, #tpu.memory_space<vmem>>) attributes {dimension_semantics = [#tpu.dimension_semantics<parallel>], iteration_bounds = array<i64: 1>, scalar_prefetch = 0 : i64, scratch_operands = 0 : i64, tpu.core_type = #tpu.core_type<tc>, window_params = [{transform_indices = @transform_0, window_bounds = array<i64: 16, 32>}, {pipeline_mode = #tpu.pipeline_mode<synchronous>, transform_indices = @transform_1, window_bounds = array<i64: 1, 32>}, {pipeline_mode = #tpu.pipeline_mode<synchronous>, transform_indices = @transform_2, window_bounds = array<i64: 1, 32>}, {transform_indices = @transform_3, window_bounds = array<i64: 16, 32>}]} {
    %c0 = arith.constant 0 : index
    %c0_0 = arith.constant 0 : index
    %0 = vector.load %arg1[%c0, %c0_0] : memref<16x32xbf16, #tpu.memory_space<vmem>>, vector<16x32xbf16>
    %1 = arith.extf %0 : vector<16x32xbf16> to vector<16x32xf32>
    %c0_1 = arith.constant 0 : index
    %c0_2 = arith.constant 0 : index
    %2 = vector.load %arg2[%c0_1, %c0_2] : memref<1x32xf32, #tpu.memory_space<vmem>>, vector<1x32xf32>
    %c0_3 = arith.constant 0 : index
    %c0_4 = arith.constant 0 : index
    %3 = vector.load %arg3[%c0_3, %c0_4] : memref<1x32xf32, #tpu.memory_space<vmem>>, vector<1x32xf32>
    %cst = arith.constant dense<0.000000e+00> : vector<16xf32>
    %4 = vector.multi_reduction <add>, %1, %cst [1] : vector<16x32xf32> to vector<16xf32>
    %5 = vector.shape_cast %4 : vector<16xf32> to vector<16x1xf32>
    %cst_5 = arith.constant 3.200000e+01 : f32
    %6 = vector.broadcast %cst_5 : f32 to vector<16x1xf32>
    %7 = arith.divf %5, %6 : vector<16x1xf32>
    %8 = vector.broadcast %7 : vector<16x1xf32> to vector<16x32xf32>
    %9 = arith.subf %1, %8 : vector<16x32xf32>
    %10 = arith.mulf %9, %9 : vector<16x32xf32>
    %cst_6 = arith.constant dense<0.000000e+00> : vector<16xf32>
    %11 = vector.multi_reduction <add>, %10, %cst_6 [1] : vector<16x32xf32> to vector<16xf32>
    %12 = vector.shape_cast %11 : vector<16xf32> to vector<16x1xf32>
    %cst_7 = arith.constant 3.200000e+01 : f32
    %13 = vector.broadcast %cst_7 : f32 to vector<16x1xf32>
    %14 = arith.divf %12, %13 : vector<16x1xf32>
    %15 = vector.broadcast %7 : vector<16x1xf32> to vector<16x32xf32>
    %16 = arith.subf %1, %15 : vector<16x32xf32>
    %cst_8 = arith.constant 9.99999974E-6 : f32
    %17 = vector.broadcast %cst_8 : f32 to vector<16x1xf32>
    %18 = arith.addf %14, %17 : vector<16x1xf32>
    %19 = math.rsqrt %18 : vector<16x1xf32>
    %20 = vector.broadcast %19 : vector<16x1xf32> to vector<16x32xf32>
    %21 = arith.mulf %16, %20 : vector<16x32xf32>
    %22 = vector.broadcast %2 : vector<1x32xf32> to vector<16x32xf32>
    %23 = arith.mulf %21, %22 : vector<16x32xf32>
    %24 = vector.broadcast %3 : vector<1x32xf32> to vector<16x32xf32>
    %25 = arith.addf %23, %24 : vector<16x32xf32>
    %26 = arith.truncf %25 : vector<16x32xf32> to vector<16x32xbf16>
    %c0_9 = arith.constant 0 : index
    %c0_10 = arith.constant 0 : index
    %27 = vector.load %arg4[%c0_9, %c0_10] : memref<16x32xbf16, #tpu.memory_space<vmem>>, vector<16x32xbf16>
    tpu.vector_store %arg4[%c0_9, %c0_10], %26 {strides = array<i32>} : memref<16x32xbf16, #tpu.memory_space<vmem>>, vector<16x32xbf16>,
    return
  }
  func.func @transform_0(%arg0: i32) -> (i32, i32) {
    %c0_i32 = arith.constant 0 : i32
    %c0_i32_0 = arith.constant 0 : i32
    return %arg0, %c0_i32 : i32, i32
  }
  func.func @transform_1(%arg0: i32) -> (i32, i32) {
    %c0_i32 = arith.constant 0 : i32
    %c0_i32_0 = arith.constant 0 : i32
    %c0_i32_1 = arith.constant 0 : i32
    return %c0_i32, %c0_i32_0 : i32, i32
  }
  func.func @transform_2(%arg0: i32) -> (i32, i32) {
    %c0_i32 = arith.constant 0 : i32
    %c0_i32_0 = arith.constant 0 : i32
    %c0_i32_1 = arith.constant 0 : i32
    return %c0_i32, %c0_i32_0 : i32, i32
  }
  func.func @transform_3(%arg0: i32) -> (i32, i32) {
    %c0_i32 = arith.constant 0 : i32
    %c0_i32_0 = arith.constant 0 : i32
    return %arg0, %c0_i32 : i32, i32
  }
}

module attributes {stable_mosaic.version = 11 : i64} {
  func.func @_mha_block_kernel(%arg0: i32, %arg1: i32, %arg2: memref<1x7x32xbf16, #tpu.memory_space<vmem>>, %arg3: memref<1x7x32xbf16, #tpu.memory_space<vmem>>, %arg4: memref<1x1x7xf32, #tpu.memory_space<vmem>>, %arg5: memref<32x32xbf16, #tpu.memory_space<vmem>>, %arg6: memref<1x32xf32, #tpu.memory_space<vmem>>, %arg7: memref<32x32xbf16, #tpu.memory_space<vmem>>, %arg8: memref<1x32xf32, #tpu.memory_space<vmem>>, %arg9: memref<32x32xbf16, #tpu.memory_space<vmem>>, %arg10: memref<1x32xf32, #tpu.memory_space<vmem>>, %arg11: memref<32x32xbf16, #tpu.memory_space<vmem>>, %arg12: memref<1x32xf32, #tpu.memory_space<vmem>>, %arg13: memref<1x32xf32, #tpu.memory_space<vmem>>, %arg14: memref<1x32xf32, #tpu.memory_space<vmem>>, %arg15: memref<1x7x32xbf16, #tpu.memory_space<vmem>>) attributes {dimension_semantics = [#tpu.dimension_semantics<parallel>, #tpu.dimension_semantics<parallel>], iteration_bounds = array<i64: 2, 1>, scalar_prefetch = 0 : i64, scratch_operands = 0 : i64, tpu.core_type = #tpu.core_type<tc>, window_params = [{transform_indices = @transform_0, window_bounds = array<i64: 1, 7, 32>}, {transform_indices = @transform_1, window_bounds = array<i64: 1, 7, 32>}, {transform_indices = @transform_2, window_bounds = array<i64: 1, 1, 7>}, {pipeline_mode = #tpu.pipeline_mode<synchronous>, transform_indices = @transform_3, window_bounds = array<i64: 32, 32>}, {pipeline_mode = #tpu.pipeline_mode<synchronous>, transform_indices = @transform_4, window_bounds = array<i64: 1, 32>}, {pipeline_mode = #tpu.pipeline_mode<synchronous>, transform_indices = @transform_5, window_bounds = array<i64: 32, 32>}, {pipeline_mode = #tpu.pipeline_mode<synchronous>, transform_indices = @transform_6, window_bounds = array<i64: 1, 32>}, {pipeline_mode = #tpu.pipeline_mode<synchronous>, transform_indices = @transform_7, window_bounds = array<i64: 32, 32>}, {pipeline_mode = #tpu.pipeline_mode<synchronous>, transform_indices = @transform_8, window_bounds = array<i64: 1, 32>}, {pipeline_mode = #tpu.pipeline_mode<synchronous>, transform_indices = @transform_9, window_bounds = array<i64: 32, 32>}, {pipeline_mode = #tpu.pipeline_mode<synchronous>, transform_indices = @transform_10, window_bounds = array<i64: 1, 32>}, {pipeline_mode = #tpu.pipeline_mode<synchronous>, transform_indices = @transform_11, window_bounds = array<i64: 1, 32>}, {pipeline_mode = #tpu.pipeline_mode<synchronous>, transform_indices = @transform_12, window_bounds = array<i64: 1, 32>}, {transform_indices = @transform_13, window_bounds = array<i64: 1, 7, 32>}]} {
    %c0 = arith.constant 0 : index
    %c0_0 = arith.constant 0 : index
    %c0_1 = arith.constant 0 : index
    %0 = vector.load %arg2[%c0, %c0_0, %c0_1] : memref<1x7x32xbf16, #tpu.memory_space<vmem>>, vector<1x7x32xbf16>
    %1 = vector.shape_cast %0 : vector<1x7x32xbf16> to vector<7x32xbf16>
    %2 = arith.extf %1 : vector<7x32xbf16> to vector<7x32xf32>
    %c0_2 = arith.constant 0 : index
    %c0_3 = arith.constant 0 : index
    %c0_4 = arith.constant 0 : index
    %3 = vector.load %arg2[%c0_2, %c0_3, %c0_4] : memref<1x7x32xbf16, #tpu.memory_space<vmem>>, vector<1x7x32xbf16>
    %4 = vector.shape_cast %3 : vector<1x7x32xbf16> to vector<7x32xbf16>
    %c0_5 = arith.constant 0 : index
    %c0_6 = arith.constant 0 : index
    %c0_7 = arith.constant 0 : index
    %5 = vector.load %arg3[%c0_5, %c0_6, %c0_7] : memref<1x7x32xbf16, #tpu.memory_space<vmem>>, vector<1x7x32xbf16>
    %6 = vector.shape_cast %5 : vector<1x7x32xbf16> to vector<7x32xbf16>
    %c0_8 = arith.constant 0 : index
    %c0_9 = arith.constant 0 : index
    %7 = vector.load %arg5[%c0_8, %c0_9] : memref<32x32xbf16, #tpu.memory_space<vmem>>, vector<32x32xbf16>
    %cst = arith.constant dense<0.000000e+00> : vector<7x32xf32>
    %8 = tpu.matmul %4, %7, %cst {dimension_numbers = #tpu.dot_dimension_numbers<[1], [0], [0], [1], [0, 0, 1, 1], [], []>} : vector<7x32xbf16>, vector<32x32xbf16>, vector<7x32xf32> -> vector<7x32xf32>
    %c0_10 = arith.constant 0 : index
    %c0_11 = arith.constant 0 : index
    %9 = vector.load %arg6[%c0_10, %c0_11] : memref<1x32xf32, #tpu.memory_space<vmem>>, vector<1x32xf32>
    %10 = vector.broadcast %9 : vector<1x32xf32> to vector<7x32xf32>
    %11 = arith.addf %8, %10 : vector<7x32xf32>
    %cst_12 = arith.constant 0.353553385 : f32
    %12 = vector.broadcast %cst_12 : f32 to vector<7x32xf32>
    %13 = arith.mulf %11, %12 : vector<7x32xf32>
    %14 = arith.truncf %13 : vector<7x32xf32> to vector<7x32xbf16>
    %c0_13 = arith.constant 0 : index
    %c0_14 = arith.constant 0 : index
    %15 = vector.load %arg7[%c0_13, %c0_14] : memref<32x32xbf16, #tpu.memory_space<vmem>>, vector<32x32xbf16>
    %cst_15 = arith.constant dense<0.000000e+00> : vector<7x32xf32>
    %16 = tpu.matmul %6, %15, %cst_15 {dimension_numbers = #tpu.dot_dimension_numbers<[1], [0], [0], [1], [0, 0, 1, 1], [], []>} : vector<7x32xbf16>, vector<32x32xbf16>, vector<7x32xf32> -> vector<7x32xf32>
    %c0_16 = arith.constant 0 : index
    %c0_17 = arith.constant 0 : index
    %17 = vector.load %arg8[%c0_16, %c0_17] : memref<1x32xf32, #tpu.memory_space<vmem>>, vector<1x32xf32>
    %18 = vector.broadcast %17 : vector<1x32xf32> to vector<7x32xf32>
    %19 = arith.addf %16, %18 : vector<7x32xf32>
    %20 = arith.truncf %19 : vector<7x32xf32> to vector<7x32xbf16>
    %c0_18 = arith.constant 0 : index
    %c0_19 = arith.constant 0 : index
    %21 = vector.load %arg9[%c0_18, %c0_19] : memref<32x32xbf16, #tpu.memory_space<vmem>>, vector<32x32xbf16>
    %cst_20 = arith.constant dense<0.000000e+00> : vector<7x32xf32>
    %22 = tpu.matmul %6, %21, %cst_20 {dimension_numbers = #tpu.dot_dimension_numbers<[1], [0], [0], [1], [0, 0, 1, 1], [], []>} : vector<7x32xbf16>, vector<32x32xbf16>, vector<7x32xf32> -> vector<7x32xf32>
    %c0_21 = arith.constant 0 : index
    %c0_22 = arith.constant 0 : index
    %23 = vector.load %arg10[%c0_21, %c0_22] : memref<1x32xf32, #tpu.memory_space<vmem>>, vector<1x32xf32>
    %24 = vector.broadcast %23 : vector<1x32xf32> to vector<7x32xf32>
    %25 = arith.addf %22, %24 : vector<7x32xf32>
    %26 = arith.truncf %25 : vector<7x32xf32> to vector<7x32xbf16>
    %c0_23 = arith.constant 0 : index
    %c0_24 = arith.constant 0 : index
    %c0_25 = arith.constant 0 : index
    %27 = vector.load %arg4[%c0_23, %c0_24, %c0_25] : memref<1x1x7xf32, #tpu.memory_space<vmem>>, vector<1x1x7xf32>
    %28 = vector.shape_cast %27 : vector<1x1x7xf32> to vector<1x7xf32>
    %c7_i32 = arith.constant 7 : i32
    %29 = arith.muli %arg1, %c7_i32 : i32
    %30 = tpu.iota {dimensions = array<i32: 0>} : vector<7x7xi32>
    %31 = vector.broadcast %29 : i32 to vector<7x7xi32>
    %32 = arith.addi %30, %31 : vector<7x7xi32>
    %33 = tpu.iota {dimensions = array<i32: 1>} : vector<7x7xi32>
    %34 = arith.cmpi sge, %32, %33 : vector<7x7xi32>
    %cst_26 = arith.constant 0.000000e+00 : f32
    %cst_27 = arith.constant -1.000000e+09 : f32
    %35 = vector.broadcast %cst_26 : f32 to vector<7x7xf32>
    %36 = vector.broadcast %cst_27 : f32 to vector<7x7xf32>
    %37 = arith.select %34, %35, %36 : vector<7x7xi1>, vector<7x7xf32>
    %38 = vector.broadcast %28 : vector<1x7xf32> to vector<7x7xf32>
    %39 = arith.addf %38, %37 : vector<7x7xf32>
    %40 = vector.extract_strided_slice %14 {offsets = [0, 0], sizes = [7, 8], strides = [1, 1]} : vector<7x32xbf16> to vector<7x8xbf16>
    %41 = vector.extract_strided_slice %20 {offsets = [0, 0], sizes = [7, 8], strides = [1, 1]} : vector<7x32xbf16> to vector<7x8xbf16>
    %42 = vector.extract_strided_slice %26 {offsets = [0, 0], sizes = [7, 8], strides = [1, 1]} : vector<7x32xbf16> to vector<7x8xbf16>
    %cst_28 = arith.constant dense<0.000000e+00> : vector<7x7xf32>
    %43 = tpu.matmul %40, %41, %cst_28 {dimension_numbers = #tpu.dot_dimension_numbers<[1], [1], [0], [0], [0, 0, 1, 0], [], []>} : vector<7x8xbf16>, vector<7x8xbf16>, vector<7x7xf32> -> vector<7x7xf32>
    %44 = arith.addf %43, %39 : vector<7x7xf32>
    %cst_29 = arith.constant dense<0xFF800000> : vector<7xf32>
    %45 = vector.multi_reduction <maximumf>, %44, %cst_29 [1] : vector<7x7xf32> to vector<7xf32>
    %46 = vector.shape_cast %45 : vector<7xf32> to vector<7x1xf32>
    %47 = vector.broadcast %46 : vector<7x1xf32> to vector<7x7xf32>
    %48 = arith.subf %44, %47 : vector<7x7xf32>
    %49 = math.exp %48 : vector<7x7xf32>
    %cst_30 = arith.constant dense<0.000000e+00> : vector<7xf32>
    %50 = vector.multi_reduction <add>, %49, %cst_30 [1] : vector<7x7xf32> to vector<7xf32>
    %51 = vector.shape_cast %50 : vector<7xf32> to vector<7x1xf32>
    %52 = tpu.reciprocal %51 {approx = true} : vector<7x1xf32> -> vector<7x1xf32>
    %53 = vector.broadcast %52 : vector<7x1xf32> to vector<7x7xf32>
    %54 = arith.mulf %49, %53 : vector<7x7xf32>
    %55 = arith.truncf %54 : vector<7x7xf32> to vector<7x7xbf16>
    %cst_31 = arith.constant dense<0.000000e+00> : vector<7x8xf32>
    %56 = tpu.matmul %55, %42, %cst_31 {dimension_numbers = #tpu.dot_dimension_numbers<[1], [0], [0], [1], [0, 0, 1, 1], [], []>} : vector<7x7xbf16>, vector<7x8xbf16>, vector<7x8xf32> -> vector<7x8xf32>
    %57 = vector.extract_strided_slice %14 {offsets = [0, 8], sizes = [7, 8], strides = [1, 1]} : vector<7x32xbf16> to vector<7x8xbf16>
    %58 = vector.extract_strided_slice %20 {offsets = [0, 8], sizes = [7, 8], strides = [1, 1]} : vector<7x32xbf16> to vector<7x8xbf16>
    %59 = vector.extract_strided_slice %26 {offsets = [0, 8], sizes = [7, 8], strides = [1, 1]} : vector<7x32xbf16> to vector<7x8xbf16>
    %cst_32 = arith.constant dense<0.000000e+00> : vector<7x7xf32>
    %60 = tpu.matmul %57, %58, %cst_32 {dimension_numbers = #tpu.dot_dimension_numbers<[1], [1], [0], [0], [0, 0, 1, 0], [], []>} : vector<7x8xbf16>, vector<7x8xbf16>, vector<7x7xf32> -> vector<7x7xf32>
    %61 = arith.addf %60, %39 : vector<7x7xf32>
    %cst_33 = arith.constant dense<0xFF800000> : vector<7xf32>
    %62 = vector.multi_reduction <maximumf>, %61, %cst_33 [1] : vector<7x7xf32> to vector<7xf32>
    %63 = vector.shape_cast %62 : vector<7xf32> to vector<7x1xf32>
    %64 = vector.broadcast %63 : vector<7x1xf32> to vector<7x7xf32>
    %65 = arith.subf %61, %64 : vector<7x7xf32>
    %66 = math.exp %65 : vector<7x7xf32>
    %cst_34 = arith.constant dense<0.000000e+00> : vector<7xf32>
    %67 = vector.multi_reduction <add>, %66, %cst_34 [1] : vector<7x7xf32> to vector<7xf32>
    %68 = vector.shape_cast %67 : vector<7xf32> to vector<7x1xf32>
    %69 = tpu.reciprocal %68 {approx = true} : vector<7x1xf32> -> vector<7x1xf32>
    %70 = vector.broadcast %69 : vector<7x1xf32> to vector<7x7xf32>
    %71 = arith.mulf %66, %70 : vector<7x7xf32>
    %72 = arith.truncf %71 : vector<7x7xf32> to vector<7x7xbf16>
    %cst_35 = arith.constant dense<0.000000e+00> : vector<7x8xf32>
    %73 = tpu.matmul %72, %59, %cst_35 {dimension_numbers = #tpu.dot_dimension_numbers<[1], [0], [0], [1], [0, 0, 1, 1], [], []>} : vector<7x7xbf16>, vector<7x8xbf16>, vector<7x8xf32> -> vector<7x8xf32>
    %74 = vector.extract_strided_slice %14 {offsets = [0, 16], sizes = [7, 8], strides = [1, 1]} : vector<7x32xbf16> to vector<7x8xbf16>
    %75 = vector.extract_strided_slice %20 {offsets = [0, 16], sizes = [7, 8], strides = [1, 1]} : vector<7x32xbf16> to vector<7x8xbf16>
    %76 = vector.extract_strided_slice %26 {offsets = [0, 16], sizes = [7, 8], strides = [1, 1]} : vector<7x32xbf16> to vector<7x8xbf16>
    %cst_36 = arith.constant dense<0.000000e+00> : vector<7x7xf32>
    %77 = tpu.matmul %74, %75, %cst_36 {dimension_numbers = #tpu.dot_dimension_numbers<[1], [1], [0], [0], [0, 0, 1, 0], [], []>} : vector<7x8xbf16>, vector<7x8xbf16>, vector<7x7xf32> -> vector<7x7xf32>
    %78 = arith.addf %77, %39 : vector<7x7xf32>
    %cst_37 = arith.constant dense<0xFF800000> : vector<7xf32>
    %79 = vector.multi_reduction <maximumf>, %78, %cst_37 [1] : vector<7x7xf32> to vector<7xf32>
    %80 = vector.shape_cast %79 : vector<7xf32> to vector<7x1xf32>
    %81 = vector.broadcast %80 : vector<7x1xf32> to vector<7x7xf32>
    %82 = arith.subf %78, %81 : vector<7x7xf32>
    %83 = math.exp %82 : vector<7x7xf32>
    %cst_38 = arith.constant dense<0.000000e+00> : vector<7xf32>
    %84 = vector.multi_reduction <add>, %83, %cst_38 [1] : vector<7x7xf32> to vector<7xf32>
    %85 = vector.shape_cast %84 : vector<7xf32> to vector<7x1xf32>
    %86 = tpu.reciprocal %85 {approx = true} : vector<7x1xf32> -> vector<7x1xf32>
    %87 = vector.broadcast %86 : vector<7x1xf32> to vector<7x7xf32>
    %88 = arith.mulf %83, %87 : vector<7x7xf32>
    %89 = arith.truncf %88 : vector<7x7xf32> to vector<7x7xbf16>
    %cst_39 = arith.constant dense<0.000000e+00> : vector<7x8xf32>
    %90 = tpu.matmul %89, %76, %cst_39 {dimension_numbers = #tpu.dot_dimension_numbers<[1], [0], [0], [1], [0, 0, 1, 1], [], []>} : vector<7x7xbf16>, vector<7x8xbf16>, vector<7x8xf32> -> vector<7x8xf32>
    %91 = vector.extract_strided_slice %14 {offsets = [0, 24], sizes = [7, 8], strides = [1, 1]} : vector<7x32xbf16> to vector<7x8xbf16>
    %92 = vector.extract_strided_slice %20 {offsets = [0, 24], sizes = [7, 8], strides = [1, 1]} : vector<7x32xbf16> to vector<7x8xbf16>
    %93 = vector.extract_strided_slice %26 {offsets = [0, 24], sizes = [7, 8], strides = [1, 1]} : vector<7x32xbf16> to vector<7x8xbf16>
    %cst_40 = arith.constant dense<0.000000e+00> : vector<7x7xf32>
    %94 = tpu.matmul %91, %92, %cst_40 {dimension_numbers = #tpu.dot_dimension_numbers<[1], [1], [0], [0], [0, 0, 1, 0], [], []>} : vector<7x8xbf16>, vector<7x8xbf16>, vector<7x7xf32> -> vector<7x7xf32>
    %95 = arith.addf %94, %39 : vector<7x7xf32>
    %cst_41 = arith.constant dense<0xFF800000> : vector<7xf32>
    %96 = vector.multi_reduction <maximumf>, %95, %cst_41 [1] : vector<7x7xf32> to vector<7xf32>
    %97 = vector.shape_cast %96 : vector<7xf32> to vector<7x1xf32>
    %98 = vector.broadcast %97 : vector<7x1xf32> to vector<7x7xf32>
    %99 = arith.subf %95, %98 : vector<7x7xf32>
    %100 = math.exp %99 : vector<7x7xf32>
    %cst_42 = arith.constant dense<0.000000e+00> : vector<7xf32>
    %101 = vector.multi_reduction <add>, %100, %cst_42 [1] : vector<7x7xf32> to vector<7xf32>
    %102 = vector.shape_cast %101 : vector<7xf32> to vector<7x1xf32>
    %103 = tpu.reciprocal %102 {approx = true} : vector<7x1xf32> -> vector<7x1xf32>
    %104 = vector.broadcast %103 : vector<7x1xf32> to vector<7x7xf32>
    %105 = arith.mulf %100, %104 : vector<7x7xf32>
    %106 = arith.truncf %105 : vector<7x7xf32> to vector<7x7xbf16>
    %cst_43 = arith.constant dense<0.000000e+00> : vector<7x8xf32>
    %107 = tpu.matmul %106, %93, %cst_43 {dimension_numbers = #tpu.dot_dimension_numbers<[1], [0], [0], [1], [0, 0, 1, 1], [], []>} : vector<7x7xbf16>, vector<7x8xbf16>, vector<7x8xf32> -> vector<7x8xf32>
    %108 = tpu.concatenate %56, %73, %90, %107 in 1 : vector<7x8xf32>, vector<7x8xf32>, vector<7x8xf32>, vector<7x8xf32> -> vector<7x32xf32>
    %109 = arith.truncf %108 : vector<7x32xf32> to vector<7x32xbf16>
    %c0_44 = arith.constant 0 : index
    %c0_45 = arith.constant 0 : index
    %110 = vector.load %arg11[%c0_44, %c0_45] : memref<32x32xbf16, #tpu.memory_space<vmem>>, vector<32x32xbf16>
    %cst_46 = arith.constant dense<0.000000e+00> : vector<7x32xf32>
    %111 = tpu.matmul %109, %110, %cst_46 {dimension_numbers = #tpu.dot_dimension_numbers<[1], [0], [0], [1], [0, 0, 1, 1], [], []>} : vector<7x32xbf16>, vector<32x32xbf16>, vector<7x32xf32> -> vector<7x32xf32>
    %c0_47 = arith.constant 0 : index
    %c0_48 = arith.constant 0 : index
    %112 = vector.load %arg12[%c0_47, %c0_48] : memref<1x32xf32, #tpu.memory_space<vmem>>, vector<1x32xf32>
    %113 = vector.broadcast %112 : vector<1x32xf32> to vector<7x32xf32>
    %114 = arith.addf %111, %113 : vector<7x32xf32>
    %115 = arith.addf %2, %114 : vector<7x32xf32>
    %c0_49 = arith.constant 0 : index
    %c0_50 = arith.constant 0 : index
    %116 = vector.load %arg13[%c0_49, %c0_50] : memref<1x32xf32, #tpu.memory_space<vmem>>, vector<1x32xf32>
    %c0_51 = arith.constant 0 : index
    %c0_52 = arith.constant 0 : index
    %117 = vector.load %arg14[%c0_51, %c0_52] : memref<1x32xf32, #tpu.memory_space<vmem>>, vector<1x32xf32>
    %cst_53 = arith.constant dense<0.000000e+00> : vector<7xf32>
    %118 = vector.multi_reduction <add>, %115, %cst_53 [1] : vector<7x32xf32> to vector<7xf32>
    %119 = vector.shape_cast %118 : vector<7xf32> to vector<7x1xf32>
    %cst_54 = arith.constant 3.200000e+01 : f32
    %120 = vector.broadcast %cst_54 : f32 to vector<7x1xf32>
    %121 = arith.divf %119, %120 : vector<7x1xf32>
    %122 = vector.broadcast %121 : vector<7x1xf32> to vector<7x32xf32>
    %123 = arith.subf %115, %122 : vector<7x32xf32>
    %124 = arith.mulf %123, %123 : vector<7x32xf32>
    %cst_55 = arith.constant dense<0.000000e+00> : vector<7xf32>
    %125 = vector.multi_reduction <add>, %124, %cst_55 [1] : vector<7x32xf32> to vector<7xf32>
    %126 = vector.shape_cast %125 : vector<7xf32> to vector<7x1xf32>
    %cst_56 = arith.constant 3.200000e+01 : f32
    %127 = vector.broadcast %cst_56 : f32 to vector<7x1xf32>
    %128 = arith.divf %126, %127 : vector<7x1xf32>
    %129 = vector.broadcast %121 : vector<7x1xf32> to vector<7x32xf32>
    %130 = arith.subf %115, %129 : vector<7x32xf32>
    %cst_57 = arith.constant 9.99999974E-6 : f32
    %131 = vector.broadcast %cst_57 : f32 to vector<7x1xf32>
    %132 = arith.addf %128, %131 : vector<7x1xf32>
    %133 = math.rsqrt %132 : vector<7x1xf32>
    %134 = vector.broadcast %133 : vector<7x1xf32> to vector<7x32xf32>
    %135 = arith.mulf %130, %134 : vector<7x32xf32>
    %136 = vector.broadcast %116 : vector<1x32xf32> to vector<7x32xf32>
    %137 = arith.mulf %135, %136 : vector<7x32xf32>
    %138 = vector.broadcast %117 : vector<1x32xf32> to vector<7x32xf32>
    %139 = arith.addf %137, %138 : vector<7x32xf32>
    %140 = arith.truncf %139 : vector<7x32xf32> to vector<7x32xbf16>
    %c0_58 = arith.constant 0 : index
    %c0_59 = arith.constant 0 : index
    %c0_60 = arith.constant 0 : index
    %141 = vector.load %arg15[%c0_58, %c0_59, %c0_60] : memref<1x7x32xbf16, #tpu.memory_space<vmem>>, vector<1x7x32xbf16>
    %142 = vector.shape_cast %141 : vector<1x7x32xbf16> to vector<7x32xbf16>
    %143 = vector.shape_cast %140 : vector<7x32xbf16> to vector<1x7x32xbf16>
    tpu.vector_store %arg15[%c0_58, %c0_59, %c0_60], %143 {strides = array<i32>} : memref<1x7x32xbf16, #tpu.memory_space<vmem>>, vector<1x7x32xbf16>,
    return
  }
  func.func @transform_0(%arg0: i32, %arg1: i32) -> (i32, i32, i32) {
    %c0_i32 = arith.constant 0 : i32
    %c0_i32_0 = arith.constant 0 : i32
    return %arg0, %arg1, %c0_i32 : i32, i32, i32
  }
  func.func @transform_1(%arg0: i32, %arg1: i32) -> (i32, i32, i32) {
    %c0_i32 = arith.constant 0 : i32
    %c0_i32_0 = arith.constant 0 : i32
    %c0_i32_1 = arith.constant 0 : i32
    return %arg0, %c0_i32, %c0_i32_0 : i32, i32, i32
  }
  func.func @transform_2(%arg0: i32, %arg1: i32) -> (i32, i32, i32) {
    %c0_i32 = arith.constant 0 : i32
    %c0_i32_0 = arith.constant 0 : i32
    %c0_i32_1 = arith.constant 0 : i32
    return %arg0, %c0_i32, %c0_i32_0 : i32, i32, i32
  }
  func.func @transform_3(%arg0: i32, %arg1: i32) -> (i32, i32) {
    %c0_i32 = arith.constant 0 : i32
    %c0_i32_0 = arith.constant 0 : i32
    %c0_i32_1 = arith.constant 0 : i32
    return %c0_i32, %c0_i32_0 : i32, i32
  }
  func.func @transform_4(%arg0: i32, %arg1: i32) -> (i32, i32) {
    %c0_i32 = arith.constant 0 : i32
    %c0_i32_0 = arith.constant 0 : i32
    %c0_i32_1 = arith.constant 0 : i32
    return %c0_i32, %c0_i32_0 : i32, i32
  }
  func.func @transform_5(%arg0: i32, %arg1: i32) -> (i32, i32) {
    %c0_i32 = arith.constant 0 : i32
    %c0_i32_0 = arith.constant 0 : i32
    %c0_i32_1 = arith.constant 0 : i32
    return %c0_i32, %c0_i32_0 : i32, i32
  }
  func.func @transform_6(%arg0: i32, %arg1: i32) -> (i32, i32) {
    %c0_i32 = arith.constant 0 : i32
    %c0_i32_0 = arith.constant 0 : i32
    %c0_i32_1 = arith.constant 0 : i32
    return %c0_i32, %c0_i32_0 : i32, i32
  }
  func.func @transform_7(%arg0: i32, %arg1: i32) -> (i32, i32) {
    %c0_i32 = arith.constant 0 : i32
    %c0_i32_0 = arith.constant 0 : i32
    %c0_i32_1 = arith.constant 0 : i32
    return %c0_i32, %c0_i32_0 : i32, i32
  }
  func.func @transform_8(%arg0: i32, %arg1: i32) -> (i32, i32) {
    %c0_i32 = arith.constant 0 : i32
    %c0_i32_0 = arith.constant 0 : i32
    %c0_i32_1 = arith.constant 0 : i32
    return %c0_i32, %c0_i32_0 : i32, i32
  }
  func.func @transform_9(%arg0: i32, %arg1: i32) -> (i32, i32) {
    %c0_i32 = arith.constant 0 : i32
    %c0_i32_0 = arith.constant 0 : i32
    %c0_i32_1 = arith.constant 0 : i32
    return %c0_i32, %c0_i32_0 : i32, i32
  }
  func.func @transform_10(%arg0: i32, %arg1: i32) -> (i32, i32) {
    %c0_i32 = arith.constant 0 : i32
    %c0_i32_0 = arith.constant 0 : i32
    %c0_i32_1 = arith.constant 0 : i32
    return %c0_i32, %c0_i32_0 : i32, i32
  }
  func.func @transform_11(%arg0: i32, %arg1: i32) -> (i32, i32) {
    %c0_i32 = arith.constant 0 : i32
    %c0_i32_0 = arith.constant 0 : i32
    %c0_i32_1 = arith.constant 0 : i32
    return %c0_i32, %c0_i32_0 : i32, i32
  }
  func.func @transform_12(%arg0: i32, %arg1: i32) -> (i32, i32) {
    %c0_i32 = arith.constant 0 : i32
    %c0_i32_0 = arith.constant 0 : i32
    %c0_i32_1 = arith.constant 0 : i32
    return %c0_i32, %c0_i32_0 : i32, i32
  }
  func.func @transform_13(%arg0: i32, %arg1: i32) -> (i32, i32, i32) {
    %c0_i32 = arith.constant 0 : i32
    %c0_i32_0 = arith.constant 0 : i32
    return %arg0, %arg1, %c0_i32 : i32, i32, i32
  }
}

module attributes {stable_mosaic.version = 11 : i64} {
  func.func @_ffn_block_kernel(%arg0: i32, %arg1: memref<14x32xbf16, #tpu.memory_space<vmem>>, %arg2: memref<32x64xbf16, #tpu.memory_space<vmem>>, %arg3: memref<1x64xf32, #tpu.memory_space<vmem>>, %arg4: memref<64x32xbf16, #tpu.memory_space<vmem>>, %arg5: memref<1x32xf32, #tpu.memory_space<vmem>>, %arg6: memref<1x32xf32, #tpu.memory_space<vmem>>, %arg7: memref<1x32xf32, #tpu.memory_space<vmem>>, %arg8: memref<14x32xbf16, #tpu.memory_space<vmem>>) attributes {dimension_semantics = [#tpu.dimension_semantics<parallel>], iteration_bounds = array<i64: 1>, scalar_prefetch = 0 : i64, scratch_operands = 0 : i64, tpu.core_type = #tpu.core_type<tc>, window_params = [{transform_indices = @transform_0, window_bounds = array<i64: 14, 32>}, {pipeline_mode = #tpu.pipeline_mode<synchronous>, transform_indices = @transform_1, window_bounds = array<i64: 32, 64>}, {pipeline_mode = #tpu.pipeline_mode<synchronous>, transform_indices = @transform_2, window_bounds = array<i64: 1, 64>}, {pipeline_mode = #tpu.pipeline_mode<synchronous>, transform_indices = @transform_3, window_bounds = array<i64: 64, 32>}, {pipeline_mode = #tpu.pipeline_mode<synchronous>, transform_indices = @transform_4, window_bounds = array<i64: 1, 32>}, {pipeline_mode = #tpu.pipeline_mode<synchronous>, transform_indices = @transform_5, window_bounds = array<i64: 1, 32>}, {pipeline_mode = #tpu.pipeline_mode<synchronous>, transform_indices = @transform_6, window_bounds = array<i64: 1, 32>}, {transform_indices = @transform_7, window_bounds = array<i64: 14, 32>}]} {
    %c0 = arith.constant 0 : index
    %c0_0 = arith.constant 0 : index
    %0 = vector.load %arg1[%c0, %c0_0] : memref<14x32xbf16, #tpu.memory_space<vmem>>, vector<14x32xbf16>
    %1 = arith.extf %0 : vector<14x32xbf16> to vector<14x32xf32>
    %c0_1 = arith.constant 0 : index
    %c0_2 = arith.constant 0 : index
    %2 = vector.load %arg1[%c0_1, %c0_2] : memref<14x32xbf16, #tpu.memory_space<vmem>>, vector<14x32xbf16>
    %c0_3 = arith.constant 0 : index
    %c0_4 = arith.constant 0 : index
    %3 = vector.load %arg2[%c0_3, %c0_4] : memref<32x64xbf16, #tpu.memory_space<vmem>>, vector<32x64xbf16>
    %cst = arith.constant dense<0.000000e+00> : vector<14x64xf32>
    %4 = tpu.matmul %2, %3, %cst {dimension_numbers = #tpu.dot_dimension_numbers<[1], [0], [0], [1], [0, 0, 1, 1], [], []>} : vector<14x32xbf16>, vector<32x64xbf16>, vector<14x64xf32> -> vector<14x64xf32>
    %c0_5 = arith.constant 0 : index
    %c0_6 = arith.constant 0 : index
    %5 = vector.load %arg3[%c0_5, %c0_6] : memref<1x64xf32, #tpu.memory_space<vmem>>, vector<1x64xf32>
    %6 = vector.broadcast %5 : vector<1x64xf32> to vector<14x64xf32>
    %7 = arith.addf %4, %6 : vector<14x64xf32>
    %cst_7 = arith.constant 0.000000e+00 : f32
    %8 = vector.broadcast %cst_7 : f32 to vector<14x64xf32>
    %9 = arith.maximumf %7, %8 : vector<14x64xf32>
    %10 = arith.truncf %9 : vector<14x64xf32> to vector<14x64xbf16>
    %c0_8 = arith.constant 0 : index
    %c0_9 = arith.constant 0 : index
    %11 = vector.load %arg4[%c0_8, %c0_9] : memref<64x32xbf16, #tpu.memory_space<vmem>>, vector<64x32xbf16>
    %cst_10 = arith.constant dense<0.000000e+00> : vector<14x32xf32>
    %12 = tpu.matmul %10, %11, %cst_10 {dimension_numbers = #tpu.dot_dimension_numbers<[1], [0], [0], [1], [0, 0, 1, 1], [], []>} : vector<14x64xbf16>, vector<64x32xbf16>, vector<14x32xf32> -> vector<14x32xf32>
    %c0_11 = arith.constant 0 : index
    %c0_12 = arith.constant 0 : index
    %13 = vector.load %arg5[%c0_11, %c0_12] : memref<1x32xf32, #tpu.memory_space<vmem>>, vector<1x32xf32>
    %14 = vector.broadcast %13 : vector<1x32xf32> to vector<14x32xf32>
    %15 = arith.addf %12, %14 : vector<14x32xf32>
    %16 = arith.addf %1, %15 : vector<14x32xf32>
    %c0_13 = arith.constant 0 : index
    %c0_14 = arith.constant 0 : index
    %17 = vector.load %arg6[%c0_13, %c0_14] : memref<1x32xf32, #tpu.memory_space<vmem>>, vector<1x32xf32>
    %c0_15 = arith.constant 0 : index
    %c0_16 = arith.constant 0 : index
    %18 = vector.load %arg7[%c0_15, %c0_16] : memref<1x32xf32, #tpu.memory_space<vmem>>, vector<1x32xf32>
    %cst_17 = arith.constant dense<0.000000e+00> : vector<14xf32>
    %19 = vector.multi_reduction <add>, %16, %cst_17 [1] : vector<14x32xf32> to vector<14xf32>
    %20 = vector.shape_cast %19 : vector<14xf32> to vector<14x1xf32>
    %cst_18 = arith.constant 3.200000e+01 : f32
    %21 = vector.broadcast %cst_18 : f32 to vector<14x1xf32>
    %22 = arith.divf %20, %21 : vector<14x1xf32>
    %23 = vector.broadcast %22 : vector<14x1xf32> to vector<14x32xf32>
    %24 = arith.subf %16, %23 : vector<14x32xf32>
    %25 = arith.mulf %24, %24 : vector<14x32xf32>
    %cst_19 = arith.constant dense<0.000000e+00> : vector<14xf32>
    %26 = vector.multi_reduction <add>, %25, %cst_19 [1] : vector<14x32xf32> to vector<14xf32>
    %27 = vector.shape_cast %26 : vector<14xf32> to vector<14x1xf32>
    %cst_20 = arith.constant 3.200000e+01 : f32
    %28 = vector.broadcast %cst_20 : f32 to vector<14x1xf32>
    %29 = arith.divf %27, %28 : vector<14x1xf32>
    %30 = vector.broadcast %22 : vector<14x1xf32> to vector<14x32xf32>
    %31 = arith.subf %16, %30 : vector<14x32xf32>
    %cst_21 = arith.constant 9.99999974E-6 : f32
    %32 = vector.broadcast %cst_21 : f32 to vector<14x1xf32>
    %33 = arith.addf %29, %32 : vector<14x1xf32>
    %34 = math.rsqrt %33 : vector<14x1xf32>
    %35 = vector.broadcast %34 : vector<14x1xf32> to vector<14x32xf32>
    %36 = arith.mulf %31, %35 : vector<14x32xf32>
    %37 = vector.broadcast %17 : vector<1x32xf32> to vector<14x32xf32>
    %38 = arith.mulf %36, %37 : vector<14x32xf32>
    %39 = vector.broadcast %18 : vector<1x32xf32> to vector<14x32xf32>
    %40 = arith.addf %38, %39 : vector<14x32xf32>
    %41 = arith.truncf %40 : vector<14x32xf32> to vector<14x32xbf16>
    %c0_22 = arith.constant 0 : index
    %c0_23 = arith.constant 0 : index
    %42 = vector.load %arg8[%c0_22, %c0_23] : memref<14x32xbf16, #tpu.memory_space<vmem>>, vector<14x32xbf16>
    tpu.vector_store %arg8[%c0_22, %c0_23], %41 {strides = array<i32>} : memref<14x32xbf16, #tpu.memory_space<vmem>>, vector<14x32xbf16>,
    return
  }
  func.func @transform_0(%arg0: i32) -> (i32, i32) {
    %c0_i32 = arith.constant 0 : i32
    %c0_i32_0 = arith.constant 0 : i32
    return %arg0, %c0_i32 : i32, i32
  }
  func.func @transform_1(%arg0: i32) -> (i32, i32) {
    %c0_i32 = arith.constant 0 : i32
    %c0_i32_0 = arith.constant 0 : i32
    %c0_i32_1 = arith.constant 0 : i32
    return %c0_i32, %c0_i32_0 : i32, i32
  }
  func.func @transform_2(%arg0: i32) -> (i32, i32) {
    %c0_i32 = arith.constant 0 : i32
    %c0_i32_0 = arith.constant 0 : i32
    %c0_i32_1 = arith.constant 0 : i32
    return %c0_i32, %c0_i32_0 : i32, i32
  }
  func.func @transform_3(%arg0: i32) -> (i32, i32) {
    %c0_i32 = arith.constant 0 : i32
    %c0_i32_0 = arith.constant 0 : i32
    %c0_i32_1 = arith.constant 0 : i32
    return %c0_i32, %c0_i32_0 : i32, i32
  }
  func.func @transform_4(%arg0: i32) -> (i32, i32) {
    %c0_i32 = arith.constant 0 : i32
    %c0_i32_0 = arith.constant 0 : i32
    %c0_i32_1 = arith.constant 0 : i32
    return %c0_i32, %c0_i32_0 : i32, i32
  }
  func.func @transform_5(%arg0: i32) -> (i32, i32) {
    %c0_i32 = arith.constant 0 : i32
    %c0_i32_0 = arith.constant 0 : i32
    %c0_i32_1 = arith.constant 0 : i32
    return %c0_i32, %c0_i32_0 : i32, i32
  }
  func.func @transform_6(%arg0: i32) -> (i32, i32) {
    %c0_i32 = arith.constant 0 : i32
    %c0_i32_0 = arith.constant 0 : i32
    %c0_i32_1 = arith.constant 0 : i32
    return %c0_i32, %c0_i32_0 : i32, i32
  }
  func.func @transform_7(%arg0: i32) -> (i32, i32) {
    %c0_i32 = arith.constant 0 : i32
    %c0_i32_0 = arith.constant 0 : i32
    return %arg0, %c0_i32 : i32, i32
  }
}

module attributes {stable_mosaic.version = 11 : i64} {
  func.func @_mha_block_kernel(%arg0: i32, %arg1: i32, %arg2: memref<1x7x32xbf16, #tpu.memory_space<vmem>>, %arg3: memref<1x8x32xbf16, #tpu.memory_space<vmem>>, %arg4: memref<1x1x8xf32, #tpu.memory_space<vmem>>, %arg5: memref<32x32xbf16, #tpu.memory_space<vmem>>, %arg6: memref<1x32xf32, #tpu.memory_space<vmem>>, %arg7: memref<32x32xbf16, #tpu.memory_space<vmem>>, %arg8: memref<1x32xf32, #tpu.memory_space<vmem>>, %arg9: memref<32x32xbf16, #tpu.memory_space<vmem>>, %arg10: memref<1x32xf32, #tpu.memory_space<vmem>>, %arg11: memref<32x32xbf16, #tpu.memory_space<vmem>>, %arg12: memref<1x32xf32, #tpu.memory_space<vmem>>, %arg13: memref<1x32xf32, #tpu.memory_space<vmem>>, %arg14: memref<1x32xf32, #tpu.memory_space<vmem>>, %arg15: memref<1x7x32xbf16, #tpu.memory_space<vmem>>) attributes {dimension_semantics = [#tpu.dimension_semantics<parallel>, #tpu.dimension_semantics<parallel>], iteration_bounds = array<i64: 2, 1>, scalar_prefetch = 0 : i64, scratch_operands = 0 : i64, tpu.core_type = #tpu.core_type<tc>, window_params = [{transform_indices = @transform_0, window_bounds = array<i64: 1, 7, 32>}, {transform_indices = @transform_1, window_bounds = array<i64: 1, 8, 32>}, {transform_indices = @transform_2, window_bounds = array<i64: 1, 1, 8>}, {pipeline_mode = #tpu.pipeline_mode<synchronous>, transform_indices = @transform_3, window_bounds = array<i64: 32, 32>}, {pipeline_mode = #tpu.pipeline_mode<synchronous>, transform_indices = @transform_4, window_bounds = array<i64: 1, 32>}, {pipeline_mode = #tpu.pipeline_mode<synchronous>, transform_indices = @transform_5, window_bounds = array<i64: 32, 32>}, {pipeline_mode = #tpu.pipeline_mode<synchronous>, transform_indices = @transform_6, window_bounds = array<i64: 1, 32>}, {pipeline_mode = #tpu.pipeline_mode<synchronous>, transform_indices = @transform_7, window_bounds = array<i64: 32, 32>}, {pipeline_mode = #tpu.pipeline_mode<synchronous>, transform_indices = @transform_8, window_bounds = array<i64: 1, 32>}, {pipeline_mode = #tpu.pipeline_mode<synchronous>, transform_indices = @transform_9, window_bounds = array<i64: 32, 32>}, {pipeline_mode = #tpu.pipeline_mode<synchronous>, transform_indices = @transform_10, window_bounds = array<i64: 1, 32>}, {pipeline_mode = #tpu.pipeline_mode<synchronous>, transform_indices = @transform_11, window_bounds = array<i64: 1, 32>}, {pipeline_mode = #tpu.pipeline_mode<synchronous>, transform_indices = @transform_12, window_bounds = array<i64: 1, 32>}, {transform_indices = @transform_13, window_bounds = array<i64: 1, 7, 32>}]} {
    %c0 = arith.constant 0 : index
    %c0_0 = arith.constant 0 : index
    %c0_1 = arith.constant 0 : index
    %0 = vector.load %arg2[%c0, %c0_0, %c0_1] : memref<1x7x32xbf16, #tpu.memory_space<vmem>>, vector<1x7x32xbf16>
    %1 = vector.shape_cast %0 : vector<1x7x32xbf16> to vector<7x32xbf16>
    %2 = arith.extf %1 : vector<7x32xbf16> to vector<7x32xf32>
    %c0_2 = arith.constant 0 : index
    %c0_3 = arith.constant 0 : index
    %c0_4 = arith.constant 0 : index
    %3 = vector.load %arg2[%c0_2, %c0_3, %c0_4] : memref<1x7x32xbf16, #tpu.memory_space<vmem>>, vector<1x7x32xbf16>
    %4 = vector.shape_cast %3 : vector<1x7x32xbf16> to vector<7x32xbf16>
    %c0_5 = arith.constant 0 : index
    %c0_6 = arith.constant 0 : index
    %c0_7 = arith.constant 0 : index
    %5 = vector.load %arg3[%c0_5, %c0_6, %c0_7] : memref<1x8x32xbf16, #tpu.memory_space<vmem>>, vector<1x8x32xbf16>
    %6 = vector.shape_cast %5 : vector<1x8x32xbf16> to vector<8x32xbf16>
    %c0_8 = arith.constant 0 : index
    %c0_9 = arith.constant 0 : index
    %7 = vector.load %arg5[%c0_8, %c0_9] : memref<32x32xbf16, #tpu.memory_space<vmem>>, vector<32x32xbf16>
    %cst = arith.constant dense<0.000000e+00> : vector<7x32xf32>
    %8 = tpu.matmul %4, %7, %cst {dimension_numbers = #tpu.dot_dimension_numbers<[1], [0], [0], [1], [0, 0, 1, 1], [], []>} : vector<7x32xbf16>, vector<32x32xbf16>, vector<7x32xf32> -> vector<7x32xf32>
    %c0_10 = arith.constant 0 : index
    %c0_11 = arith.constant 0 : index
    %9 = vector.load %arg6[%c0_10, %c0_11] : memref<1x32xf32, #tpu.memory_space<vmem>>, vector<1x32xf32>
    %10 = vector.broadcast %9 : vector<1x32xf32> to vector<7x32xf32>
    %11 = arith.addf %8, %10 : vector<7x32xf32>
    %cst_12 = arith.constant 0.353553385 : f32
    %12 = vector.broadcast %cst_12 : f32 to vector<7x32xf32>
    %13 = arith.mulf %11, %12 : vector<7x32xf32>
    %14 = arith.truncf %13 : vector<7x32xf32> to vector<7x32xbf16>
    %c0_13 = arith.constant 0 : index
    %c0_14 = arith.constant 0 : index
    %15 = vector.load %arg7[%c0_13, %c0_14] : memref<32x32xbf16, #tpu.memory_space<vmem>>, vector<32x32xbf16>
    %cst_15 = arith.constant dense<0.000000e+00> : vector<8x32xf32>
    %16 = tpu.matmul %6, %15, %cst_15 {dimension_numbers = #tpu.dot_dimension_numbers<[1], [0], [0], [1], [0, 0, 1, 1], [], []>} : vector<8x32xbf16>, vector<32x32xbf16>, vector<8x32xf32> -> vector<8x32xf32>
    %c0_16 = arith.constant 0 : index
    %c0_17 = arith.constant 0 : index
    %17 = vector.load %arg8[%c0_16, %c0_17] : memref<1x32xf32, #tpu.memory_space<vmem>>, vector<1x32xf32>
    %18 = vector.broadcast %17 : vector<1x32xf32> to vector<8x32xf32>
    %19 = arith.addf %16, %18 : vector<8x32xf32>
    %20 = arith.truncf %19 : vector<8x32xf32> to vector<8x32xbf16>
    %c0_18 = arith.constant 0 : index
    %c0_19 = arith.constant 0 : index
    %21 = vector.load %arg9[%c0_18, %c0_19] : memref<32x32xbf16, #tpu.memory_space<vmem>>, vector<32x32xbf16>
    %cst_20 = arith.constant dense<0.000000e+00> : vector<8x32xf32>
    %22 = tpu.matmul %6, %21, %cst_20 {dimension_numbers = #tpu.dot_dimension_numbers<[1], [0], [0], [1], [0, 0, 1, 1], [], []>} : vector<8x32xbf16>, vector<32x32xbf16>, vector<8x32xf32> -> vector<8x32xf32>
    %c0_21 = arith.constant 0 : index
    %c0_22 = arith.constant 0 : index
    %23 = vector.load %arg10[%c0_21, %c0_22] : memref<1x32xf32, #tpu.memory_space<vmem>>, vector<1x32xf32>
    %24 = vector.broadcast %23 : vector<1x32xf32> to vector<8x32xf32>
    %25 = arith.addf %22, %24 : vector<8x32xf32>
    %26 = arith.truncf %25 : vector<8x32xf32> to vector<8x32xbf16>
    %c0_23 = arith.constant 0 : index
    %c0_24 = arith.constant 0 : index
    %c0_25 = arith.constant 0 : index
    %27 = vector.load %arg4[%c0_23, %c0_24, %c0_25] : memref<1x1x8xf32, #tpu.memory_space<vmem>>, vector<1x1x8xf32>
    %28 = vector.shape_cast %27 : vector<1x1x8xf32> to vector<1x8xf32>
    %29 = vector.extract_strided_slice %14 {offsets = [0, 0], sizes = [7, 8], strides = [1, 1]} : vector<7x32xbf16> to vector<7x8xbf16>
    %30 = vector.extract_strided_slice %20 {offsets = [0, 0], sizes = [8, 8], strides = [1, 1]} : vector<8x32xbf16> to vector<8x8xbf16>
    %31 = vector.extract_strided_slice %26 {offsets = [0, 0], sizes = [8, 8], strides = [1, 1]} : vector<8x32xbf16> to vector<8x8xbf16>
    %cst_26 = arith.constant dense<0.000000e+00> : vector<7x8xf32>
    %32 = tpu.matmul %29, %30, %cst_26 {dimension_numbers = #tpu.dot_dimension_numbers<[1], [1], [0], [0], [0, 0, 1, 0], [], []>} : vector<7x8xbf16>, vector<8x8xbf16>, vector<7x8xf32> -> vector<7x8xf32>
    %33 = vector.broadcast %28 : vector<1x8xf32> to vector<7x8xf32>
    %34 = arith.addf %32, %33 : vector<7x8xf32>
    %cst_27 = arith.constant dense<0xFF800000> : vector<7xf32>
    %35 = vector.multi_reduction <maximumf>, %34, %cst_27 [1] : vector<7x8xf32> to vector<7xf32>
    %36 = vector.shape_cast %35 : vector<7xf32> to vector<7x1xf32>
    %37 = vector.broadcast %36 : vector<7x1xf32> to vector<7x8xf32>
    %38 = arith.subf %34, %37 : vector<7x8xf32>
    %39 = math.exp %38 : vector<7x8xf32>
    %cst_28 = arith.constant dense<0.000000e+00> : vector<7xf32>
    %40 = vector.multi_reduction <add>, %39, %cst_28 [1] : vector<7x8xf32> to vector<7xf32>
    %41 = vector.shape_cast %40 : vector<7xf32> to vector<7x1xf32>
    %42 = tpu.reciprocal %41 {approx = true} : vector<7x1xf32> -> vector<7x1xf32>
    %43 = vector.broadcast %42 : vector<7x1xf32> to vector<7x8xf32>
    %44 = arith.mulf %39, %43 : vector<7x8xf32>
    %45 = arith.truncf %44 : vector<7x8xf32> to vector<7x8xbf16>
    %cst_29 = arith.constant dense<0.000000e+00> : vector<7x8xf32>
    %46 = tpu.matmul %45, %31, %cst_29 {dimension_numbers = #tpu.dot_dimension_numbers<[1], [0], [0], [1], [0, 0, 1, 1], [], []>} : vector<7x8xbf16>, vector<8x8xbf16>, vector<7x8xf32> -> vector<7x8xf32>
    %47 = vector.extract_strided_slice %14 {offsets = [0, 8], sizes = [7, 8], strides = [1, 1]} : vector<7x32xbf16> to vector<7x8xbf16>
    %48 = vector.extract_strided_slice %20 {offsets = [0, 8], sizes = [8, 8], strides = [1, 1]} : vector<8x32xbf16> to vector<8x8xbf16>
    %49 = vector.extract_strided_slice %26 {offsets = [0, 8], sizes = [8, 8], strides = [1, 1]} : vector<8x32xbf16> to vector<8x8xbf16>
    %cst_30 = arith.constant dense<0.000000e+00> : vector<7x8xf32>
    %50 = tpu.matmul %47, %48, %cst_30 {dimension_numbers = #tpu.dot_dimension_numbers<[1], [1], [0], [0], [0, 0, 1, 0], [], []>} : vector<7x8xbf16>, vector<8x8xbf16>, vector<7x8xf32> -> vector<7x8xf32>
    %51 = vector.broadcast %28 : vector<1x8xf32> to vector<7x8xf32>
    %52 = arith.addf %50, %51 : vector<7x8xf32>
    %cst_31 = arith.constant dense<0xFF800000> : vector<7xf32>
    %53 = vector.multi_reduction <maximumf>, %52, %cst_31 [1] : vector<7x8xf32> to vector<7xf32>
    %54 = vector.shape_cast %53 : vector<7xf32> to vector<7x1xf32>
    %55 = vector.broadcast %54 : vector<7x1xf32> to vector<7x8xf32>
    %56 = arith.subf %52, %55 : vector<7x8xf32>
    %57 = math.exp %56 : vector<7x8xf32>
    %cst_32 = arith.constant dense<0.000000e+00> : vector<7xf32>
    %58 = vector.multi_reduction <add>, %57, %cst_32 [1] : vector<7x8xf32> to vector<7xf32>
    %59 = vector.shape_cast %58 : vector<7xf32> to vector<7x1xf32>
    %60 = tpu.reciprocal %59 {approx = true} : vector<7x1xf32> -> vector<7x1xf32>
    %61 = vector.broadcast %60 : vector<7x1xf32> to vector<7x8xf32>
    %62 = arith.mulf %57, %61 : vector<7x8xf32>
    %63 = arith.truncf %62 : vector<7x8xf32> to vector<7x8xbf16>
    %cst_33 = arith.constant dense<0.000000e+00> : vector<7x8xf32>
    %64 = tpu.matmul %63, %49, %cst_33 {dimension_numbers = #tpu.dot_dimension_numbers<[1], [0], [0], [1], [0, 0, 1, 1], [], []>} : vector<7x8xbf16>, vector<8x8xbf16>, vector<7x8xf32> -> vector<7x8xf32>
    %65 = vector.extract_strided_slice %14 {offsets = [0, 16], sizes = [7, 8], strides = [1, 1]} : vector<7x32xbf16> to vector<7x8xbf16>
    %66 = vector.extract_strided_slice %20 {offsets = [0, 16], sizes = [8, 8], strides = [1, 1]} : vector<8x32xbf16> to vector<8x8xbf16>
    %67 = vector.extract_strided_slice %26 {offsets = [0, 16], sizes = [8, 8], strides = [1, 1]} : vector<8x32xbf16> to vector<8x8xbf16>
    %cst_34 = arith.constant dense<0.000000e+00> : vector<7x8xf32>
    %68 = tpu.matmul %65, %66, %cst_34 {dimension_numbers = #tpu.dot_dimension_numbers<[1], [1], [0], [0], [0, 0, 1, 0], [], []>} : vector<7x8xbf16>, vector<8x8xbf16>, vector<7x8xf32> -> vector<7x8xf32>
    %69 = vector.broadcast %28 : vector<1x8xf32> to vector<7x8xf32>
    %70 = arith.addf %68, %69 : vector<7x8xf32>
    %cst_35 = arith.constant dense<0xFF800000> : vector<7xf32>
    %71 = vector.multi_reduction <maximumf>, %70, %cst_35 [1] : vector<7x8xf32> to vector<7xf32>
    %72 = vector.shape_cast %71 : vector<7xf32> to vector<7x1xf32>
    %73 = vector.broadcast %72 : vector<7x1xf32> to vector<7x8xf32>
    %74 = arith.subf %70, %73 : vector<7x8xf32>
    %75 = math.exp %74 : vector<7x8xf32>
    %cst_36 = arith.constant dense<0.000000e+00> : vector<7xf32>
    %76 = vector.multi_reduction <add>, %75, %cst_36 [1] : vector<7x8xf32> to vector<7xf32>
    %77 = vector.shape_cast %76 : vector<7xf32> to vector<7x1xf32>
    %78 = tpu.reciprocal %77 {approx = true} : vector<7x1xf32> -> vector<7x1xf32>
    %79 = vector.broadcast %78 : vector<7x1xf32> to vector<7x8xf32>
    %80 = arith.mulf %75, %79 : vector<7x8xf32>
    %81 = arith.truncf %80 : vector<7x8xf32> to vector<7x8xbf16>
    %cst_37 = arith.constant dense<0.000000e+00> : vector<7x8xf32>
    %82 = tpu.matmul %81, %67, %cst_37 {dimension_numbers = #tpu.dot_dimension_numbers<[1], [0], [0], [1], [0, 0, 1, 1], [], []>} : vector<7x8xbf16>, vector<8x8xbf16>, vector<7x8xf32> -> vector<7x8xf32>
    %83 = vector.extract_strided_slice %14 {offsets = [0, 24], sizes = [7, 8], strides = [1, 1]} : vector<7x32xbf16> to vector<7x8xbf16>
    %84 = vector.extract_strided_slice %20 {offsets = [0, 24], sizes = [8, 8], strides = [1, 1]} : vector<8x32xbf16> to vector<8x8xbf16>
    %85 = vector.extract_strided_slice %26 {offsets = [0, 24], sizes = [8, 8], strides = [1, 1]} : vector<8x32xbf16> to vector<8x8xbf16>
    %cst_38 = arith.constant dense<0.000000e+00> : vector<7x8xf32>
    %86 = tpu.matmul %83, %84, %cst_38 {dimension_numbers = #tpu.dot_dimension_numbers<[1], [1], [0], [0], [0, 0, 1, 0], [], []>} : vector<7x8xbf16>, vector<8x8xbf16>, vector<7x8xf32> -> vector<7x8xf32>
    %87 = vector.broadcast %28 : vector<1x8xf32> to vector<7x8xf32>
    %88 = arith.addf %86, %87 : vector<7x8xf32>
    %cst_39 = arith.constant dense<0xFF800000> : vector<7xf32>
    %89 = vector.multi_reduction <maximumf>, %88, %cst_39 [1] : vector<7x8xf32> to vector<7xf32>
    %90 = vector.shape_cast %89 : vector<7xf32> to vector<7x1xf32>
    %91 = vector.broadcast %90 : vector<7x1xf32> to vector<7x8xf32>
    %92 = arith.subf %88, %91 : vector<7x8xf32>
    %93 = math.exp %92 : vector<7x8xf32>
    %cst_40 = arith.constant dense<0.000000e+00> : vector<7xf32>
    %94 = vector.multi_reduction <add>, %93, %cst_40 [1] : vector<7x8xf32> to vector<7xf32>
    %95 = vector.shape_cast %94 : vector<7xf32> to vector<7x1xf32>
    %96 = tpu.reciprocal %95 {approx = true} : vector<7x1xf32> -> vector<7x1xf32>
    %97 = vector.broadcast %96 : vector<7x1xf32> to vector<7x8xf32>
    %98 = arith.mulf %93, %97 : vector<7x8xf32>
    %99 = arith.truncf %98 : vector<7x8xf32> to vector<7x8xbf16>
    %cst_41 = arith.constant dense<0.000000e+00> : vector<7x8xf32>
    %100 = tpu.matmul %99, %85, %cst_41 {dimension_numbers = #tpu.dot_dimension_numbers<[1], [0], [0], [1], [0, 0, 1, 1], [], []>} : vector<7x8xbf16>, vector<8x8xbf16>, vector<7x8xf32> -> vector<7x8xf32>
    %101 = tpu.concatenate %46, %64, %82, %100 in 1 : vector<7x8xf32>, vector<7x8xf32>, vector<7x8xf32>, vector<7x8xf32> -> vector<7x32xf32>
    %102 = arith.truncf %101 : vector<7x32xf32> to vector<7x32xbf16>
    %c0_42 = arith.constant 0 : index
    %c0_43 = arith.constant 0 : index
    %103 = vector.load %arg11[%c0_42, %c0_43] : memref<32x32xbf16, #tpu.memory_space<vmem>>, vector<32x32xbf16>
    %cst_44 = arith.constant dense<0.000000e+00> : vector<7x32xf32>
    %104 = tpu.matmul %102, %103, %cst_44 {dimension_numbers = #tpu.dot_dimension_numbers<[1], [0], [0], [1], [0, 0, 1, 1], [], []>} : vector<7x32xbf16>, vector<32x32xbf16>, vector<7x32xf32> -> vector<7x32xf32>
    %c0_45 = arith.constant 0 : index
    %c0_46 = arith.constant 0 : index
    %105 = vector.load %arg12[%c0_45, %c0_46] : memref<1x32xf32, #tpu.memory_space<vmem>>, vector<1x32xf32>
    %106 = vector.broadcast %105 : vector<1x32xf32> to vector<7x32xf32>
    %107 = arith.addf %104, %106 : vector<7x32xf32>
    %108 = arith.addf %2, %107 : vector<7x32xf32>
    %c0_47 = arith.constant 0 : index
    %c0_48 = arith.constant 0 : index
    %109 = vector.load %arg13[%c0_47, %c0_48] : memref<1x32xf32, #tpu.memory_space<vmem>>, vector<1x32xf32>
    %c0_49 = arith.constant 0 : index
    %c0_50 = arith.constant 0 : index
    %110 = vector.load %arg14[%c0_49, %c0_50] : memref<1x32xf32, #tpu.memory_space<vmem>>, vector<1x32xf32>
    %cst_51 = arith.constant dense<0.000000e+00> : vector<7xf32>
    %111 = vector.multi_reduction <add>, %108, %cst_51 [1] : vector<7x32xf32> to vector<7xf32>
    %112 = vector.shape_cast %111 : vector<7xf32> to vector<7x1xf32>
    %cst_52 = arith.constant 3.200000e+01 : f32
    %113 = vector.broadcast %cst_52 : f32 to vector<7x1xf32>
    %114 = arith.divf %112, %113 : vector<7x1xf32>
    %115 = vector.broadcast %114 : vector<7x1xf32> to vector<7x32xf32>
    %116 = arith.subf %108, %115 : vector<7x32xf32>
    %117 = arith.mulf %116, %116 : vector<7x32xf32>
    %cst_53 = arith.constant dense<0.000000e+00> : vector<7xf32>
    %118 = vector.multi_reduction <add>, %117, %cst_53 [1] : vector<7x32xf32> to vector<7xf32>
    %119 = vector.shape_cast %118 : vector<7xf32> to vector<7x1xf32>
    %cst_54 = arith.constant 3.200000e+01 : f32
    %120 = vector.broadcast %cst_54 : f32 to vector<7x1xf32>
    %121 = arith.divf %119, %120 : vector<7x1xf32>
    %122 = vector.broadcast %114 : vector<7x1xf32> to vector<7x32xf32>
    %123 = arith.subf %108, %122 : vector<7x32xf32>
    %cst_55 = arith.constant 9.99999974E-6 : f32
    %124 = vector.broadcast %cst_55 : f32 to vector<7x1xf32>
    %125 = arith.addf %121, %124 : vector<7x1xf32>
    %126 = math.rsqrt %125 : vector<7x1xf32>
    %127 = vector.broadcast %126 : vector<7x1xf32> to vector<7x32xf32>
    %128 = arith.mulf %123, %127 : vector<7x32xf32>
    %129 = vector.broadcast %109 : vector<1x32xf32> to vector<7x32xf32>
    %130 = arith.mulf %128, %129 : vector<7x32xf32>
    %131 = vector.broadcast %110 : vector<1x32xf32> to vector<7x32xf32>
    %132 = arith.addf %130, %131 : vector<7x32xf32>
    %133 = arith.truncf %132 : vector<7x32xf32> to vector<7x32xbf16>
    %c0_56 = arith.constant 0 : index
    %c0_57 = arith.constant 0 : index
    %c0_58 = arith.constant 0 : index
    %134 = vector.load %arg15[%c0_56, %c0_57, %c0_58] : memref<1x7x32xbf16, #tpu.memory_space<vmem>>, vector<1x7x32xbf16>
    %135 = vector.shape_cast %134 : vector<1x7x32xbf16> to vector<7x32xbf16>
    %136 = vector.shape_cast %133 : vector<7x32xbf16> to vector<1x7x32xbf16>
    tpu.vector_store %arg15[%c0_56, %c0_57, %c0_58], %136 {strides = array<i32>} : memref<1x7x32xbf16, #tpu.memory_space<vmem>>, vector<1x7x32xbf16>,
    return
  }
  func.func @transform_0(%arg0: i32, %arg1: i32) -> (i32, i32, i32) {
    %c0_i32 = arith.constant 0 : i32
    %c0_i32_0 = arith.constant 0 : i32
    return %arg0, %arg1, %c0_i32 : i32, i32, i32
  }
  func.func @transform_1(%arg0: i32, %arg1: i32) -> (i32, i32, i32) {
    %c0_i32 = arith.constant 0 : i32
    %c0_i32_0 = arith.constant 0 : i32
    %c0_i32_1 = arith.constant 0 : i32
    return %arg0, %c0_i32, %c0_i32_0 : i32, i32, i32
  }
  func.func @transform_2(%arg0: i32, %arg1: i32) -> (i32, i32, i32) {
    %c0_i32 = arith.constant 0 : i32
    %c0_i32_0 = arith.constant 0 : i32
    %c0_i32_1 = arith.constant 0 : i32
    return %arg0, %c0_i32, %c0_i32_0 : i32, i32, i32
  }
  func.func @transform_3(%arg0: i32, %arg1: i32) -> (i32, i32) {
    %c0_i32 = arith.constant 0 : i32
    %c0_i32_0 = arith.constant 0 : i32
    %c0_i32_1 = arith.constant 0 : i32
    return %c0_i32, %c0_i32_0 : i32, i32
  }
  func.func @transform_4(%arg0: i32, %arg1: i32) -> (i32, i32) {
    %c0_i32 = arith.constant 0 : i32
    %c0_i32_0 = arith.constant 0 : i32
    %c0_i32_1 = arith.constant 0 : i32
    return %c0_i32, %c0_i32_0 : i32, i32
  }
  func.func @transform_5(%arg0: i32, %arg1: i32) -> (i32, i32) {
    %c0_i32 = arith.constant 0 : i32
    %c0_i32_0 = arith.constant 0 : i32
    %c0_i32_1 = arith.constant 0 : i32
    return %c0_i32, %c0_i32_0 : i32, i32
  }
  func.func @transform_6(%arg0: i32, %arg1: i32) -> (i32, i32) {
    %c0_i32 = arith.constant 0 : i32
    %c0_i32_0 = arith.constant 0 : i32
    %c0_i32_1 = arith.constant 0 : i32
    return %c0_i32, %c0_i32_0 : i32, i32
  }
  func.func @transform_7(%arg0: i32, %arg1: i32) -> (i32, i32) {
    %c0_i32 = arith.constant 0 : i32
    %c0_i32_0 = arith.constant 0 : i32
    %c0_i32_1 = arith.constant 0 : i32
    return %c0_i32, %c0_i32_0 : i32, i32
  }
  func.func @transform_8(%arg0: i32, %arg1: i32) -> (i32, i32) {
    %c0_i32 = arith.constant 0 : i32
    %c0_i32_0 = arith.constant 0 : i32
    %c0_i32_1 = arith.constant 0 : i32
    return %c0_i32, %c0_i32_0 : i32, i32
  }
  func.func @transform_9(%arg0: i32, %arg1: i32) -> (i32, i32) {
    %c0_i32 = arith.constant 0 : i32
    %c0_i32_0 = arith.constant 0 : i32
    %c0_i32_1 = arith.constant 0 : i32
    return %c0_i32, %c0_i32_0 : i32, i32
  }
  func.func @transform_10(%arg0: i32, %arg1: i32) -> (i32, i32) {
    %c0_i32 = arith.constant 0 : i32
    %c0_i32_0 = arith.constant 0 : i32
    %c0_i32_1 = arith.constant 0 : i32
    return %c0_i32, %c0_i32_0 : i32, i32
  }
  func.func @transform_11(%arg0: i32, %arg1: i32) -> (i32, i32) {
    %c0_i32 = arith.constant 0 : i32
    %c0_i32_0 = arith.constant 0 : i32
    %c0_i32_1 = arith.constant 0 : i32
    return %c0_i32, %c0_i32_0 : i32, i32
  }
  func.func @transform_12(%arg0: i32, %arg1: i32) -> (i32, i32) {
    %c0_i32 = arith.constant 0 : i32
    %c0_i32_0 = arith.constant 0 : i32
    %c0_i32_1 = arith.constant 0 : i32
    return %c0_i32, %c0_i32_0 : i32, i32
  }
  func.func @transform_13(%arg0: i32, %arg1: i32) -> (i32, i32, i32) {
    %c0_i32 = arith.constant 0 : i32
    %c0_i32_0 = arith.constant 0 : i32
    return %arg0, %arg1, %c0_i32 : i32, i32, i32
  }
}

module attributes {stable_mosaic.version = 11 : i64} {
  func.func @_ln_kernel(%arg0: i32, %arg1: memref<14x32xbf16, #tpu.memory_space<vmem>>, %arg2: memref<1x32xf32, #tpu.memory_space<vmem>>, %arg3: memref<1x32xf32, #tpu.memory_space<vmem>>, %arg4: memref<14x32xbf16, #tpu.memory_space<vmem>>) attributes {dimension_semantics = [#tpu.dimension_semantics<parallel>], iteration_bounds = array<i64: 1>, scalar_prefetch = 0 : i64, scratch_operands = 0 : i64, tpu.core_type = #tpu.core_type<tc>, window_params = [{transform_indices = @transform_0, window_bounds = array<i64: 14, 32>}, {pipeline_mode = #tpu.pipeline_mode<synchronous>, transform_indices = @transform_1, window_bounds = array<i64: 1, 32>}, {pipeline_mode = #tpu.pipeline_mode<synchronous>, transform_indices = @transform_2, window_bounds = array<i64: 1, 32>}, {transform_indices = @transform_3, window_bounds = array<i64: 14, 32>}]} {
    %c0 = arith.constant 0 : index
    %c0_0 = arith.constant 0 : index
    %0 = vector.load %arg1[%c0, %c0_0] : memref<14x32xbf16, #tpu.memory_space<vmem>>, vector<14x32xbf16>
    %1 = arith.extf %0 : vector<14x32xbf16> to vector<14x32xf32>
    %c0_1 = arith.constant 0 : index
    %c0_2 = arith.constant 0 : index
    %2 = vector.load %arg2[%c0_1, %c0_2] : memref<1x32xf32, #tpu.memory_space<vmem>>, vector<1x32xf32>
    %c0_3 = arith.constant 0 : index
    %c0_4 = arith.constant 0 : index
    %3 = vector.load %arg3[%c0_3, %c0_4] : memref<1x32xf32, #tpu.memory_space<vmem>>, vector<1x32xf32>
    %cst = arith.constant dense<0.000000e+00> : vector<14xf32>
    %4 = vector.multi_reduction <add>, %1, %cst [1] : vector<14x32xf32> to vector<14xf32>
    %5 = vector.shape_cast %4 : vector<14xf32> to vector<14x1xf32>
    %cst_5 = arith.constant 3.200000e+01 : f32
    %6 = vector.broadcast %cst_5 : f32 to vector<14x1xf32>
    %7 = arith.divf %5, %6 : vector<14x1xf32>
    %8 = vector.broadcast %7 : vector<14x1xf32> to vector<14x32xf32>
    %9 = arith.subf %1, %8 : vector<14x32xf32>
    %10 = arith.mulf %9, %9 : vector<14x32xf32>
    %cst_6 = arith.constant dense<0.000000e+00> : vector<14xf32>
    %11 = vector.multi_reduction <add>, %10, %cst_6 [1] : vector<14x32xf32> to vector<14xf32>
    %12 = vector.shape_cast %11 : vector<14xf32> to vector<14x1xf32>
    %cst_7 = arith.constant 3.200000e+01 : f32
    %13 = vector.broadcast %cst_7 : f32 to vector<14x1xf32>
    %14 = arith.divf %12, %13 : vector<14x1xf32>
    %15 = vector.broadcast %7 : vector<14x1xf32> to vector<14x32xf32>
    %16 = arith.subf %1, %15 : vector<14x32xf32>
    %cst_8 = arith.constant 9.99999974E-6 : f32
    %17 = vector.broadcast %cst_8 : f32 to vector<14x1xf32>
    %18 = arith.addf %14, %17 : vector<14x1xf32>
    %19 = math.rsqrt %18 : vector<14x1xf32>
    %20 = vector.broadcast %19 : vector<14x1xf32> to vector<14x32xf32>
    %21 = arith.mulf %16, %20 : vector<14x32xf32>
    %22 = vector.broadcast %2 : vector<1x32xf32> to vector<14x32xf32>
    %23 = arith.mulf %21, %22 : vector<14x32xf32>
    %24 = vector.broadcast %3 : vector<1x32xf32> to vector<14x32xf32>
    %25 = arith.addf %23, %24 : vector<14x32xf32>
    %26 = arith.truncf %25 : vector<14x32xf32> to vector<14x32xbf16>
    %c0_9 = arith.constant 0 : index
    %c0_10 = arith.constant 0 : index
    %27 = vector.load %arg4[%c0_9, %c0_10] : memref<14x32xbf16, #tpu.memory_space<vmem>>, vector<14x32xbf16>
    tpu.vector_store %arg4[%c0_9, %c0_10], %26 {strides = array<i32>} : memref<14x32xbf16, #tpu.memory_space<vmem>>, vector<14x32xbf16>,
    return
  }
  func.func @transform_0(%arg0: i32) -> (i32, i32) {
    %c0_i32 = arith.constant 0 : i32
    %c0_i32_0 = arith.constant 0 : i32
    return %arg0, %c0_i32 : i32, i32
  }
  func.func @transform_1(%arg0: i32) -> (i32, i32) {
    %c0_i32 = arith.constant 0 : i32
    %c0_i32_0 = arith.constant 0 : i32
    %c0_i32_1 = arith.constant 0 : i32
    return %c0_i32, %c0_i32_0 : i32, i32
  }
  func.func @transform_2(%arg0: i32) -> (i32, i32) {
    %c0_i32 = arith.constant 0 : i32
    %c0_i32_0 = arith.constant 0 : i32
    %c0_i32_1 = arith.constant 0 : i32
    return %c0_i32, %c0_i32_0 : i32, i32
  }
  func.func @transform_3(%arg0: i32) -> (i32, i32) {
    %c0_i32 = arith.constant 0 : i32
    %c0_i32_0 = arith.constant 0 : i32
    return %arg0, %c0_i32 : i32, i32
  }
}

module attributes {stable_mosaic.version = 11 : i64} {
  func.func @_linear_kernel(%arg0: i32, %arg1: i32, %arg2: memref<14x32xbf16, #tpu.memory_space<vmem>>, %arg3: memref<32x16xbf16, #tpu.memory_space<vmem>>, %arg4: memref<1x16xf32, #tpu.memory_space<vmem>>, %arg5: memref<14x16xf32, #tpu.memory_space<vmem>>) attributes {dimension_semantics = [#tpu.dimension_semantics<parallel>, #tpu.dimension_semantics<parallel>], iteration_bounds = array<i64: 1, 1>, scalar_prefetch = 0 : i64, scratch_operands = 0 : i64, tpu.core_type = #tpu.core_type<tc>, window_params = [{transform_indices = @transform_0, window_bounds = array<i64: 14, 32>}, {transform_indices = @transform_1, window_bounds = array<i64: 32, 16>}, {transform_indices = @transform_2, window_bounds = array<i64: 1, 16>}, {transform_indices = @transform_3, window_bounds = array<i64: 14, 16>}]} {
    %c0 = arith.constant 0 : index
    %c0_0 = arith.constant 0 : index
    %0 = vector.load %arg2[%c0, %c0_0] : memref<14x32xbf16, #tpu.memory_space<vmem>>, vector<14x32xbf16>
    %c0_1 = arith.constant 0 : index
    %c0_2 = arith.constant 0 : index
    %1 = vector.load %arg3[%c0_1, %c0_2] : memref<32x16xbf16, #tpu.memory_space<vmem>>, vector<32x16xbf16>
    %cst = arith.constant dense<0.000000e+00> : vector<14x16xf32>
    %2 = tpu.matmul %0, %1, %cst {dimension_numbers = #tpu.dot_dimension_numbers<[1], [0], [0], [1], [0, 0, 1, 1], [], []>} : vector<14x32xbf16>, vector<32x16xbf16>, vector<14x16xf32> -> vector<14x16xf32>
    %c0_3 = arith.constant 0 : index
    %c0_4 = arith.constant 0 : index
    %3 = vector.load %arg4[%c0_3, %c0_4] : memref<1x16xf32, #tpu.memory_space<vmem>>, vector<1x16xf32>
    %4 = vector.broadcast %3 : vector<1x16xf32> to vector<14x16xf32>
    %5 = arith.addf %2, %4 : vector<14x16xf32>
    %c0_5 = arith.constant 0 : index
    %c0_6 = arith.constant 0 : index
    %6 = vector.load %arg5[%c0_5, %c0_6] : memref<14x16xf32, #tpu.memory_space<vmem>>, vector<14x16xf32>
    tpu.vector_store %arg5[%c0_5, %c0_6], %5 {strides = array<i32>} : memref<14x16xf32, #tpu.memory_space<vmem>>, vector<14x16xf32>,
    return
  }
  func.func @transform_0(%arg0: i32, %arg1: i32) -> (i32, i32) {
    %c0_i32 = arith.constant 0 : i32
    %c0_i32_0 = arith.constant 0 : i32
    return %arg0, %c0_i32 : i32, i32
  }
  func.func @transform_1(%arg0: i32, %arg1: i32) -> (i32, i32) {
    %c0_i32 = arith.constant 0 : i32
    %c0_i32_0 = arith.constant 0 : i32
    return %c0_i32, %arg1 : i32, i32
  }
  func.func @transform_2(%arg0: i32, %arg1: i32) -> (i32, i32) {
    %c0_i32 = arith.constant 0 : i32
    %c0_i32_0 = arith.constant 0 : i32
    return %c0_i32, %arg1 : i32, i32
  }
  func.func @transform_3(%arg0: i32, %arg1: i32) -> (i32, i32) {
    %c0_i32 = arith.constant 0 : i32
    return %arg0, %arg1 : i32, i32
  }
}

</mosaic_0001>

<bundles_post_ra>
// kernel: transformer_forward.17
= control target key start
LH: loop header
LB: loop body
LE: loop exit
PB: predicated region body
PF: predicated region fallthrough
CT: control target
= control target key end

     0   :  { %vm20_vm0 = vcmask 261120   ;;  %vm72_vm1 = vcmask 257024   ;;  %s132_s0 = inlined_call_operand.vmem [shape: bf16[16,32], index: 0, kind: input, shape index: {}]   ;;  %s133_s1 = inlined_call_operand.vmem [shape: f32[1,32], index: 1, kind: input, shape index: {}]   ;;  %s134_s2 = inlined_call_operand.vmem [shape: f32[1,32], index: 2, kind: input, shape index: {}]   ;;  %s135_s3 = inlined_call_operand.vmem [shape: bf16[16,32], index: 3, kind: output, shape index: {}]  }
   0x1   :  { %v86_v0 = vld [vmem:[%s132_s0] sm:$0xff]  }
   0x2   :  { %v87_v1 = vunpack.c.l.bf16 %v86_v0  ;;  %v88_v2 = vunpack.c.h.bf16 %v86_v0  ;;  %v79_v22 = vld [vmem:[%s133_s1] ss:$0 sm:$0xff] }
   0x3   :  { %v80_v24 = vld [vmem:[%s134_s2] ss:$0 sm:$0xff] }
   0x4   :  { %v21_v3 = vsel %vm20_vm0, %v87_v1, 0.0  ;;  %v24_v4 = vsel %vm20_vm0, %v88_v2, 0.0 }
   0x5   :  { %22 = vadd.xlane.f32.xlu0 %v21_v3 }
   0x9   :  { %25 = vadd.xlane.f32.xlu0 %v24_v4 }
  0x92   :  { %v23_v5 = vpop.xlane.xlu0 %22 }
  0x93   :  { %v28_v6 = vmul.f32 0.03125, %v23_v5 }
  0x95   :  { %v30_v7 = vsub.f32 %v87_v1, %v28_v6 }
  0x96   :  { %v26_v8 = vpop.xlane.xlu0 %25 }
  0x97   :  { %v29_v9 = vmul.f32 0.03125, %v26_v8  ;;  %v32_v10 = vmul.f32 %v30_v7, %v30_v7 }
  0x99   :  { %v31_v11 = vsub.f32 %v88_v2, %v29_v9  ;;  %v34_v12 = vsel %vm20_vm0, %v32_v10, 0.0 }
  0x9a   :  { %35 = vadd.xlane.f32.xlu1 %v34_v12 }
  0x9b   :  { %v33_v13 = vmul.f32 %v31_v11, %v31_v11 }
  0x9d   :  { %v37_v14 = vsel %vm20_vm0, %v33_v13, 0.0 }
  0x9e   :  { %38 = vadd.xlane.f32.xlu1 %v37_v14 }
 0x127   :  { %v36_v15 = vpop.xlane.xlu1 %35 }
 0x128   :  { %v40_v16 = vmul.f32 0.03125, %v36_v15 }
 0x12a   :  { %v42_v17 = vadd.f32 1e-05, %v40_v16 }
 0x12b   :  { %v39_v18 = vpop.xlane.xlu1 %38 }
 0x12c   :  { %89 = vrsqrt.f32 %v42_v17  ;;  %v41_v19 = vmul.f32 0.03125, %v39_v18 }
 0x12e   :  { %v43_v20 = vadd.f32 1e-05, %v41_v19 }
 0x130   :  { %91 = vrsqrt.f32 %v43_v20 }
 0x136   :  { %v90_v21 = vpop.eup %89 }
 0x137   :  { %v46_v23 = vmul.f32 %v90_v21, %v30_v7 }
 0x139   :  { %v54_v25 = vmul.f32 %v79_v22, %v46_v23 }
 0x13a   :  { %v92_v26 = vpop.eup %91 }
 0x13b   :  { %v62_v27 = vadd.f32 %v80_v24, %v54_v25  ;;  %v47_v28 = vmul.f32 %v92_v26, %v31_v11 }
 0x13d   :  { %v83_v29 = vpack.c.bf16 %v62_v27, %v62_v27  ;;  %v55_v30 = vmul.f32 %v79_v22, %v47_v28 }
 0x13f   :  { %73 = vst.msk [vmem:[%s135_s3] sm:$0xf] %vm72_vm1, %v83_v29  ;;  %v63_v31 = vadd.f32 %v80_v24, %v55_v30 }
 0x141   :  { %v84_v32 = vpack.c.bf16 %v63_v31, %v63_v31 }
 0x143   :  { %74 = vst.msk [vmem:[%s135_s3 + $0x4] sm:$0xf] %vm72_vm1, %v84_v32 }

// kernel: transformer_forward.14
= control target key start
LH: loop header
LB: loop body
LE: loop exit
PB: predicated region body
PF: predicated region fallthrough
CT: control target
= control target key end

     0   :  { %v312_v0 = vmov 0.0   ;;  %vm313_vm0 = vmmov 0   ;;  %vm59_vm1 = vcmask 261120   ;;  %vm146_vm2 = vcmask 523264   ;;  %s398_s1 = inlined_call_operand.vmem [shape: bf16[32,64], index: 1, kind: input, shape index: {}]   ;;  %s399_s0 = inlined_call_operand.vmem [shape: bf16[16,32], index: 0, kind: input, shape index: {}]   ;;  %s400_s3 = inlined_call_operand.vmem [shape: bf16[64,32], index: 3, kind: input, shape index: {}]   ;;  %s401_s2 = inlined_call_operand.vmem [shape: f32[1,64], index: 2, kind: input, shape index: {}]   ;;  %s402_s4 = inlined_call_operand.vmem [shape: f32[1,32], index: 4, kind: input, shape index: {}]   ;;  %s403_s5 = inlined_call_operand.vmem [shape: f32[1,32], index: 5, kind: input, shape index: {}]   ;;  %s404_s6 = inlined_call_operand.vmem [shape: f32[1,32], index: 6, kind: input, shape index: {}]   ;;  %s405_s7 = inlined_call_operand.vmem [shape: bf16[16,32], index: 7, kind: output, shape index: {}]  }
   0x1   :  { %278 = vmatprep.subr.bf16.mxu0 %v312_v0  ;;  %v300_v1 = vld [vmem:[%s398_s1] sm:$0xff]   ;;  %282 = vmatprep.mubr.msk.bf16.mxu0 %vm313_vm0, %v312_v0  ;;  %v301_v2 = vld [vmem:[%s398_s1 + $0x8] sm:$0xff]   ;;  %v305_v6 = vld [vmem:[%s400_s3 + $0x10] sm:$0xff]   ;;  %vm246_vm3 = vcmask 257024  }
   0x2   :  { %286 = vmatprep.subr.bf16.mxu1 %v312_v0  ;;  %294 = vmatprep.mubr.msk.bf16.mxu1 %vm313_vm0, %v312_v0  ;;  %v27_v3 = vld [vmem:[%s399_s0] sm:$0xff]   ;;  %v304_v5 = vld [vmem:[%s400_s3 + $0x8] sm:$0xff]   ;;  %v306_v7 = vld [vmem:[%s400_s3 + $0x18] sm:$0xff]  }
   0x3   :  { %279 = vmatpush3.bf16.msra.mxu0 %v300_v1  ;;  %v303_v4 = vld [vmem:[%s400_s3] sm:$0xff]   ;;  %v29_v19 = vunpack.c.l.bf16 %v27_v3  ;;  %v30_v23 = vunpack.c.h.bf16 %v27_v3 }
   0x4   :  { %280 = vmatprep.subr.bf16.mxu0 %v312_v0  ;;  %287 = vmatpush3.bf16.msra.mxu1 %v303_v4  ;;  %v253_v8 = vld [vmem:[%s401_s2] ss:$0 sm:$0xff] }
   0x5   :  { %288 = vmatprep.subr.bf16.mxu1 %v312_v0  ;;  %v258_v18 = vld [vmem:[%s402_s4] ss:$0 sm:$0xff] }
   0x6   :  { %v264_v48 = vld [vmem:[%s403_s5] ss:$0 sm:$0xff] }
   0x7   :  { %281 = vmatpush3.bf16.msra.mxu0 %v301_v2  ;;  %v265_v50 = vld [vmem:[%s404_s6] ss:$0 sm:$0xff] }
   0x8   :  { %289 = vmatpush3.bf16.msra.mxu1 %v304_v5 }
   0x9   :  { %290 = vmatprep.subr.bf16.mxu1 %v312_v0 }
   0xa   :  { %283 = vmatmul.mubr.msk.bf16.vlgmr.msra.gmra.mrb[0].mxu0 %vm59_vm1, %v27_v3 }
   0xc   :  { %291 = vmatpush3.bf16.msra.mxu1 %v305_v6 }
   0xd   :  { %292 = vmatprep.subr.bf16.mxu1 %v312_v0 }
  0x10   :  { %293 = vmatpush3.bf16.msra.mxu1 %v306_v7 }
  0xdd   :  { %v97_v9 = vpop.f32.mrb[0].mxu0 }
  0xde   :  { %v98_v10 = vadd.f32 %v253_v8, %v97_v9  ;;  %v284_v11 = vpop.f32.mrb[1].mxu0 }
  0xdf   :  { %v100_v12 = vpop.f32.mrb[2].mxu0 }
  0xe0   :  { %v101_v13 = vadd.f32 %v253_v8, %v100_v12  ;;  %v285_v14 = vpop.f32.mrb[3].mxu0  ;;  %v104_v15 = vmax.f32 %v98_v10, 0.0 }
  0xe2   :  { %v105_v16 = vmax.f32 %v101_v13, 0.0 }
  0xe4   :  { %v106_v17 = vpack.c.bf16 %v105_v16, %v104_v15 }
  0xe6   :  { %295 = vmatmul.mubr.msk.bf16.vlgmr.msra.gmra.mrb[0].mxu1 %vm146_vm2, %v106_v17 }
 0x1b9   :  { %v184_v20 = vpop.f32.mrb[0].mxu1 }
 0x1ba   :  { %v185_v21 = vadd.f32 %v258_v18, %v184_v20  ;;  %v296_v22 = vpop.f32.mrb[1].mxu1 }
 0x1bb   :  { %v187_v24 = vpop.f32.mrb[2].mxu1 }
 0x1bc   :  { %v188_v25 = vadd.f32 %v258_v18, %v187_v24  ;;  %v297_v26 = vpop.f32.mrb[3].mxu1  ;;  %v191_v27 = vadd.f32 %v185_v21, %v29_v19 }
 0x1be   :  { %v195_v28 = vsel %vm59_vm1, %v191_v27, 0.0  ;;  %v192_v29 = vadd.f32 %v188_v25, %v30_v23 }
 0x1bf   :  { %196 = vadd.xlane.f32.xlu0 %v195_v28 }
 0x1c0   :  { %v198_v30 = vsel %vm59_vm1, %v192_v29, 0.0 }
 0x1c3   :  { %199 = vadd.xlane.f32.xlu0 %v198_v30 }
 0x24c   :  { %v197_v31 = vpop.xlane.xlu0 %196 }
 0x24d   :  { %v202_v32 = vmul.f32 0.03125, %v197_v31 }
 0x24f   :  { %v204_v33 = vsub.f32 %v191_v27, %v202_v32 }
 0x250   :  { %v200_v34 = vpop.xlane.xlu0 %199 }
 0x251   :  { %v203_v35 = vmul.f32 0.03125, %v200_v34  ;;  %v206_v36 = vmul.f32 %v204_v33, %v204_v33 }
 0x253   :  { %v205_v37 = vsub.f32 %v192_v29, %v203_v35  ;;  %v208_v38 = vsel %vm59_vm1, %v206_v36, 0.0 }
 0x254   :  { %209 = vadd.xlane.f32.xlu1 %v208_v38 }
 0x255   :  { %v207_v39 = vmul.f32 %v205_v37, %v205_v37 }
 0x257   :  { %v211_v40 = vsel %vm59_vm1, %v207_v39, 0.0 }
 0x258   :  { %212 = vadd.xlane.f32.xlu1 %v211_v40 }
 0x2e1   :  { %v210_v41 = vpop.xlane.xlu1 %209 }
 0x2e2   :  { %v214_v42 = vmul.f32 0.03125, %v210_v41 }
 0x2e4   :  { %v216_v43 = vadd.f32 1e-05, %v214_v42 }
 0x2e5   :  { %v213_v44 = vpop.xlane.xlu1 %212 }
 0x2e6   :  { %308 = vrsqrt.f32 %v216_v43  ;;  %v215_v45 = vmul.f32 0.03125, %v213_v44 }
 0x2e8   :  { %v217_v46 = vadd.f32 1e-05, %v215_v45 }
 0x2ea   :  { %310 = vrsqrt.f32 %v217_v46 }
 0x2f0   :  { %v309_v47 = vpop.eup %308 }
 0x2f1   :  { %v220_v49 = vmul.f32 %v309_v47, %v204_v33 }
 0x2f3   :  { %v228_v51 = vmul.f32 %v264_v48, %v220_v49 }
 0x2f4   :  { %v311_v52 = vpop.eup %310 }
 0x2f5   :  { %v236_v53 = vadd.f32 %v265_v50, %v228_v51  ;;  %v221_v54 = vmul.f32 %v311_v52, %v205_v37 }
 0x2f7   :  { %v268_v55 = vpack.c.bf16 %v236_v53, %v236_v53  ;;  %v229_v56 = vmul.f32 %v264_v48, %v221_v54 }
 0x2f9   :  { %247 = vst.msk [vmem:[%s405_s7] sm:$0xf] %vm246_vm3, %v268_v55  ;;  %v237_v57 = vadd.f32 %v265_v50, %v229_v56 }
 0x2fb   :  { %v269_v58 = vpack.c.bf16 %v237_v57, %v237_v57 }
 0x2fd   :  { %248 = vst.msk [vmem:[%s405_s7 + $0x4] sm:$0xf] %vm246_vm3, %v269_v58 }

// kernel: transformer_forward.13
= control target key start
LH: loop header
LB: loop body
LE: loop exit
PB: predicated region body
PF: predicated region fallthrough
CT: control target
= control target key end

     0   :  { %s1666_s25 = smov 0   ;;  %s1668_s26 = smov 0   ;;  %s1840_s0 = inlined_call_operand.vmem [shape: bf16[2,8,32], index: 0, kind: input, shape index: {}, may-alias: {0,1}]   ;;  %s1841_s1 = inlined_call_operand.vmem [shape: bf16[2,8,32], index: 1, kind: input, shape index: {}, may-alias: {0,1}]   ;;  %s1842_s2 = inlined_call_operand.vmem [shape: f32[2,1,8], index: 2, kind: input, shape index: {}]   ;;  %s1843_s3 = inlined_call_operand.vmem [shape: bf16[32,32], index: 3, kind: input, shape index: {}]   ;;  %s1844_s4 = inlined_call_operand.vmem [shape: f32[1,32], index: 4, kind: input, shape index: {}]   ;;  %s1845_s5 = inlined_call_operand.vmem [shape: bf16[32,32], index: 5, kind: input, shape index: {}]   ;;  %s1846_s6 = inlined_call_operand.vmem [shape: f32[1,32], index: 6, kind: input, shape index: {}]   ;;  %s1847_s7 = inlined_call_operand.vmem [shape: bf16[32,32], index: 7, kind: input, shape index: {}]   ;;  %s1848_s8 = inlined_call_operand.vmem [shape: f32[1,32], index: 8, kind: input, shape index: {}]   ;;  %s1849_s9 = inlined_call_operand.vmem [shape: bf16[32,32], index: 9, kind: input, shape index: {}]   ;;  %s1850_s10 = inlined_call_operand.vmem [shape: f32[1,32], index: 10, kind: input, shape index: {}]   ;;  %s1851_s11 = inlined_call_operand.vmem [shape: f32[1,32], index: 11, kind: input, shape index: {}]   ;;  %s1852_s12 = inlined_call_operand.vmem [shape: f32[1,32], index: 12, kind: input, shape index: {}]   ;;  %s1853_s13 = inlined_call_operand.vmem [shape: bf16[2,8,32], index: 13, kind: output, shape index: {}]  }
   0x1   :  { %s1670_s27 = smov 0  }
   0x2 LB: > { %s35_s28 = sadd.s32 1, %s1582_s26  ;;  %p1365_p0 = scmp.ge.s32.totalorder %s1586_s27, 1  ;;  %s1586_s27 = sphi %s1670_s27, %s23_s27   ;;  %s1582_s26 = sphi %s1668_s26, %s1855_s26   ;;  %s1578_s25 = sphi %s1666_s25, %s1854_s25  }
   0x3   : > { %p37_p1 = scmp.ge.s32.totalorder %s35_s28, 2  ;;  %p422_p2 = scmp.lt.s32.totalorder %s1586_s27, 3 }
   0x5   : > { %s1857_s28 = smov (%p37_p1, %s35_s28), 0  ;;  %p423_p3 = pnand %p1365_p0, %p422_p2 }
   0x6   : > { %v1538_v0 = vld [vmem:[%s1845_s5] sm:$0xff] (!%p423_p3)   ;;  %v1588_v1 = vmov (!%p423_p3), 0.0   ;;  %v1540_v3 = vld [vmem:[%s1845_s5 + $0x8] sm:$0xff] (!%p423_p3)   ;;  %vm1589_vm0 = vmmov (!%p423_p3), 0   ;;  %p477_p4 = scmp.lt.s32.totalorder (!%p423_p3), %s1578_s25, 1  ;;  %vm525_vm1 = vcmask (!%p423_p3), 261120  }
   0x7   : > { %426 = sbr.rel (%p423_p3) target bundleno = 1766 (0x6e6), region = 72  ;;  %1434 = vmatprep.subr.bf16.mxu1 (!%p423_p3), %v1588_v1  ;;  %1426 = vmatprep.subr.bf16.mxu0 (!%p423_p3), %v1588_v1  ;;  %v1539_v2 = vld [vmem:[%s1843_s3] sm:$0xff] (!%p423_p3)   ;;  %v1541_v4 = vld [vmem:[%s1843_s3 + $0x8] sm:$0xff] (!%p423_p3)   ;;  %vm709_vm2 = vcmask (!%p423_p3), 64512   ;;  %s1590_s18 = smov (!%p423_p3), 112   ;;  %vm771_vm3 = vcmask (!%p423_p3), 1043456  }
   0x8   : > { %1435 = vmatpush3.bf16.msra.mxu1 (!%p423_p3), %v1538_v0  ;;  %1438 = vmatprep.mubr.msk.bf16.mxu1 (!%p423_p3), %vm1589_vm0, %v1588_v1  ;;  %v1373_v7 = vld [vmem:[%s1846_s6] ss:$0 sm:$0xff] (!%p423_p3)  ;;  %s1591_s19 = smov (!%p423_p3), 120   ;;  %s1592_s21 = smov (!%p423_p3), 104   ;;  %v1543_v24 = vld [vmem:[%s1847_s7 + $0x8] sm:$0xff] (!%p423_p3)   ;;  %vm1161_vm4 = vcmask (!%p423_p3), 130048  }
   0x9   : > { %1427 = vmatpush3.bf16.msra.mxu0 (!%p423_p3), %v1539_v2  ;;  %1436 = vmatprep.subr.bf16.mxu1 (!%p423_p3), %v1588_v1  ;;  %v1369_v8 = vld [vmem:[%s1844_s4] ss:$0 sm:$0xff] (!%p423_p3)  ;;  %s1595_s24 = smov (!%p423_p3), 24   ;;  %vm1163_vm5 = vcmask (!%p423_p3), 195584   ;;  %vm1264_vm6 = vcmask (!%p423_p3), 257024  }
   0xa   : > { %1428 = vmatprep.subr.bf16.mxu0 (!%p423_p3), %v1588_v1  ;;  %1430 = vmatprep.mubr.msk.bf16.mxu0 (!%p423_p3), %vm1589_vm0, %v1588_v1  ;;  %v1542_v23 = vld [vmem:[%s1847_s7] sm:$0xff] (!%p423_p3)  }
   0xb   : > { %v1377_v41 = vld [vmem:[%s1848_s8] ss:$0 sm:$0xff] (!%p423_p3) }
   0xc   : > { %1437 = vmatpush3.bf16.msra.mxu1 (!%p423_p3), %v1540_v3 }
   0xd   : > { %1429 = vmatpush3.bf16.msra.mxu0 (!%p423_p3), %v1541_v4  ;;  %1450 = vmatprep.subr.bf16.mxu1 (!%p423_p3), %v1588_v1 }
   0xe   : > { %s1859_s25 = smov (!%p477_p4, %s1578_s25), 1  ;;  %1442 = vmatprep.subr.bf16.mxu0 %v1588_v1 }
   0xf   : > { %s1707_s20 = sshll.u32 %s1859_s25, 2  ;;  %s490_s15 = scalar_lea.vmem %s1842_s2, %s1859_s25 }
  0x10   : > { %s487_s23 = scalar_lea.vmem %s1841_s1, %s1707_s20  ;;  %s483_s30 = scalar_lea.vmem %s1840_s0, %s1707_s20  ;;  %v1381_v34 = vld [vmem:[%s490_s15] ss:$0 sm:$0xff] }
  0x11   : > { %v501_v5 = vld [vmem:[%s487_s23] sm:$0xf]  ;;  %s1594_s23 = smov 16  }
  0x12   : > { %1439 = vmatmul.mubr.msk.bf16.vlgmr.msra.gmra.mrb[0].mxu1 %vm525_vm1, %v501_v5  ;;  %v1720_v6 = vld [vmem:[%s483_s30] sm:$0xf] }
  0x13   : > { %1431 = vmatmul.mubr.msk.bf16.vlgmr.msra.gmra.mrb[0].mxu0 %vm525_vm1, %v1720_v6  ;;  %1452 = vmatprep.mubr.msk.bf16.mxu1 %vm1589_vm0, %v1588_v1 }
  0x14   : > { %1446 = vmatprep.mubr.msk.bf16.mxu0 %vm1589_vm0, %v1588_v1  ;;  %1443 = vmatpush3.bf16.msra.mxu0 %v1542_v23 }
  0x15   : > { %1444 = vmatprep.subr.bf16.mxu0 %v1588_v1 }
  0x18   : > { %1445 = vmatpush3.bf16.msra.mxu0 %v1543_v24 }
  0x19   : > { %1456 = vmatprep.subr.bf16.mxu0 %v1588_v1 }
  0x1b   : > { %1447 = vmatmul.mubr.msk.bf16.vlgmr.msra.gmra.mrb[4].mxu0 %vm525_vm1, %v501_v5 }
  0x1c   : > { %1458 = vmatprep.mubr.msk.bf16.mxu0 %vm1589_vm0, %v1588_v1 }
  0xe5   : > { %v631_v9 = vpop.f32.mrb[0].mxu1 }
  0xe6   : > { %v632_v10 = vadd.f32 %v1373_v7, %v631_v9  ;;  %v1440_v11 = vpop.f32.mrb[1].mxu1  ;;  %v563_v12 = vpop.f32.mrb[0].mxu0 }
  0xe7   : > { %v564_v13 = vadd.f32 %v1369_v8, %v563_v12  ;;  %v634_v14 = vpop.f32.mrb[2].mxu1  ;;  %v1432_v15 = vpop.f32.mrb[1].mxu0 }
  0xe8   : > { %v637_v16 = vpack.c.bf16 %v632_v10, %v632_v10  ;;  %v1441_v17 = vpop.f32.mrb[3].mxu1  ;;  %v566_v18 = vpop.f32.mrb[2].mxu0 }
  0xe9   : > { %v569_v19 = vmul.f32 0.35355338, %v564_v13  ;;  %v1433_v20 = vpop.f32.mrb[3].mxu0 }
  0xea   : > { %930 = vrot.lane.b32.xlu1 %v637_v16, %s1590_s18  ;;  %819 = vrot.lane.b32.xlu0 %v637_v16, %s1591_s19  ;;  %v714_v21 = vsel %vm709_vm2, %v637_v16, 0 }
  0xeb   : > { %v570_v22 = vpack.c.bf16 %v569_v19, %v569_v19  ;;  %1451 = vmatpush3.bf16.xpose.msra.mxu1 %v714_v21 }
  0xec   : > { %1462 = vmatprep.subr.bf16.mxu1 %v1588_v1 }
  0xee   : > { %928 = vrot.lane.b32.xlu1 %v570_v22, %s1590_s18  ;;  %816 = vrot.lane.b32.xlu0 %v570_v22, %s1591_s19  ;;  %v695_v42 = vpop.f32.mrb[4].mxu0 }
  0xef   : > { %v696_v43 = vadd.f32 %v1377_v41, %v695_v42  ;;  %v1448_v44 = vpop.f32.mrb[5].mxu0 }
  0xf0   : > { %v698_v45 = vpop.f32.mrb[6].mxu0 }
  0xf1   : > { %v701_v46 = vpack.c.bf16 %v696_v43, %v696_v43  ;;  %v1449_v47 = vpop.f32.mrb[7].mxu0 }
  0xf2   : > { %1038 = vrot.lane.b32.xlu1 %v570_v22, %s1592_s21  ;;  %1040 = vrot.lane.b32.xlu0 %v637_v16, %s1592_s21 }
  0xf3   : > { %1453 = vmatmul.mubr.msk.bf16.vlgmr.msra.gmra.mrb[4].mxu1 %vm709_vm2, %v570_v22  ;;  %v773_v48 = vsel %vm771_vm3, %v701_v46, 0 }
  0xf4   : > { %1464 = vmatprep.mubr.msk.bf16.mxu1 %vm1589_vm0, %v1588_v1  ;;  %1457 = vmatpush3.bf16.msra.mxu0 %v773_v48 }
  0xf5   : > { %1468 = vmatprep.subr.bf16.mxu0 %v1588_v1 }
 0x15c   : > { %v820_v25 = vpop.permute.xlu0 %819  ;;  %v931_v27 = vpop.permute.xlu1 %930 }
 0x15d   : > { %v825_v26 = vsel %vm709_vm2, %v820_v25, 0  ;;  %v936_v29 = vsel %vm709_vm2, %v931_v27, 0 }
 0x15e   : > { %1463 = vmatpush3.bf16.xpose.msra.mxu1 %v825_v26 }
 0x15f   : > { %1474 = vmatprep.subr.bf16.mxu1 %v1588_v1 }
 0x160   : > { %v817_v28 = vpop.permute.xlu0 %816  ;;  %v929_v31 = vpop.permute.xlu1 %928 }
 0x164   : > { %v1041_v30 = vpop.permute.xlu0 %1040  ;;  %v1039_v33 = vpop.permute.xlu1 %1038 }
 0x165   : > { %1465 = vmatmul.mubr.msk.bf16.vlgmr.msra.gmra.mrb[8].mxu1 %vm709_vm2, %v817_v28  ;;  %v1046_v32 = vsel %vm709_vm2, %v1041_v30, 0 }
 0x166   : > { %1475 = vmatpush3.bf16.xpose.msra.mxu1 %v936_v29  ;;  %1476 = vmatprep.mubr.msk.bf16.mxu1 %vm1589_vm0, %v1588_v1 }
 0x167   : > { %1486 = vmatprep.subr.bf16.mxu1 %v1588_v1 }
 0x16d   : > { %1477 = vmatmul.mubr.msk.bf16.vlgmr.msra.gmra.mrb[12].mxu1 %vm709_vm2, %v929_v31 }
 0x16e   : > { %1487 = vmatpush3.bf16.xpose.msra.mxu1 %v1046_v32  ;;  %1488 = vmatprep.mubr.msk.bf16.mxu1 %vm1589_vm0, %v1588_v1 }
 0x16f   : > { %1498 = vmatprep.subr.bf16.mxu1 %v1588_v1 }
 0x175   : > { %1489 = vmatmul.mubr.msk.bf16.vlgmr.msra.gmra.mrb[16].mxu1 %vm709_vm2, %v1039_v33 }
 0x176   : > { %1502 = vmatprep.mubr.msk.bf16.mxu1 %vm1589_vm0, %v1588_v1 }
 0x1c6   : > { %v750_v35 = vpop.f32.mrb[4].mxu1 }
 0x1c7   : > { %v751_v36 = vadd.f32 %v1381_v34, %v750_v35  ;;  %v1454_v37 = vpop.f32.mrb[5].mxu1 }
 0x1c8   : > { %v753_v38 = vpop.f32.mrb[6].mxu1 }
 0x1c9   : > { %v1455_v39 = vpop.f32.mrb[7].mxu1  ;;  %v756_v40 = vsel %vm709_vm2, %v751_v36, -inf }
 0x1ca   : > { %757 = vmax.xlane.f32.xlu0 %v756_v40 }
 0x238   : > { %v861_v49 = vpop.f32.mrb[8].mxu1 }
 0x239   : > { %v862_v50 = vadd.f32 %v1381_v34, %v861_v49  ;;  %v1466_v51 = vpop.f32.mrb[9].mxu1 }
 0x23a   : > { %v864_v52 = vpop.f32.mrb[10].mxu1  ;;  %v1544_v51 = vld [vmem:[%s1849_s9] sm:$0xff]  }
 0x23b   : > { %v1467_v53 = vpop.f32.mrb[11].mxu1  ;;  %v867_v54 = vsel %vm709_vm2, %v862_v50, -inf  ;;  %1499 = vmatpush3.bf16.msra.mxu1 %v1544_v51 }
 0x23c   : > { %868 = vmax.xlane.f32.xlu1 %v867_v54  ;;  %1500 = vmatprep.subr.bf16.mxu1 %v1588_v1 }
 0x240   : > { %v972_v55 = vpop.f32.mrb[12].mxu1 }
 0x241   : > { %v973_v56 = vadd.f32 %v1381_v34, %v972_v55  ;;  %v1478_v57 = vpop.f32.mrb[13].mxu1 }
 0x242   : > { %v975_v58 = vpop.f32.mrb[14].mxu1 }
 0x243   : > { %v1479_v59 = vpop.f32.mrb[15].mxu1  ;;  %v978_v60 = vsel %vm709_vm2, %v973_v56, -inf }
 0x244   : > { %979 = vmax.xlane.f32.xlu0 %v978_v60 }
 0x248   : > { %v1082_v61 = vpop.f32.mrb[16].mxu1 }
 0x249   : > { %v1083_v62 = vadd.f32 %v1381_v34, %v1082_v61  ;;  %v1490_v63 = vpop.f32.mrb[17].mxu1 }
 0x24a   : > { %v1085_v0 = vpop.f32.mrb[18].mxu1 }
 0x24b   : > { %v1491_v2 = vpop.f32.mrb[19].mxu1  ;;  %v1088_v3 = vsel %vm709_vm2, %v1083_v62, -inf }
 0x24c   : > { %1089 = vmax.xlane.f32.xlu0 %v1088_v3 }
 0x257   : > { %v758_v4 = vpop.xlane.xlu0 %757 }
 0x258   : > { %v759_v5 = vsub.f32 %v751_v36, %v758_v4 }
 0x25a   : > { %v760_v7 = vmul.f32 1.442695, %v759_v5 }
 0x25c   : > { %1546 = vpow2.f32 %v760_v7 }
 0x266   : > { %v1547_v8 = vpop.eup %1546 }
 0x267   : > { %v762_v9 = vsel %vm709_vm2, %v1547_v8, 0.0 }
 0x268   : > { %763 = vadd.xlane.f32.xlu1 %v762_v9  ;;  %v1390_v9 = vld [vmem:[%s1850_s10] ss:$0 sm:$0xff] }
 0x279   : > { %880 = vrot.lane.b32.xlu1 %v701_v46, %s1591_s19  ;;  %s1593_s19 = smov 8  }
 0x2c9   : > { %v869_v10 = vpop.xlane.xlu1 %868 }
 0x2ca   : > { %v870_v11 = vsub.f32 %v862_v50, %v869_v10  ;;  %v500_v10 = vunpack.c.l.bf16 %v1720_v6 }
 0x2cc   : > { %v871_v12 = vmul.f32 1.442695, %v870_v11 }
 0x2ce   : > { %1548 = vpow2.f32 %v871_v12 }
 0x2d1   : > { %v980_v13 = vpop.xlane.xlu0 %979 }
 0x2d2   : > { %v981_v14 = vsub.f32 %v973_v56, %v980_v13  ;;  %v1545_v56 = vld [vmem:[%s1849_s9 + $0x8] sm:$0xff]  }
 0x2d3   : > { %1501 = vmatpush3.bf16.msra.mxu1 %v1545_v56 }
 0x2d4   : > { %v982_v15 = vmul.f32 1.442695, %v981_v14 }
 0x2d6   : > { %1550 = vpow2.f32 %v982_v15 }
 0x2d8   : > { %v1549_v16 = vpop.eup %1548 }
 0x2d9   : > { %v1090_v17 = vpop.xlane.xlu0 %1089  ;;  %v873_v18 = vsel %vm709_vm2, %v1549_v16, 0.0 }
 0x2da   : > { %v1091_v19 = vsub.f32 %v1083_v62, %v1090_v17  ;;  %874 = vadd.xlane.f32.xlu0 %v873_v18 }
 0x2dc   : > { %v1092_v20 = vmul.f32 1.442695, %v1091_v19 }
 0x2de   : > { %1552 = vpow2.f32 %v1092_v20 }
 0x2e0   : > { %v1551_v21 = vpop.eup %1550 }
 0x2e1   : > { %v984_v22 = vsel %vm709_vm2, %v1551_v21, 0.0 }
 0x2e2   : > { %985 = vadd.xlane.f32.xlu1 %v984_v22 }
 0x2e8   : > { %v1553_v23 = vpop.eup %1552 }
 0x2e9   : > { %v1094_v24 = vsel %vm709_vm2, %v1553_v23, 0.0 }
 0x2ea   : > { %1095 = vadd.xlane.f32.xlu0 %v1094_v24 }
 0x2f3   : > { %1100 = vrot.lane.b32.xlu1 %v701_v46, %s1592_s21 }
 0x2f5   : > { %v764_v25 = vpop.xlane.xlu1 %763 }
 0x2f6   : > { %1554 = vrcp.f32 %v764_v25 }
 0x2f9   : > { %v881_v27 = vpop.permute.xlu1 %880 }
 0x2fa   : > { %v886_v30 = vsel %vm771_vm3, %v881_v27, 0 }
 0x300   : > { %v1555_v26 = vpop.eup %1554  ;;  %990 = vrot.lane.b32.xlu0 %v701_v46, %s1590_s18 }
 0x301   : > { %v766_v28 = vmul.f32 %v1555_v26, %v1547_v8  ;;  %v1394_v26 = vld [vmem:[%s1851_s11] ss:$0 sm:$0xff] }
 0x303   : > { %v767_v29 = vpack.c.bf16 %v766_v28, %v766_v28  ;;  %v1395_v28 = vld [vmem:[%s1852_s12] ss:$0 sm:$0xff] }
 0x305   : > { %1459 = vmatmul.mubr.msk.bf16.vlgmr.msra.gmra.mrb[8].mxu0 %vm709_vm2, %v767_v29 }
 0x306   : > { %1469 = vmatpush3.bf16.msra.mxu0 %v886_v30  ;;  %1470 = vmatprep.mubr.msk.bf16.mxu0 %vm1589_vm0, %v1588_v1 }
 0x307   : > { %1480 = vmatprep.subr.bf16.mxu0 %v1588_v1 }
 0x367   : > { %v875_v31 = vpop.xlane.xlu0 %874 }
 0x368   : > { %1556 = vrcp.f32 %v875_v31 }
 0x36f   : > { %v986_v32 = vpop.xlane.xlu1 %985 }
 0x370   : > { %1558 = vrcp.f32 %v986_v32 }
 0x372   : > { %v1557_v33 = vpop.eup %1556 }
 0x373   : > { %v877_v34 = vmul.f32 %v1557_v33, %v1549_v16  ;;  %v1101_v41 = vpop.permute.xlu1 %1100 }
 0x374   : > { %v1106_v43 = vsel %vm771_vm3, %v1101_v41, 0 }
 0x375   : > { %v878_v35 = vpack.c.bf16 %v877_v34, %v877_v34 }
 0x377   : > { %v1096_v36 = vpop.xlane.xlu0 %1095  ;;  %1471 = vmatmul.mubr.msk.bf16.vlgmr.msra.gmra.mrb[12].mxu0 %vm709_vm2, %v878_v35 }
 0x378   : > { %1560 = vrcp.f32 %v1096_v36  ;;  %1482 = vmatprep.mubr.msk.bf16.mxu0 %vm1589_vm0, %v1588_v1 }
 0x37a   : > { %v1559_v37 = vpop.eup %1558 }
 0x37b   : > { %v988_v38 = vmul.f32 %v1559_v37, %v1551_v21  ;;  %v991_v39 = vpop.permute.xlu0 %990 }
 0x37c   : > { %v996_v40 = vsel %vm771_vm3, %v991_v39, 0 }
 0x37d   : > { %1481 = vmatpush3.bf16.msra.mxu0 %v996_v40  ;;  %v989_v42 = vpack.c.bf16 %v988_v38, %v988_v38 }
 0x37e   : > { %1492 = vmatprep.subr.bf16.mxu0 %v1588_v1 }
 0x380   : > { %1483 = vmatmul.mubr.msk.bf16.vlgmr.msra.gmra.mrb[16].mxu0 %vm709_vm2, %v989_v42 }
 0x381   : > { %1493 = vmatpush3.bf16.msra.mxu0 %v1106_v43  ;;  %1494 = vmatprep.mubr.msk.bf16.mxu0 %vm1589_vm0, %v1588_v1 }
 0x382   : > { %v1561_v44 = vpop.eup %1560 }
 0x383   : > { %v1098_v45 = vmul.f32 %v1561_v44, %v1553_v23 }
 0x385   : > { %v1099_v46 = vpack.c.bf16 %v1098_v45, %v1098_v45 }
 0x388   : > { %1495 = vmatmul.mubr.msk.bf16.vlgmr.msra.gmra.mrb[20].mxu0 %vm709_vm2, %v1099_v46 }
 0x3d8   : > { %v809_v47 = vpop.f32.mrb[8].mxu0 }
 0x3d9   : > { %v1460_v48 = vpop.f32.mrb[9].mxu0 }
 0x3da   : > { %v812_v49 = vpop.f32.mrb[10].mxu0 }
 0x3db   : > { %v1461_v50 = vpop.f32.mrb[11].mxu0 }
 0x44a   : > { %v922_v52 = vpop.f32.mrb[12].mxu0 }
 0x44b   : > { %1149 = vrot.lane.b32.xlu1 %v922_v52, %s1593_s19  ;;  %v1472_v53 = vpop.f32.mrb[13].mxu0  ;;  %s497_s19 = scalar_lea.vmem %s1853_s13, %s1707_s20 }
 0x44c   : > { %v925_v54 = vpop.f32.mrb[14].mxu0 }
 0x44d   : > { %v1473_v55 = vpop.f32.mrb[15].mxu0 }
 0x453   : > { %v1032_v57 = vpop.f32.mrb[16].mxu0 }
 0x454   : > { %1153 = vrot.lane.b32.xlu0 %v1032_v57, %s1594_s23  ;;  %v1484_v58 = vpop.f32.mrb[17].mxu0 }
 0x455   : > { %v1035_v59 = vpop.f32.mrb[18].mxu0 }
 0x456   : > { %v1485_v60 = vpop.f32.mrb[19].mxu0 }
 0x45b   : > { %v1142_v61 = vpop.f32.mrb[20].mxu0 }
 0x45c   : > { %1157 = vrot.lane.b32.xlu1 %v1142_v61, %s1595_s24  ;;  %v1496_v1 = vpop.f32.mrb[21].mxu0 }
 0x45d   : > { %v1145_v62 = vpop.f32.mrb[22].mxu0 }
 0x45e   : > { %v1497_v63 = vpop.f32.mrb[23].mxu0 }
 0x4bd   : > { %v1150_v0 = vpop.permute.xlu1 %1149 }
 0x4be   : > { %v1160_v3 = vsel %vm709_vm2, %v809_v47, %v1150_v0 }
 0x4c6   : > { %v1154_v2 = vpop.permute.xlu0 %1153 }
 0x4c7   : > { %v1162_v4 = vsel %vm1161_vm4, %v1160_v3, %v1154_v2 }
 0x4ce   : > { %v1158_v5 = vpop.permute.xlu1 %1157 }
 0x4cf   : > { %v1164_v7 = vsel %vm1163_vm5, %v1162_v4, %v1158_v5 }
 0x4d0   : > { %v1165_v8 = vpack.c.bf16 %v1164_v7, %v1164_v7 }
 0x4d2   : > { %1503 = vmatmul.mubr.msk.bf16.vlgmr.msra.gmra.mrb[20].mxu1 %vm525_vm1, %v1165_v8 }
 0x5a5   : > { %v1226_v11 = vpop.f32.mrb[20].mxu1 }
 0x5a6   : > { %v1227_v12 = vadd.f32 %v1390_v9, %v1226_v11  ;;  %v1504_v13 = vpop.f32.mrb[21].mxu1 }
 0x5a7   : > { %v1229_v14 = vpop.f32.mrb[22].mxu1 }
 0x5a8   : > { %v1505_v15 = vpop.f32.mrb[23].mxu1  ;;  %v1232_v16 = vadd.f32 %v1227_v12, %v500_v10 }
 0x5aa   : > { %v1235_v17 = vsel %vm525_vm1, %v1232_v16, 0.0 }
 0x5ab   : > { %1236 = vadd.xlane.f32.xlu0 %v1235_v17 }
 0x638   : > { %v1237_v18 = vpop.xlane.xlu0 %1236 }
 0x639   : > { %v1239_v19 = vmul.f32 0.03125, %v1237_v18 }
 0x63b   : > { %v1240_v20 = vsub.f32 %v1232_v16, %v1239_v19 }
 0x63d   : > { %v1241_v21 = vmul.f32 %v1240_v20, %v1240_v20 }
 0x63f   : > { %v1242_v22 = vsel %vm525_vm1, %v1241_v21, 0.0 }
 0x640   : > { %1243 = vadd.xlane.f32.xlu1 %v1242_v22 }
 0x6cd   : > { %v1244_v23 = vpop.xlane.xlu1 %1243 }
 0x6ce   : > { %v1245_v24 = vmul.f32 0.03125, %v1244_v23 }
 0x6d0   : > { %v1246_v6 = vadd.f32 1e-05, %v1245_v24 }
 0x6d2   : > { %1562 = vrsqrt.f32 %v1246_v6 }
 0x6dc   : > { %v1563_v25 = vpop.eup %1562 }
 0x6dd   : > { %v1248_v27 = vmul.f32 %v1563_v25, %v1240_v20 }
 0x6df   : > { %v1255_v29 = vmul.f32 %v1394_v26, %v1248_v27 }
 0x6e1   : > { %v1262_v30 = vadd.f32 %v1395_v28, %v1255_v29 }
 0x6e3   : > { %v1263_v31 = vpack.c.bf16 %v1262_v30, %v1262_v30 }
 0x6e5   : > { %1265 = vst.msk [vmem:[%s497_s19] sm:$0xf] %vm1264_vm6, %v1263_v31 }
 0x6e6 PF: > { %s23_s27 = sadd.s32 1, %s1586_s27   ;;  %s1854_s25 = smov %s1582_s26 }
 0x6e7   : > { %p20_p5 = scmp.ge.s32.totalorder %s23_s27, 4   ;;  %s1855_s26 = smov %s1857_s28 }
 0x6e9   :  { %22 = sbr.rel (!%p20_p5) target bundleno = 2 (0x2), region = 108 }

// kernel: transformer_forward.20
= control target key start
LH: loop header
LB: loop body
LE: loop exit
PB: predicated region body
PF: predicated region fallthrough
CT: control target
= control target key end

     0   :  { %v313_v0 = vmov 0.0   ;;  %vm314_vm0 = vmmov 0   ;;  %vm59_vm1 = vcmask 261120   ;;  %vm146_vm2 = vcmask 523264   ;;  %s400_s1 = inlined_call_operand.vmem [shape: bf16[32,64], index: 1, kind: input, shape index: {}]   ;;  %s401_s0 = inlined_call_operand.vmem [shape: bf16[14,32], index: 0, kind: input, shape index: {}]   ;;  %s402_s3 = inlined_call_operand.vmem [shape: bf16[64,32], index: 3, kind: input, shape index: {}]   ;;  %s403_s2 = inlined_call_operand.vmem [shape: f32[1,64], index: 2, kind: input, shape index: {}]   ;;  %s404_s4 = inlined_call_operand.vmem [shape: f32[1,32], index: 4, kind: input, shape index: {}]   ;;  %s405_s5 = inlined_call_operand.vmem [shape: f32[1,32], index: 5, kind: input, shape index: {}]   ;;  %s406_s6 = inlined_call_operand.vmem [shape: f32[1,32], index: 6, kind: input, shape index: {}]   ;;  %s407_s7 = inlined_call_operand.vmem [shape: bf16[14,32], index: 7, kind: output, shape index: {}]  }
   0x1   :  { %280 = vmatprep.subr.bf16.mxu0 %v313_v0  ;;  %v302_v1 = vld [vmem:[%s400_s1] sm:$0xff]   ;;  %284 = vmatprep.mubr.msk.bf16.mxu0 %vm314_vm0, %v313_v0  ;;  %v303_v2 = vld [vmem:[%s400_s1 + $0x8] sm:$0xff]   ;;  %v307_v8 = vld [vmem:[%s402_s3 + $0x10] sm:$0xff]   ;;  %vm198_vm3 = vcmask 259072   ;;  %vm247_vm4 = vcmask 257024   ;;  %vm249_vm5 = vcmask 256000  }
   0x2   :  { %288 = vmatprep.subr.bf16.mxu1 %v313_v0  ;;  %296 = vmatprep.mubr.msk.bf16.mxu1 %vm314_vm0, %v313_v0  ;;  %v27_v3 = vld [vmem:[%s401_s0] sm:$0xf]  ;;  %v28_v4 = vld [vmem:[%s401_s0 + $0x4] sm:$0x7]  ;;  %v306_v6 = vld [vmem:[%s402_s3 + $0x8] sm:$0xff]  }
   0x3   :  { %281 = vmatpush3.bf16.msra.mxu0 %v302_v1  ;;  %v305_v5 = vld [vmem:[%s402_s3] sm:$0xff]   ;;  %v256_v7 = vcombine.low %v27_v3, %v28_v4  ;;  %v308_v9 = vld [vmem:[%s402_s3 + $0x18] sm:$0xff]   ;;  %v29_v21 = vunpack.c.l.bf16 %v27_v3  ;;  %v30_v25 = vunpack.c.l.bf16 %v28_v4 }
   0x4   :  { %282 = vmatprep.subr.bf16.mxu0 %v313_v0  ;;  %289 = vmatpush3.bf16.msra.mxu1 %v305_v5  ;;  %v255_v10 = vld [vmem:[%s403_s2] ss:$0 sm:$0xff] }
   0x5   :  { %290 = vmatprep.subr.bf16.mxu1 %v313_v0  ;;  %v260_v20 = vld [vmem:[%s404_s4] ss:$0 sm:$0xff] }
   0x6   :  { %v266_v50 = vld [vmem:[%s405_s5] ss:$0 sm:$0xff] }
   0x7   :  { %283 = vmatpush3.bf16.msra.mxu0 %v303_v2  ;;  %v267_v52 = vld [vmem:[%s406_s6] ss:$0 sm:$0xff] }
   0x8   :  { %291 = vmatpush3.bf16.msra.mxu1 %v306_v6 }
   0x9   :  { %292 = vmatprep.subr.bf16.mxu1 %v313_v0 }
   0xa   :  { %285 = vmatmul.mubr.msk.bf16.vlgmr.msra.gmra.mrb[0].mxu0 %vm59_vm1, %v256_v7 }
   0xc   :  { %293 = vmatpush3.bf16.msra.mxu1 %v307_v8 }
   0xd   :  { %294 = vmatprep.subr.bf16.mxu1 %v313_v0 }
  0x10   :  { %295 = vmatpush3.bf16.msra.mxu1 %v308_v9 }
  0xdd   :  { %v97_v11 = vpop.f32.mrb[0].mxu0 }
  0xde   :  { %v98_v12 = vadd.f32 %v255_v10, %v97_v11  ;;  %v286_v13 = vpop.f32.mrb[1].mxu0 }
  0xdf   :  { %v100_v14 = vpop.f32.mrb[2].mxu0 }
  0xe0   :  { %v101_v15 = vadd.f32 %v255_v10, %v100_v14  ;;  %v287_v16 = vpop.f32.mrb[3].mxu0  ;;  %v104_v17 = vmax.f32 %v98_v12, 0.0 }
  0xe2   :  { %v105_v18 = vmax.f32 %v101_v15, 0.0 }
  0xe4   :  { %v106_v19 = vpack.c.bf16 %v105_v18, %v104_v17 }
  0xe6   :  { %297 = vmatmul.mubr.msk.bf16.vlgmr.msra.gmra.mrb[0].mxu1 %vm146_vm2, %v106_v19 }
 0x1b9   :  { %v184_v22 = vpop.f32.mrb[0].mxu1 }
 0x1ba   :  { %v185_v23 = vadd.f32 %v260_v20, %v184_v22  ;;  %v298_v24 = vpop.f32.mrb[1].mxu1 }
 0x1bb   :  { %v187_v26 = vpop.f32.mrb[2].mxu1 }
 0x1bc   :  { %v188_v27 = vadd.f32 %v260_v20, %v187_v26  ;;  %v299_v28 = vpop.f32.mrb[3].mxu1  ;;  %v191_v29 = vadd.f32 %v185_v23, %v29_v21 }
 0x1be   :  { %v195_v30 = vsel %vm59_vm1, %v191_v29, 0.0  ;;  %v192_v31 = vadd.f32 %v188_v27, %v30_v25 }
 0x1bf   :  { %196 = vadd.xlane.f32.xlu0 %v195_v30 }
 0x1c0   :  { %v199_v32 = vsel %vm198_vm3, %v192_v31, 0.0 }
 0x1c3   :  { %200 = vadd.xlane.f32.xlu0 %v199_v32 }
 0x24c   :  { %v197_v33 = vpop.xlane.xlu0 %196 }
 0x24d   :  { %v203_v34 = vmul.f32 0.03125, %v197_v33 }
 0x24f   :  { %v205_v35 = vsub.f32 %v191_v29, %v203_v34 }
 0x250   :  { %v201_v36 = vpop.xlane.xlu0 %200 }
 0x251   :  { %v204_v37 = vmul.f32 0.03125, %v201_v36  ;;  %v207_v38 = vmul.f32 %v205_v35, %v205_v35 }
 0x253   :  { %v206_v39 = vsub.f32 %v192_v31, %v204_v37  ;;  %v209_v40 = vsel %vm59_vm1, %v207_v38, 0.0 }
 0x254   :  { %210 = vadd.xlane.f32.xlu1 %v209_v40 }
 0x255   :  { %v208_v41 = vmul.f32 %v206_v39, %v206_v39 }
 0x257   :  { %v212_v42 = vsel %vm198_vm3, %v208_v41, 0.0 }
 0x258   :  { %213 = vadd.xlane.f32.xlu1 %v212_v42 }
 0x2e1   :  { %v211_v43 = vpop.xlane.xlu1 %210 }
 0x2e2   :  { %v215_v44 = vmul.f32 0.03125, %v211_v43 }
 0x2e4   :  { %v217_v45 = vadd.f32 1e-05, %v215_v44 }
 0x2e5   :  { %v214_v46 = vpop.xlane.xlu1 %213 }
 0x2e6   :  { %309 = vrsqrt.f32 %v217_v45  ;;  %v216_v47 = vmul.f32 0.03125, %v214_v46 }
 0x2e8   :  { %v218_v48 = vadd.f32 1e-05, %v216_v47 }
 0x2ea   :  { %311 = vrsqrt.f32 %v218_v48 }
 0x2f0   :  { %v310_v49 = vpop.eup %309 }
 0x2f1   :  { %v221_v51 = vmul.f32 %v310_v49, %v205_v35 }
 0x2f3   :  { %v229_v53 = vmul.f32 %v266_v50, %v221_v51 }
 0x2f4   :  { %v312_v54 = vpop.eup %311 }
 0x2f5   :  { %v237_v55 = vadd.f32 %v267_v52, %v229_v53  ;;  %v222_v56 = vmul.f32 %v312_v54, %v206_v39 }
 0x2f7   :  { %v270_v57 = vpack.c.bf16 %v237_v55, %v237_v55  ;;  %v230_v58 = vmul.f32 %v266_v50, %v222_v56 }
 0x2f9   :  { %248 = vst.msk [vmem:[%s407_s7] sm:$0xf] %vm247_vm4, %v270_v57  ;;  %v238_v59 = vadd.f32 %v267_v52, %v230_v58 }
 0x2fb   :  { %v271_v60 = vpack.c.bf16 %v238_v59, %v238_v59 }
 0x2fd   :  { %250 = vst.msk [vmem:[%s407_s7 + $0x4] sm:$0x7] %vm249_vm5, %v271_v60 }

// kernel: transformer_forward.18
= control target key start
LH: loop header
LB: loop body
LE: loop exit
PB: predicated region body
PF: predicated region fallthrough
CT: control target
= control target key end

     0   :  { %s1690_s25 = smov 0   ;;  %s1692_s26 = smov 0   ;;  %s1864_s0 = inlined_call_operand.vmem [shape: bf16[2,7,32], index: 0, kind: input, shape index: {}, may-alias: {0,1}]   ;;  %s1865_s1 = inlined_call_operand.vmem [shape: bf16[2,7,32], index: 1, kind: input, shape index: {}, may-alias: {0,1}]   ;;  %s1866_s2 = inlined_call_operand.vmem [shape: f32[2,1,7], index: 2, kind: input, shape index: {}]   ;;  %s1867_s3 = inlined_call_operand.vmem [shape: bf16[32,32], index: 3, kind: input, shape index: {}]   ;;  %s1868_s4 = inlined_call_operand.vmem [shape: f32[1,32], index: 4, kind: input, shape index: {}]   ;;  %s1869_s5 = inlined_call_operand.vmem [shape: bf16[32,32], index: 5, kind: input, shape index: {}]   ;;  %s1870_s6 = inlined_call_operand.vmem [shape: f32[1,32], index: 6, kind: input, shape index: {}]   ;;  %s1871_s7 = inlined_call_operand.vmem [shape: bf16[32,32], index: 7, kind: input, shape index: {}]   ;;  %s1872_s8 = inlined_call_operand.vmem [shape: f32[1,32], index: 8, kind: input, shape index: {}]   ;;  %s1873_s9 = inlined_call_operand.vmem [shape: bf16[32,32], index: 9, kind: input, shape index: {}]   ;;  %s1874_s10 = inlined_call_operand.vmem [shape: f32[1,32], index: 10, kind: input, shape index: {}]   ;;  %s1875_s11 = inlined_call_operand.vmem [shape: f32[1,32], index: 11, kind: input, shape index: {}]   ;;  %s1876_s12 = inlined_call_operand.vmem [shape: f32[1,32], index: 12, kind: input, shape index: {}]   ;;  %s1877_s13 = inlined_call_operand.vmem [shape: bf16[2,7,32], index: 13, kind: output, shape index: {}]  }
   0x1   :  { %s1694_s27 = smov 0  }
   0x2 LB: > { %s35_s28 = sadd.s32 1, %s1604_s26  ;;  %p1385_p0 = scmp.ge.s32.totalorder %s1608_s27, 1  ;;  %s1608_s27 = sphi %s1694_s27, %s23_s27   ;;  %s1604_s26 = sphi %s1692_s26, %s1879_s26   ;;  %s1600_s25 = sphi %s1690_s25, %s1878_s25  }
   0x3   : > { %p37_p1 = scmp.ge.s32.totalorder %s35_s28, 2  ;;  %p422_p2 = scmp.lt.s32.totalorder %s1608_s27, 3 }
   0x5   : > { %s1881_s28 = smov (%p37_p1, %s35_s28), 0  ;;  %p423_p3 = pnand %p1385_p0, %p422_p2 }
   0x6   : > { %v1560_v0 = vld [vmem:[%s1869_s5] sm:$0xff] (!%p423_p3)   ;;  %v1610_v1 = vmov (!%p423_p3), 0.0   ;;  %v1562_v3 = vld [vmem:[%s1869_s5 + $0x8] sm:$0xff] (!%p423_p3)   ;;  %vm1611_vm0 = vmmov (!%p423_p3), 0   ;;  %p477_p4 = scmp.lt.s32.totalorder (!%p423_p3), %s1600_s25, 1  ;;  %vm525_vm1 = vcmask (!%p423_p3), 261120   ;;  %v704_v34 = vlaneseq (!%p423_p3) }
   0x7   : > { %426 = sbr.rel (%p423_p3) target bundleno = 1768 (0x6e8), region = 72  ;;  %1454 = vmatprep.subr.bf16.mxu1 (!%p423_p3), %v1610_v1  ;;  %1446 = vmatprep.subr.bf16.mxu0 (!%p423_p3), %v1610_v1  ;;  %v1561_v2 = vld [vmem:[%s1867_s3] sm:$0xff] (!%p423_p3)   ;;  %v1563_v4 = vld [vmem:[%s1867_s3 + $0x8] sm:$0xff] (!%p423_p3)   ;;  %vm719_vm2 = vcmask (!%p423_p3), 64512   ;;  %s1612_s18 = smov (!%p423_p3), 112   ;;  %vm766_vm4 = vcmask (!%p423_p3), 55296  }
   0x8   : > { %1455 = vmatpush3.bf16.msra.mxu1 (!%p423_p3), %v1560_v0  ;;  %1458 = vmatprep.mubr.msk.bf16.mxu1 (!%p423_p3), %vm1611_vm0, %v1610_v1  ;;  %v1393_v7 = vld [vmem:[%s1870_s6] ss:$0 sm:$0xff] (!%p423_p3)  ;;  %s1613_s19 = smov (!%p423_p3), 120   ;;  %s1614_s21 = smov (!%p423_p3), 104   ;;  %v1565_v24 = vld [vmem:[%s1871_s7 + $0x8] sm:$0xff] (!%p423_p3)   ;;  %v705_v35 = vshrl.u32 (!%p423_p3), %v704_v34, 7 }
   0x9   : > { %1447 = vmatpush3.bf16.msra.mxu0 (!%p423_p3), %v1561_v2  ;;  %1456 = vmatprep.subr.bf16.mxu1 (!%p423_p3), %v1610_v1  ;;  %v1389_v8 = vld [vmem:[%s1868_s4] ss:$0 sm:$0xff] (!%p423_p3)  ;;  %v709_v36 = vand.u32 (!%p423_p3), 127, %v704_v34  ;;  %v1615_v38 = vmov (!%p423_p3), -1e+09   ;;  %vm783_vm5 = vcmask (!%p423_p3), 1042432  }
   0xa   : > { %1448 = vmatprep.subr.bf16.mxu0 (!%p423_p3), %v1610_v1  ;;  %1450 = vmatprep.mubr.msk.bf16.mxu0 (!%p423_p3), %vm1611_vm0, %v1610_v1  ;;  %v1564_v23 = vld [vmem:[%s1871_s7] sm:$0xff] (!%p423_p3)   ;;  %vm784_vm6 = vcmask (!%p423_p3), 1043456   ;;  %v1616_v48 = vmov (!%p423_p3), 65535   ;;  %vm779_vm7 = vcmask (!%p423_p3), 56320   ;;  %s1619_s24 = smov (!%p423_p3), 24   ;;  %vm1176_vm8 = vcmask (!%p423_p3), 130048  }
   0xb   : > { %vm710_vm3 = vcmp.ge.s32.totalorder (!%p423_p3), %v705_v35, %v709_v36  ;;  %v1397_v47 = vld [vmem:[%s1872_s8] ss:$0 sm:$0xff] (!%p423_p3)  ;;  %v785_v49 = vsel (!%p423_p3), %vm783_vm5, 4294967295, %v1616_v48  ;;  %vm1178_vm9 = vcmask (!%p423_p3), 195584   ;;  %vm1250_vm10 = vcmask (!%p423_p3), 260096  }
   0xc   : > { %1457 = vmatpush3.bf16.msra.mxu1 (!%p423_p3), %v1562_v3  ;;  %v711_v39 = vsel (!%p423_p3), %vm710_vm3, 0.0, %v1615_v38  ;;  %v1803_v54 = vsel (!%p423_p3), %vm784_vm6, %v785_v49, 0  ;;  %vm1280_vm11 = vcmask (!%p423_p3), 257024   ;;  %vm1281_vm12 = vsmask.f32 (!%p423_p3), 3328 }
   0xd   : > { %1449 = vmatpush3.bf16.msra.mxu0 (!%p423_p3), %v1563_v4  ;;  %1470 = vmatprep.subr.bf16.mxu1 (!%p423_p3), %v1610_v1  ;;  %vm1282_vm13 = vmand (!%p423_p3), %vm1280_vm11, %vm1281_vm12 }
   0xe   : > { %s1883_s25 = smov (!%p477_p4, %s1600_s25), 1  ;;  %1462 = vmatprep.subr.bf16.mxu0 %v1610_v1 }
   0xf   : > { %s1731_s20 = sshll.u32 %s1883_s25, 2  ;;  %s490_s15 = scalar_lea.vmem %s1866_s2, %s1883_s25 }
  0x10   : > { %s487_s23 = scalar_lea.vmem %s1865_s1, %s1731_s20  ;;  %s483_s30 = scalar_lea.vmem %s1864_s0, %s1731_s20  ;;  %v1401_v37 = vld [vmem:[%s490_s15] ss:$0 sm:$0xff] }
  0x11   : > { %v501_v5 = vld [vmem:[%s487_s23] sm:$0xf]  ;;  %v718_v40 = vadd.f32 %v1401_v37, %v711_v39  ;;  %s1618_s23 = smov 16  }
  0x12   : > { %1459 = vmatmul.mubr.msk.bf16.vlgmr.msra.gmra.mrb[0].mxu1 %vm525_vm1, %v501_v5  ;;  %v1744_v6 = vld [vmem:[%s483_s30] sm:$0xf] }
  0x13   : > { %1451 = vmatmul.mubr.msk.bf16.vlgmr.msra.gmra.mrb[0].mxu0 %vm525_vm1, %v1744_v6  ;;  %1472 = vmatprep.mubr.msk.bf16.mxu1 %vm1611_vm0, %v1610_v1 }
  0x14   : > { %1466 = vmatprep.mubr.msk.bf16.mxu0 %vm1611_vm0, %v1610_v1  ;;  %1463 = vmatpush3.bf16.msra.mxu0 %v1564_v23 }
  0x15   : > { %1464 = vmatprep.subr.bf16.mxu0 %v1610_v1 }
  0x18   : > { %1465 = vmatpush3.bf16.msra.mxu0 %v1565_v24 }
  0x19   : > { %1476 = vmatprep.subr.bf16.mxu0 %v1610_v1 }
  0x1b   : > { %1467 = vmatmul.mubr.msk.bf16.vlgmr.msra.gmra.mrb[4].mxu0 %vm525_vm1, %v501_v5 }
  0x1c   : > { %1478 = vmatprep.mubr.msk.bf16.mxu0 %vm1611_vm0, %v1610_v1 }
  0xe5   : > { %v631_v9 = vpop.f32.mrb[0].mxu1 }
  0xe6   : > { %v632_v10 = vadd.f32 %v1393_v7, %v631_v9  ;;  %v1460_v11 = vpop.f32.mrb[1].mxu1  ;;  %v563_v12 = vpop.f32.mrb[0].mxu0 }
  0xe7   : > { %v564_v13 = vadd.f32 %v1389_v8, %v563_v12  ;;  %v634_v14 = vpop.f32.mrb[2].mxu1  ;;  %v1452_v15 = vpop.f32.mrb[1].mxu0 }
  0xe8   : > { %v637_v16 = vpack.c.bf16 %v632_v10, %v632_v10  ;;  %v1461_v17 = vpop.f32.mrb[3].mxu1  ;;  %v566_v18 = vpop.f32.mrb[2].mxu0 }
  0xe9   : > { %v569_v19 = vmul.f32 0.35355338, %v564_v13  ;;  %v1453_v20 = vpop.f32.mrb[3].mxu0 }
  0xea   : > { %945 = vrot.lane.b32.xlu1 %v637_v16, %s1612_s18  ;;  %834 = vrot.lane.b32.xlu0 %v637_v16, %s1613_s19  ;;  %v724_v21 = vsel %vm719_vm2, %v637_v16, 0 }
  0xeb   : > { %v570_v22 = vpack.c.bf16 %v569_v19, %v569_v19  ;;  %1471 = vmatpush3.bf16.xpose.msra.mxu1 %v724_v21 }
  0xec   : > { %1482 = vmatprep.subr.bf16.mxu1 %v1610_v1 }
  0xee   : > { %943 = vrot.lane.b32.xlu1 %v570_v22, %s1612_s18  ;;  %831 = vrot.lane.b32.xlu0 %v570_v22, %s1613_s19  ;;  %v695_v50 = vpop.f32.mrb[4].mxu0 }
  0xef   : > { %v696_v51 = vadd.f32 %v1397_v47, %v695_v50  ;;  %v1468_v52 = vpop.f32.mrb[5].mxu0 }
  0xf0   : > { %v698_v53 = vpop.f32.mrb[6].mxu0 }
  0xf1   : > { %v701_v55 = vpack.c.bf16 %v696_v51, %v696_v51  ;;  %v1469_v56 = vpop.f32.mrb[7].mxu0 }
  0xf2   : > { %1053 = vrot.lane.b32.xlu1 %v570_v22, %s1614_s21  ;;  %1055 = vrot.lane.b32.xlu0 %v637_v16, %s1614_s21 }
  0xf3   : > { %1473 = vmatmul.mubr.msk.bf16.vlgmr.msra.gmra.mrb[4].mxu1 %vm719_vm2, %v570_v22  ;;  %v788_v57 = vand.u32 %v1803_v54, %v701_v55 }
  0xf4   : > { %1484 = vmatprep.mubr.msk.bf16.mxu1 %vm1611_vm0, %v1610_v1 }
  0xf5   : > { %1477 = vmatpush3.bf16.msra.mxu0 %v788_v57 }
  0xf6   : > { %1488 = vmatprep.subr.bf16.mxu0 %v1610_v1 }
 0x15c   : > { %v835_v25 = vpop.permute.xlu0 %834  ;;  %v946_v27 = vpop.permute.xlu1 %945 }
 0x15d   : > { %v840_v26 = vsel %vm719_vm2, %v835_v25, 0  ;;  %v951_v29 = vsel %vm719_vm2, %v946_v27, 0 }
 0x15e   : > { %1483 = vmatpush3.bf16.xpose.msra.mxu1 %v840_v26 }
 0x15f   : > { %1494 = vmatprep.subr.bf16.mxu1 %v1610_v1 }
 0x160   : > { %v832_v28 = vpop.permute.xlu0 %831  ;;  %v944_v31 = vpop.permute.xlu1 %943 }
 0x164   : > { %v1056_v30 = vpop.permute.xlu0 %1055  ;;  %v1054_v33 = vpop.permute.xlu1 %1053 }
 0x165   : > { %1485 = vmatmul.mubr.msk.bf16.vlgmr.msra.gmra.mrb[8].mxu1 %vm719_vm2, %v832_v28  ;;  %v1061_v32 = vsel %vm719_vm2, %v1056_v30, 0 }
 0x166   : > { %1495 = vmatpush3.bf16.xpose.msra.mxu1 %v951_v29  ;;  %1496 = vmatprep.mubr.msk.bf16.mxu1 %vm1611_vm0, %v1610_v1 }
 0x167   : > { %1506 = vmatprep.subr.bf16.mxu1 %v1610_v1 }
 0x16d   : > { %1497 = vmatmul.mubr.msk.bf16.vlgmr.msra.gmra.mrb[12].mxu1 %vm719_vm2, %v944_v31 }
 0x16e   : > { %1507 = vmatpush3.bf16.xpose.msra.mxu1 %v1061_v32  ;;  %1508 = vmatprep.mubr.msk.bf16.mxu1 %vm1611_vm0, %v1610_v1 }
 0x16f   : > { %1518 = vmatprep.subr.bf16.mxu1 %v1610_v1 }
 0x175   : > { %1509 = vmatmul.mubr.msk.bf16.vlgmr.msra.gmra.mrb[16].mxu1 %vm719_vm2, %v1054_v33 }
 0x176   : > { %1522 = vmatprep.mubr.msk.bf16.mxu1 %vm1611_vm0, %v1610_v1 }
 0x1c6   : > { %v760_v41 = vpop.f32.mrb[4].mxu1 }
 0x1c7   : > { %v761_v42 = vadd.f32 %v760_v41, %v718_v40  ;;  %v1474_v43 = vpop.f32.mrb[5].mxu1 }
 0x1c8   : > { %v763_v44 = vpop.f32.mrb[6].mxu1 }
 0x1c9   : > { %v1475_v45 = vpop.f32.mrb[7].mxu1  ;;  %v767_v46 = vsel %vm766_vm4, %v761_v42, -inf }
 0x1ca   : > { %768 = vmax.xlane.f32.xlu0 %v767_v46 }
 0x238   : > { %v876_v58 = vpop.f32.mrb[8].mxu1 }
 0x239   : > { %v877_v59 = vadd.f32 %v876_v58, %v718_v40  ;;  %v1486_v60 = vpop.f32.mrb[9].mxu1 }
 0x23a   : > { %v879_v61 = vpop.f32.mrb[10].mxu1 }
 0x23b   : > { %v1487_v62 = vpop.f32.mrb[11].mxu1  ;;  %v882_v63 = vsel %vm766_vm4, %v877_v59, -inf  ;;  %v1566_v61 = vld [vmem:[%s1873_s9] sm:$0xff]  }
 0x23c   : > { %883 = vmax.xlane.f32.xlu1 %v882_v63  ;;  %1519 = vmatpush3.bf16.msra.mxu1 %v1566_v61 }
 0x23d   : > { %1520 = vmatprep.subr.bf16.mxu1 %v1610_v1 }
 0x240   : > { %v987_v0 = vpop.f32.mrb[12].mxu1 }
 0x241   : > { %v988_v2 = vadd.f32 %v987_v0, %v718_v40  ;;  %v1498_v3 = vpop.f32.mrb[13].mxu1 }
 0x242   : > { %v990_v4 = vpop.f32.mrb[14].mxu1 }
 0x243   : > { %v1499_v5 = vpop.f32.mrb[15].mxu1  ;;  %v993_v7 = vsel %vm766_vm4, %v988_v2, -inf }
 0x244   : > { %994 = vmax.xlane.f32.xlu0 %v993_v7 }
 0x248   : > { %v1097_v8 = vpop.f32.mrb[16].mxu1 }
 0x249   : > { %v1098_v9 = vadd.f32 %v1097_v8, %v718_v40  ;;  %v1510_v10 = vpop.f32.mrb[17].mxu1 }
 0x24a   : > { %v1100_v11 = vpop.f32.mrb[18].mxu1 }
 0x24b   : > { %v1511_v12 = vpop.f32.mrb[19].mxu1  ;;  %v1103_v13 = vsel %vm766_vm4, %v1098_v9, -inf }
 0x24c   : > { %1104 = vmax.xlane.f32.xlu0 %v1103_v13 }
 0x257   : > { %v769_v14 = vpop.xlane.xlu0 %768 }
 0x258   : > { %v770_v15 = vsub.f32 %v761_v42, %v769_v14 }
 0x25a   : > { %v771_v16 = vmul.f32 1.442695, %v770_v15 }
 0x25c   : > { %1568 = vpow2.f32 %v771_v16 }
 0x266   : > { %v1569_v17 = vpop.eup %1568 }
 0x267   : > { %v773_v18 = vsel %vm766_vm4, %v1569_v17, 0.0 }
 0x268   : > { %774 = vadd.xlane.f32.xlu1 %v773_v18  ;;  %v1410_v18 = vld [vmem:[%s1874_s10] ss:$0 sm:$0xff] }
 0x279   : > { %895 = vrot.lane.b32.xlu1 %v701_v55, %s1613_s19  ;;  %s1617_s19 = smov 8  }
 0x2c9   : > { %v884_v19 = vpop.xlane.xlu1 %883 }
 0x2ca   : > { %v885_v20 = vsub.f32 %v877_v59, %v884_v19  ;;  %v500_v19 = vunpack.c.l.bf16 %v1744_v6 }
 0x2cc   : > { %v886_v21 = vmul.f32 1.442695, %v885_v20 }
 0x2ce   : > { %1570 = vpow2.f32 %v886_v21 }
 0x2d1   : > { %v995_v22 = vpop.xlane.xlu0 %994 }
 0x2d2   : > { %v996_v23 = vsub.f32 %v988_v2, %v995_v22  ;;  %v1567_v2 = vld [vmem:[%s1873_s9 + $0x8] sm:$0xff]  }
 0x2d3   : > { %1521 = vmatpush3.bf16.msra.mxu1 %v1567_v2 }
 0x2d4   : > { %v997_v24 = vmul.f32 1.442695, %v996_v23 }
 0x2d6   : > { %1572 = vpow2.f32 %v997_v24 }
 0x2d8   : > { %v1571_v25 = vpop.eup %1570 }
 0x2d9   : > { %v1105_v26 = vpop.xlane.xlu0 %1104  ;;  %v888_v27 = vsel %vm766_vm4, %v1571_v25, 0.0 }
 0x2da   : > { %v1106_v28 = vsub.f32 %v1098_v9, %v1105_v26  ;;  %889 = vadd.xlane.f32.xlu0 %v888_v27 }
 0x2dc   : > { %v1107_v29 = vmul.f32 1.442695, %v1106_v28 }
 0x2de   : > { %1574 = vpow2.f32 %v1107_v29 }
 0x2e0   : > { %v1573_v30 = vpop.eup %1572 }
 0x2e1   : > { %v999_v31 = vsel %vm766_vm4, %v1573_v30, 0.0 }
 0x2e2   : > { %1000 = vadd.xlane.f32.xlu1 %v999_v31 }
 0x2e8   : > { %v1575_v32 = vpop.eup %1574 }
 0x2e9   : > { %v1109_v33 = vsel %vm766_vm4, %v1575_v32, 0.0 }
 0x2ea   : > { %1110 = vadd.xlane.f32.xlu0 %v1109_v33 }
 0x2f3   : > { %1115 = vrot.lane.b32.xlu1 %v701_v55, %s1614_s21 }
 0x2f5   : > { %v775_v34 = vpop.xlane.xlu1 %774 }
 0x2f6   : > { %1576 = vrcp.f32 %v775_v34 }
 0x2f9   : > { %v896_v35 = vpop.permute.xlu1 %895 }
 0x2fa   : > { %v901_v38 = vand.u32 %v896_v35, %v1803_v54  ;;  %v1414_v35 = vld [vmem:[%s1875_s11] ss:$0 sm:$0xff] }
 0x300   : > { %v1577_v36 = vpop.eup %1576  ;;  %1005 = vrot.lane.b32.xlu0 %v701_v55, %s1612_s18 }
 0x301   : > { %v777_v37 = vmul.f32 %v1577_v36, %v1569_v17 }
 0x303   : > { %v778_v39 = vpack.c.bf16 %v777_v37, %v777_v37  ;;  %v1415_v37 = vld [vmem:[%s1876_s12] ss:$0 sm:$0xff] }
 0x305   : > { %1479 = vmatmul.mubr.msk.bf16.vlgmr.msra.gmra.mrb[8].mxu0 %vm779_vm7, %v778_v39 }
 0x306   : > { %1489 = vmatpush3.bf16.msra.mxu0 %v901_v38  ;;  %1490 = vmatprep.mubr.msk.bf16.mxu0 %vm1611_vm0, %v1610_v1 }
 0x307   : > { %1500 = vmatprep.subr.bf16.mxu0 %v1610_v1 }
 0x367   : > { %v890_v40 = vpop.xlane.xlu0 %889 }
 0x368   : > { %1578 = vrcp.f32 %v890_v40 }
 0x36f   : > { %v1001_v41 = vpop.xlane.xlu1 %1000 }
 0x370   : > { %1580 = vrcp.f32 %v1001_v41 }
 0x372   : > { %v1579_v42 = vpop.eup %1578 }
 0x373   : > { %v892_v43 = vmul.f32 %v1579_v42, %v1571_v25  ;;  %v1116_v50 = vpop.permute.xlu1 %1115 }
 0x374   : > { %v1121_v52 = vand.u32 %v1116_v50, %v1803_v54 }
 0x375   : > { %v893_v44 = vpack.c.bf16 %v892_v43, %v892_v43 }
 0x377   : > { %v1111_v45 = vpop.xlane.xlu0 %1110  ;;  %1491 = vmatmul.mubr.msk.bf16.vlgmr.msra.gmra.mrb[12].mxu0 %vm779_vm7, %v893_v44 }
 0x378   : > { %1582 = vrcp.f32 %v1111_v45  ;;  %1502 = vmatprep.mubr.msk.bf16.mxu0 %vm1611_vm0, %v1610_v1 }
 0x37a   : > { %v1581_v46 = vpop.eup %1580 }
 0x37b   : > { %v1003_v47 = vmul.f32 %v1581_v46, %v1573_v30  ;;  %v1006_v48 = vpop.permute.xlu0 %1005 }
 0x37c   : > { %v1011_v49 = vand.u32 %v1006_v48, %v1803_v54 }
 0x37d   : > { %v1004_v51 = vpack.c.bf16 %v1003_v47, %v1003_v47 }
 0x37e   : > { %1501 = vmatpush3.bf16.msra.mxu0 %v1011_v49 }
 0x37f   : > { %1512 = vmatprep.subr.bf16.mxu0 %v1610_v1 }
 0x381   : > { %1503 = vmatmul.mubr.msk.bf16.vlgmr.msra.gmra.mrb[16].mxu0 %vm779_vm7, %v1004_v51 }
 0x382   : > { %v1583_v53 = vpop.eup %1582  ;;  %1513 = vmatpush3.bf16.msra.mxu0 %v1121_v52  ;;  %1514 = vmatprep.mubr.msk.bf16.mxu0 %vm1611_vm0, %v1610_v1 }
 0x383   : > { %v1113_v55 = vmul.f32 %v1583_v53, %v1575_v32 }
 0x385   : > { %v1114_v56 = vpack.c.bf16 %v1113_v55, %v1113_v55 }
 0x389   : > { %1515 = vmatmul.mubr.msk.bf16.vlgmr.msra.gmra.mrb[20].mxu0 %vm779_vm7, %v1114_v56 }
 0x3d8   : > { %v824_v57 = vpop.f32.mrb[8].mxu0 }
 0x3d9   : > { %v1480_v58 = vpop.f32.mrb[9].mxu0 }
 0x3da   : > { %v827_v59 = vpop.f32.mrb[10].mxu0 }
 0x3db   : > { %v1481_v60 = vpop.f32.mrb[11].mxu0 }
 0x44a   : > { %v937_v54 = vpop.f32.mrb[12].mxu0 }
 0x44b   : > { %1164 = vrot.lane.b32.xlu1 %v937_v54, %s1617_s19  ;;  %v1492_v62 = vpop.f32.mrb[13].mxu0  ;;  %s497_s19 = scalar_lea.vmem %s1877_s13, %s1731_s20 }
 0x44c   : > { %v940_v63 = vpop.f32.mrb[14].mxu0  ;;  %v1283_v40 = vld [vmem:[%s497_s19] sm:$0xf] }
 0x44d   : > { %v1493_v0 = vpop.f32.mrb[15].mxu0 }
 0x454   : > { %v1047_v3 = vpop.f32.mrb[16].mxu0 }
 0x455   : > { %1168 = vrot.lane.b32.xlu0 %v1047_v3, %s1618_s23  ;;  %v1504_v4 = vpop.f32.mrb[17].mxu0 }
 0x456   : > { %v1050_v5 = vpop.f32.mrb[18].mxu0 }
 0x457   : > { %v1505_v7 = vpop.f32.mrb[19].mxu0 }
 0x45c   : > { %v1157_v8 = vpop.f32.mrb[20].mxu0 }
 0x45d   : > { %1172 = vrot.lane.b32.xlu1 %v1157_v8, %s1619_s24  ;;  %v1516_v9 = vpop.f32.mrb[21].mxu0 }
 0x45e   : > { %v1160_v10 = vpop.f32.mrb[22].mxu0 }
 0x45f   : > { %v1517_v11 = vpop.f32.mrb[23].mxu0 }
 0x4bd   : > { %v1165_v1 = vpop.permute.xlu1 %1164 }
 0x4be   : > { %v1175_v13 = vsel %vm719_vm2, %v824_v57, %v1165_v1 }
 0x4c7   : > { %v1169_v12 = vpop.permute.xlu0 %1168 }
 0x4c8   : > { %v1177_v14 = vsel %vm1176_vm8, %v1175_v13, %v1169_v12 }
 0x4cf   : > { %v1173_v15 = vpop.permute.xlu1 %1172 }
 0x4d0   : > { %v1179_v16 = vsel %vm1178_vm9, %v1177_v14, %v1173_v15 }
 0x4d1   : > { %v1180_v17 = vpack.c.bf16 %v1179_v16, %v1179_v16 }
 0x4d3   : > { %1523 = vmatmul.mubr.msk.bf16.vlgmr.msra.gmra.mrb[20].mxu1 %vm525_vm1, %v1180_v17 }
 0x5a6   : > { %v1241_v20 = vpop.f32.mrb[20].mxu1 }
 0x5a7   : > { %v1242_v21 = vadd.f32 %v1410_v18, %v1241_v20  ;;  %v1524_v22 = vpop.f32.mrb[21].mxu1 }
 0x5a8   : > { %v1244_v23 = vpop.f32.mrb[22].mxu1 }
 0x5a9   : > { %v1525_v24 = vpop.f32.mrb[23].mxu1  ;;  %v1247_v25 = vadd.f32 %v1242_v21, %v500_v19 }
 0x5ab   : > { %v1251_v26 = vsel %vm1250_vm10, %v1247_v25, 0.0 }
 0x5ac   : > { %1252 = vadd.xlane.f32.xlu0 %v1251_v26 }
 0x639   : > { %v1253_v27 = vpop.xlane.xlu0 %1252 }
 0x63a   : > { %v1255_v28 = vmul.f32 0.03125, %v1253_v27 }
 0x63c   : > { %v1256_v29 = vsub.f32 %v1247_v25, %v1255_v28 }
 0x63e   : > { %v1257_v30 = vmul.f32 %v1256_v29, %v1256_v29 }
 0x640   : > { %v1258_v31 = vsel %vm1250_vm10, %v1257_v30, 0.0 }
 0x641   : > { %1259 = vadd.xlane.f32.xlu1 %v1258_v31 }
 0x6ce   : > { %v1260_v32 = vpop.xlane.xlu1 %1259 }
 0x6cf   : > { %v1261_v33 = vmul.f32 0.03125, %v1260_v32 }
 0x6d1   : > { %v1262_v34 = vadd.f32 1e-05, %v1261_v33 }
 0x6d3   : > { %1584 = vrsqrt.f32 %v1262_v34 }
 0x6dd   : > { %v1585_v6 = vpop.eup %1584 }
 0x6de   : > { %v1264_v36 = vmul.f32 %v1585_v6, %v1256_v29 }
 0x6e0   : > { %v1271_v38 = vmul.f32 %v1414_v35, %v1264_v36 }
 0x6e2   : > { %v1278_v39 = vadd.f32 %v1415_v37, %v1271_v38 }
 0x6e4   : > { %v1279_v41 = vpack.c.bf16 %v1278_v39, %v1278_v39 }
 0x6e6   : > { %v1284_v42 = vsel %vm1282_vm13, %v1279_v41, %v1283_v40 }
 0x6e7   : > { %1285 = vst [vmem:[%s497_s19] sm:$0xf] %v1284_v42 }
 0x6e8 PF: > { %s23_s27 = sadd.s32 1, %s1608_s27   ;;  %s1878_s25 = smov %s1604_s26 }
 0x6e9   : > { %p20_p5 = scmp.ge.s32.totalorder %s23_s27, 4   ;;  %s1879_s26 = smov %s1881_s28 }
 0x6eb   :  { %22 = sbr.rel (!%p20_p5) target bundleno = 2 (0x2), region = 108 }

// kernel: transformer_forward.19
= control target key start
LH: loop header
LB: loop body
LE: loop exit
PB: predicated region body
PF: predicated region fallthrough
CT: control target
= control target key end

     0   :  { %s1672_s25 = smov 0   ;;  %s1674_s26 = smov 0   ;;  %s1844_s0 = inlined_call_operand.vmem [shape: bf16[2,7,32], index: 0, kind: input, shape index: {}]   ;;  %s1845_s1 = inlined_call_operand.vmem [shape: bf16[2,8,32], index: 1, kind: input, shape index: {}]   ;;  %s1846_s2 = inlined_call_operand.vmem [shape: f32[2,1,8], index: 2, kind: input, shape index: {}]   ;;  %s1847_s3 = inlined_call_operand.vmem [shape: bf16[32,32], index: 3, kind: input, shape index: {}]   ;;  %s1848_s4 = inlined_call_operand.vmem [shape: f32[1,32], index: 4, kind: input, shape index: {}]   ;;  %s1849_s5 = inlined_call_operand.vmem [shape: bf16[32,32], index: 5, kind: input, shape index: {}]   ;;  %s1850_s6 = inlined_call_operand.vmem [shape: f32[1,32], index: 6, kind: input, shape index: {}]   ;;  %s1851_s7 = inlined_call_operand.vmem [shape: bf16[32,32], index: 7, kind: input, shape index: {}]   ;;  %s1852_s8 = inlined_call_operand.vmem [shape: f32[1,32], index: 8, kind: input, shape index: {}]   ;;  %s1853_s9 = inlined_call_operand.vmem [shape: bf16[32,32], index: 9, kind: input, shape index: {}]   ;;  %s1854_s10 = inlined_call_operand.vmem [shape: f32[1,32], index: 10, kind: input, shape index: {}]   ;;  %s1855_s11 = inlined_call_operand.vmem [shape: f32[1,32], index: 11, kind: input, shape index: {}]   ;;  %s1856_s12 = inlined_call_operand.vmem [shape: f32[1,32], index: 12, kind: input, shape index: {}]   ;;  %s1857_s13 = inlined_call_operand.vmem [shape: bf16[2,7,32], index: 13, kind: output, shape index: {}]  }
   0x1   :  { %s1676_s27 = smov 0  }
   0x2 LB: > { %s35_s28 = sadd.s32 1, %s1588_s26  ;;  %p1371_p0 = scmp.ge.s32.totalorder %s1592_s27, 1  ;;  %s1592_s27 = sphi %s1676_s27, %s23_s27   ;;  %s1588_s26 = sphi %s1674_s26, %s1859_s26   ;;  %s1584_s25 = sphi %s1672_s25, %s1858_s25  }
   0x3   : > { %p37_p1 = scmp.ge.s32.totalorder %s35_s28, 2  ;;  %p422_p2 = scmp.lt.s32.totalorder %s1592_s27, 3 }
   0x5   : > { %s1861_s28 = smov (%p37_p1, %s35_s28), 0  ;;  %p423_p3 = pnand %p1371_p0, %p422_p2 }
   0x6   : > { %v1544_v0 = vld [vmem:[%s1849_s5] sm:$0xff] (!%p423_p3)   ;;  %v1594_v1 = vmov (!%p423_p3), 0.0   ;;  %v1546_v3 = vld [vmem:[%s1849_s5 + $0x8] sm:$0xff] (!%p423_p3)   ;;  %vm1595_vm0 = vmmov (!%p423_p3), 0   ;;  %p477_p4 = scmp.lt.s32.totalorder (!%p423_p3), %s1584_s25, 1  ;;  %vm525_vm1 = vcmask (!%p423_p3), 261120  }
   0x7   : > { %426 = sbr.rel (%p423_p3) target bundleno = 1767 (0x6e7), region = 72  ;;  %1440 = vmatprep.subr.bf16.mxu1 (!%p423_p3), %v1594_v1  ;;  %1432 = vmatprep.subr.bf16.mxu0 (!%p423_p3), %v1594_v1  ;;  %v1545_v2 = vld [vmem:[%s1847_s3] sm:$0xff] (!%p423_p3)   ;;  %v1547_v4 = vld [vmem:[%s1847_s3 + $0x8] sm:$0xff] (!%p423_p3)   ;;  %vm709_vm2 = vcmask (!%p423_p3), 64512   ;;  %s1596_s18 = smov (!%p423_p3), 112   ;;  %vm756_vm3 = vcmask (!%p423_p3), 63488  }
   0x8   : > { %1441 = vmatpush3.bf16.msra.mxu1 (!%p423_p3), %v1544_v0  ;;  %1444 = vmatprep.mubr.msk.bf16.mxu1 (!%p423_p3), %vm1595_vm0, %v1594_v1  ;;  %v1379_v7 = vld [vmem:[%s1850_s6] ss:$0 sm:$0xff] (!%p423_p3)  ;;  %s1597_s19 = smov (!%p423_p3), 120   ;;  %s1598_s21 = smov (!%p423_p3), 104   ;;  %v1549_v24 = vld [vmem:[%s1851_s7 + $0x8] sm:$0xff] (!%p423_p3)   ;;  %vm772_vm4 = vcmask (!%p423_p3), 1043456  }
   0x9   : > { %1433 = vmatpush3.bf16.msra.mxu0 (!%p423_p3), %v1545_v2  ;;  %1442 = vmatprep.subr.bf16.mxu1 (!%p423_p3), %v1594_v1  ;;  %v1375_v8 = vld [vmem:[%s1848_s4] ss:$0 sm:$0xff] (!%p423_p3)  ;;  %s1601_s24 = smov (!%p423_p3), 24   ;;  %vm1162_vm5 = vcmask (!%p423_p3), 130048   ;;  %vm1164_vm6 = vcmask (!%p423_p3), 195584   ;;  %vm1236_vm7 = vcmask (!%p423_p3), 260096  }
   0xa   : > { %1434 = vmatprep.subr.bf16.mxu0 (!%p423_p3), %v1594_v1  ;;  %1436 = vmatprep.mubr.msk.bf16.mxu0 (!%p423_p3), %vm1595_vm0, %v1594_v1  ;;  %v1548_v23 = vld [vmem:[%s1851_s7] sm:$0xff] (!%p423_p3)   ;;  %vm1266_vm8 = vcmask (!%p423_p3), 257024   ;;  %vm1267_vm9 = vsmask.f32 (!%p423_p3), 3328 }
   0xb   : > { %v1383_v41 = vld [vmem:[%s1852_s8] ss:$0 sm:$0xff] (!%p423_p3)  ;;  %vm1268_vm10 = vmand (!%p423_p3), %vm1266_vm8, %vm1267_vm9 }
   0xc   : > { %1443 = vmatpush3.bf16.msra.mxu1 (!%p423_p3), %v1546_v3 }
   0xd   : > { %1435 = vmatpush3.bf16.msra.mxu0 (!%p423_p3), %v1547_v4  ;;  %1456 = vmatprep.subr.bf16.mxu1 (!%p423_p3), %v1594_v1 }
   0xe   : > { %s1863_s25 = smov (!%p477_p4, %s1584_s25), 1  ;;  %1448 = vmatprep.subr.bf16.mxu0 %v1594_v1 }
   0xf   : > { %s1713_s20 = sshll.u32 %s1863_s25, 2  ;;  %s490_s15 = scalar_lea.vmem %s1846_s2, %s1863_s25 }
  0x10   : > { %s487_s23 = scalar_lea.vmem %s1845_s1, %s1713_s20  ;;  %s483_s30 = scalar_lea.vmem %s1844_s0, %s1713_s20  ;;  %v1387_v34 = vld [vmem:[%s490_s15] ss:$0 sm:$0xff] }
  0x11   : > { %v501_v5 = vld [vmem:[%s487_s23] sm:$0xf]  ;;  %s1600_s23 = smov 16  }
  0x12   : > { %1445 = vmatmul.mubr.msk.bf16.vlgmr.msra.gmra.mrb[0].mxu1 %vm525_vm1, %v501_v5  ;;  %v1726_v6 = vld [vmem:[%s483_s30] sm:$0xf] }
  0x13   : > { %1437 = vmatmul.mubr.msk.bf16.vlgmr.msra.gmra.mrb[0].mxu0 %vm525_vm1, %v1726_v6  ;;  %1458 = vmatprep.mubr.msk.bf16.mxu1 %vm1595_vm0, %v1594_v1 }
  0x14   : > { %1452 = vmatprep.mubr.msk.bf16.mxu0 %vm1595_vm0, %v1594_v1  ;;  %1449 = vmatpush3.bf16.msra.mxu0 %v1548_v23 }
  0x15   : > { %1450 = vmatprep.subr.bf16.mxu0 %v1594_v1 }
  0x18   : > { %1451 = vmatpush3.bf16.msra.mxu0 %v1549_v24 }
  0x19   : > { %1462 = vmatprep.subr.bf16.mxu0 %v1594_v1 }
  0x1b   : > { %1453 = vmatmul.mubr.msk.bf16.vlgmr.msra.gmra.mrb[4].mxu0 %vm525_vm1, %v501_v5 }
  0x1c   : > { %1464 = vmatprep.mubr.msk.bf16.mxu0 %vm1595_vm0, %v1594_v1 }
  0xe5   : > { %v631_v9 = vpop.f32.mrb[0].mxu1 }
  0xe6   : > { %v632_v10 = vadd.f32 %v1379_v7, %v631_v9  ;;  %v1446_v11 = vpop.f32.mrb[1].mxu1  ;;  %v563_v12 = vpop.f32.mrb[0].mxu0 }
  0xe7   : > { %v564_v13 = vadd.f32 %v1375_v8, %v563_v12  ;;  %v634_v14 = vpop.f32.mrb[2].mxu1  ;;  %v1438_v15 = vpop.f32.mrb[1].mxu0 }
  0xe8   : > { %v637_v16 = vpack.c.bf16 %v632_v10, %v632_v10  ;;  %v1447_v17 = vpop.f32.mrb[3].mxu1  ;;  %v566_v18 = vpop.f32.mrb[2].mxu0 }
  0xe9   : > { %v569_v19 = vmul.f32 0.35355338, %v564_v13  ;;  %v1439_v20 = vpop.f32.mrb[3].mxu0 }
  0xea   : > { %931 = vrot.lane.b32.xlu1 %v637_v16, %s1596_s18  ;;  %820 = vrot.lane.b32.xlu0 %v637_v16, %s1597_s19  ;;  %v714_v21 = vsel %vm709_vm2, %v637_v16, 0 }
  0xeb   : > { %v570_v22 = vpack.c.bf16 %v569_v19, %v569_v19  ;;  %1457 = vmatpush3.bf16.xpose.msra.mxu1 %v714_v21 }
  0xec   : > { %1468 = vmatprep.subr.bf16.mxu1 %v1594_v1 }
  0xee   : > { %929 = vrot.lane.b32.xlu1 %v570_v22, %s1596_s18  ;;  %817 = vrot.lane.b32.xlu0 %v570_v22, %s1597_s19  ;;  %v695_v42 = vpop.f32.mrb[4].mxu0 }
  0xef   : > { %v696_v43 = vadd.f32 %v1383_v41, %v695_v42  ;;  %v1454_v44 = vpop.f32.mrb[5].mxu0 }
  0xf0   : > { %v698_v45 = vpop.f32.mrb[6].mxu0 }
  0xf1   : > { %v701_v46 = vpack.c.bf16 %v696_v43, %v696_v43  ;;  %v1455_v47 = vpop.f32.mrb[7].mxu0 }
  0xf2   : > { %1039 = vrot.lane.b32.xlu1 %v570_v22, %s1598_s21  ;;  %1041 = vrot.lane.b32.xlu0 %v637_v16, %s1598_s21 }
  0xf3   : > { %1459 = vmatmul.mubr.msk.bf16.vlgmr.msra.gmra.mrb[4].mxu1 %vm709_vm2, %v570_v22  ;;  %v774_v48 = vsel %vm772_vm4, %v701_v46, 0 }
  0xf4   : > { %1470 = vmatprep.mubr.msk.bf16.mxu1 %vm1595_vm0, %v1594_v1  ;;  %1463 = vmatpush3.bf16.msra.mxu0 %v774_v48 }
  0xf5   : > { %1474 = vmatprep.subr.bf16.mxu0 %v1594_v1 }
 0x15c   : > { %v821_v25 = vpop.permute.xlu0 %820  ;;  %v932_v27 = vpop.permute.xlu1 %931 }
 0x15d   : > { %v826_v26 = vsel %vm709_vm2, %v821_v25, 0  ;;  %v937_v29 = vsel %vm709_vm2, %v932_v27, 0 }
 0x15e   : > { %1469 = vmatpush3.bf16.xpose.msra.mxu1 %v826_v26 }
 0x15f   : > { %1480 = vmatprep.subr.bf16.mxu1 %v1594_v1 }
 0x160   : > { %v818_v28 = vpop.permute.xlu0 %817  ;;  %v930_v31 = vpop.permute.xlu1 %929 }
 0x164   : > { %v1042_v30 = vpop.permute.xlu0 %1041  ;;  %v1040_v33 = vpop.permute.xlu1 %1039 }
 0x165   : > { %1471 = vmatmul.mubr.msk.bf16.vlgmr.msra.gmra.mrb[8].mxu1 %vm709_vm2, %v818_v28  ;;  %v1047_v32 = vsel %vm709_vm2, %v1042_v30, 0 }
 0x166   : > { %1481 = vmatpush3.bf16.xpose.msra.mxu1 %v937_v29  ;;  %1482 = vmatprep.mubr.msk.bf16.mxu1 %vm1595_vm0, %v1594_v1 }
 0x167   : > { %1492 = vmatprep.subr.bf16.mxu1 %v1594_v1 }
 0x16d   : > { %1483 = vmatmul.mubr.msk.bf16.vlgmr.msra.gmra.mrb[12].mxu1 %vm709_vm2, %v930_v31 }
 0x16e   : > { %1493 = vmatpush3.bf16.xpose.msra.mxu1 %v1047_v32  ;;  %1494 = vmatprep.mubr.msk.bf16.mxu1 %vm1595_vm0, %v1594_v1 }
 0x16f   : > { %1504 = vmatprep.subr.bf16.mxu1 %v1594_v1 }
 0x175   : > { %1495 = vmatmul.mubr.msk.bf16.vlgmr.msra.gmra.mrb[16].mxu1 %vm709_vm2, %v1040_v33 }
 0x176   : > { %1508 = vmatprep.mubr.msk.bf16.mxu1 %vm1595_vm0, %v1594_v1 }
 0x1c6   : > { %v750_v35 = vpop.f32.mrb[4].mxu1 }
 0x1c7   : > { %v751_v36 = vadd.f32 %v1387_v34, %v750_v35  ;;  %v1460_v37 = vpop.f32.mrb[5].mxu1 }
 0x1c8   : > { %v753_v38 = vpop.f32.mrb[6].mxu1 }
 0x1c9   : > { %v1461_v39 = vpop.f32.mrb[7].mxu1  ;;  %v757_v40 = vsel %vm756_vm3, %v751_v36, -inf }
 0x1ca   : > { %758 = vmax.xlane.f32.xlu0 %v757_v40 }
 0x238   : > { %v862_v49 = vpop.f32.mrb[8].mxu1 }
 0x239   : > { %v863_v50 = vadd.f32 %v1387_v34, %v862_v49  ;;  %v1472_v51 = vpop.f32.mrb[9].mxu1 }
 0x23a   : > { %v865_v52 = vpop.f32.mrb[10].mxu1  ;;  %v1550_v51 = vld [vmem:[%s1853_s9] sm:$0xff]  }
 0x23b   : > { %v1473_v53 = vpop.f32.mrb[11].mxu1  ;;  %v868_v54 = vsel %vm756_vm3, %v863_v50, -inf  ;;  %1505 = vmatpush3.bf16.msra.mxu1 %v1550_v51 }
 0x23c   : > { %869 = vmax.xlane.f32.xlu1 %v868_v54  ;;  %1506 = vmatprep.subr.bf16.mxu1 %v1594_v1 }
 0x240   : > { %v973_v55 = vpop.f32.mrb[12].mxu1 }
 0x241   : > { %v974_v56 = vadd.f32 %v1387_v34, %v973_v55  ;;  %v1484_v57 = vpop.f32.mrb[13].mxu1 }
 0x242   : > { %v976_v58 = vpop.f32.mrb[14].mxu1 }
 0x243   : > { %v1485_v59 = vpop.f32.mrb[15].mxu1  ;;  %v979_v60 = vsel %vm756_vm3, %v974_v56, -inf }
 0x244   : > { %980 = vmax.xlane.f32.xlu0 %v979_v60 }
 0x248   : > { %v1083_v61 = vpop.f32.mrb[16].mxu1 }
 0x249   : > { %v1084_v62 = vadd.f32 %v1387_v34, %v1083_v61  ;;  %v1496_v63 = vpop.f32.mrb[17].mxu1 }
 0x24a   : > { %v1086_v0 = vpop.f32.mrb[18].mxu1 }
 0x24b   : > { %v1497_v2 = vpop.f32.mrb[19].mxu1  ;;  %v1089_v3 = vsel %vm756_vm3, %v1084_v62, -inf }
 0x24c   : > { %1090 = vmax.xlane.f32.xlu0 %v1089_v3 }
 0x257   : > { %v759_v4 = vpop.xlane.xlu0 %758 }
 0x258   : > { %v760_v5 = vsub.f32 %v751_v36, %v759_v4 }
 0x25a   : > { %v761_v7 = vmul.f32 1.442695, %v760_v5 }
 0x25c   : > { %1552 = vpow2.f32 %v761_v7 }
 0x266   : > { %v1553_v8 = vpop.eup %1552 }
 0x267   : > { %v763_v9 = vsel %vm756_vm3, %v1553_v8, 0.0 }
 0x268   : > { %764 = vadd.xlane.f32.xlu1 %v763_v9  ;;  %v1396_v9 = vld [vmem:[%s1854_s10] ss:$0 sm:$0xff] }
 0x279   : > { %881 = vrot.lane.b32.xlu1 %v701_v46, %s1597_s19  ;;  %s1599_s19 = smov 8  }
 0x2c9   : > { %v870_v10 = vpop.xlane.xlu1 %869 }
 0x2ca   : > { %v871_v11 = vsub.f32 %v863_v50, %v870_v10  ;;  %v500_v10 = vunpack.c.l.bf16 %v1726_v6 }
 0x2cc   : > { %v872_v12 = vmul.f32 1.442695, %v871_v11 }
 0x2ce   : > { %1554 = vpow2.f32 %v872_v12 }
 0x2d1   : > { %v981_v13 = vpop.xlane.xlu0 %980 }
 0x2d2   : > { %v982_v14 = vsub.f32 %v974_v56, %v981_v13  ;;  %v1551_v56 = vld [vmem:[%s1853_s9 + $0x8] sm:$0xff]  }
 0x2d3   : > { %1507 = vmatpush3.bf16.msra.mxu1 %v1551_v56 }
 0x2d4   : > { %v983_v15 = vmul.f32 1.442695, %v982_v14 }
 0x2d6   : > { %1556 = vpow2.f32 %v983_v15 }
 0x2d8   : > { %v1555_v16 = vpop.eup %1554 }
 0x2d9   : > { %v1091_v17 = vpop.xlane.xlu0 %1090  ;;  %v874_v18 = vsel %vm756_vm3, %v1555_v16, 0.0 }
 0x2da   : > { %v1092_v19 = vsub.f32 %v1084_v62, %v1091_v17  ;;  %875 = vadd.xlane.f32.xlu0 %v874_v18 }
 0x2dc   : > { %v1093_v20 = vmul.f32 1.442695, %v1092_v19 }
 0x2de   : > { %1558 = vpow2.f32 %v1093_v20 }
 0x2e0   : > { %v1557_v21 = vpop.eup %1556 }
 0x2e1   : > { %v985_v22 = vsel %vm756_vm3, %v1557_v21, 0.0 }
 0x2e2   : > { %986 = vadd.xlane.f32.xlu1 %v985_v22 }
 0x2e8   : > { %v1559_v23 = vpop.eup %1558 }
 0x2e9   : > { %v1095_v24 = vsel %vm756_vm3, %v1559_v23, 0.0 }
 0x2ea   : > { %1096 = vadd.xlane.f32.xlu0 %v1095_v24 }
 0x2f3   : > { %1101 = vrot.lane.b32.xlu1 %v701_v46, %s1598_s21 }
 0x2f5   : > { %v765_v25 = vpop.xlane.xlu1 %764 }
 0x2f6   : > { %1560 = vrcp.f32 %v765_v25 }
 0x2f9   : > { %v882_v27 = vpop.permute.xlu1 %881 }
 0x2fa   : > { %v887_v30 = vsel %vm772_vm4, %v882_v27, 0 }
 0x300   : > { %v1561_v26 = vpop.eup %1560  ;;  %991 = vrot.lane.b32.xlu0 %v701_v46, %s1596_s18 }
 0x301   : > { %v767_v28 = vmul.f32 %v1561_v26, %v1553_v8  ;;  %v1400_v26 = vld [vmem:[%s1855_s11] ss:$0 sm:$0xff] }
 0x303   : > { %v768_v29 = vpack.c.bf16 %v767_v28, %v767_v28  ;;  %v1401_v28 = vld [vmem:[%s1856_s12] ss:$0 sm:$0xff] }
 0x305   : > { %1465 = vmatmul.mubr.msk.bf16.vlgmr.msra.gmra.mrb[8].mxu0 %vm709_vm2, %v768_v29 }
 0x306   : > { %1475 = vmatpush3.bf16.msra.mxu0 %v887_v30  ;;  %1476 = vmatprep.mubr.msk.bf16.mxu0 %vm1595_vm0, %v1594_v1 }
 0x307   : > { %1486 = vmatprep.subr.bf16.mxu0 %v1594_v1 }
 0x367   : > { %v876_v31 = vpop.xlane.xlu0 %875 }
 0x368   : > { %1562 = vrcp.f32 %v876_v31 }
 0x36f   : > { %v987_v32 = vpop.xlane.xlu1 %986 }
 0x370   : > { %1564 = vrcp.f32 %v987_v32 }
 0x372   : > { %v1563_v33 = vpop.eup %1562 }
 0x373   : > { %v878_v34 = vmul.f32 %v1563_v33, %v1555_v16  ;;  %v1102_v41 = vpop.permute.xlu1 %1101 }
 0x374   : > { %v1107_v43 = vsel %vm772_vm4, %v1102_v41, 0 }
 0x375   : > { %v879_v35 = vpack.c.bf16 %v878_v34, %v878_v34 }
 0x377   : > { %v1097_v36 = vpop.xlane.xlu0 %1096  ;;  %1477 = vmatmul.mubr.msk.bf16.vlgmr.msra.gmra.mrb[12].mxu0 %vm709_vm2, %v879_v35 }
 0x378   : > { %1566 = vrcp.f32 %v1097_v36  ;;  %1488 = vmatprep.mubr.msk.bf16.mxu0 %vm1595_vm0, %v1594_v1 }
 0x37a   : > { %v1565_v37 = vpop.eup %1564 }
 0x37b   : > { %v989_v38 = vmul.f32 %v1565_v37, %v1557_v21  ;;  %v992_v39 = vpop.permute.xlu0 %991 }
 0x37c   : > { %v997_v40 = vsel %vm772_vm4, %v992_v39, 0 }
 0x37d   : > { %1487 = vmatpush3.bf16.msra.mxu0 %v997_v40  ;;  %v990_v42 = vpack.c.bf16 %v989_v38, %v989_v38 }
 0x37e   : > { %1498 = vmatprep.subr.bf16.mxu0 %v1594_v1 }
 0x380   : > { %1489 = vmatmul.mubr.msk.bf16.vlgmr.msra.gmra.mrb[16].mxu0 %vm709_vm2, %v990_v42 }
 0x381   : > { %1499 = vmatpush3.bf16.msra.mxu0 %v1107_v43  ;;  %1500 = vmatprep.mubr.msk.bf16.mxu0 %vm1595_vm0, %v1594_v1 }
 0x382   : > { %v1567_v44 = vpop.eup %1566 }
 0x383   : > { %v1099_v45 = vmul.f32 %v1567_v44, %v1559_v23 }
 0x385   : > { %v1100_v46 = vpack.c.bf16 %v1099_v45, %v1099_v45 }
 0x388   : > { %1501 = vmatmul.mubr.msk.bf16.vlgmr.msra.gmra.mrb[20].mxu0 %vm709_vm2, %v1100_v46 }
 0x3d8   : > { %v810_v47 = vpop.f32.mrb[8].mxu0 }
 0x3d9   : > { %v1466_v48 = vpop.f32.mrb[9].mxu0 }
 0x3da   : > { %v813_v49 = vpop.f32.mrb[10].mxu0 }
 0x3db   : > { %v1467_v50 = vpop.f32.mrb[11].mxu0 }
 0x44a   : > { %v923_v52 = vpop.f32.mrb[12].mxu0 }
 0x44b   : > { %1150 = vrot.lane.b32.xlu1 %v923_v52, %s1599_s19  ;;  %v1478_v53 = vpop.f32.mrb[13].mxu0  ;;  %s497_s19 = scalar_lea.vmem %s1857_s13, %s1713_s20 }
 0x44c   : > { %v926_v54 = vpop.f32.mrb[14].mxu0  ;;  %v1269_v31 = vld [vmem:[%s497_s19] sm:$0xf] }
 0x44d   : > { %v1479_v55 = vpop.f32.mrb[15].mxu0 }
 0x453   : > { %v1033_v57 = vpop.f32.mrb[16].mxu0 }
 0x454   : > { %1154 = vrot.lane.b32.xlu0 %v1033_v57, %s1600_s23  ;;  %v1490_v58 = vpop.f32.mrb[17].mxu0 }
 0x455   : > { %v1036_v59 = vpop.f32.mrb[18].mxu0 }
 0x456   : > { %v1491_v60 = vpop.f32.mrb[19].mxu0 }
 0x45b   : > { %v1143_v61 = vpop.f32.mrb[20].mxu0 }
 0x45c   : > { %1158 = vrot.lane.b32.xlu1 %v1143_v61, %s1601_s24  ;;  %v1502_v1 = vpop.f32.mrb[21].mxu0 }
 0x45d   : > { %v1146_v62 = vpop.f32.mrb[22].mxu0 }
 0x45e   : > { %v1503_v63 = vpop.f32.mrb[23].mxu0 }
 0x4bd   : > { %v1151_v0 = vpop.permute.xlu1 %1150 }
 0x4be   : > { %v1161_v3 = vsel %vm709_vm2, %v810_v47, %v1151_v0 }
 0x4c6   : > { %v1155_v2 = vpop.permute.xlu0 %1154 }
 0x4c7   : > { %v1163_v4 = vsel %vm1162_vm5, %v1161_v3, %v1155_v2 }
 0x4ce   : > { %v1159_v5 = vpop.permute.xlu1 %1158 }
 0x4cf   : > { %v1165_v7 = vsel %vm1164_vm6, %v1163_v4, %v1159_v5 }
 0x4d0   : > { %v1166_v8 = vpack.c.bf16 %v1165_v7, %v1165_v7 }
 0x4d2   : > { %1509 = vmatmul.mubr.msk.bf16.vlgmr.msra.gmra.mrb[20].mxu1 %vm525_vm1, %v1166_v8 }
 0x5a5   : > { %v1227_v11 = vpop.f32.mrb[20].mxu1 }
 0x5a6   : > { %v1228_v12 = vadd.f32 %v1396_v9, %v1227_v11  ;;  %v1510_v13 = vpop.f32.mrb[21].mxu1 }
 0x5a7   : > { %v1230_v14 = vpop.f32.mrb[22].mxu1 }
 0x5a8   : > { %v1511_v15 = vpop.f32.mrb[23].mxu1  ;;  %v1233_v16 = vadd.f32 %v1228_v12, %v500_v10 }
 0x5aa   : > { %v1237_v17 = vsel %vm1236_vm7, %v1233_v16, 0.0 }
 0x5ab   : > { %1238 = vadd.xlane.f32.xlu0 %v1237_v17 }
 0x638   : > { %v1239_v18 = vpop.xlane.xlu0 %1238 }
 0x639   : > { %v1241_v19 = vmul.f32 0.03125, %v1239_v18 }
 0x63b   : > { %v1242_v20 = vsub.f32 %v1233_v16, %v1241_v19 }
 0x63d   : > { %v1243_v21 = vmul.f32 %v1242_v20, %v1242_v20 }
 0x63f   : > { %v1244_v22 = vsel %vm1236_vm7, %v1243_v21, 0.0 }
 0x640   : > { %1245 = vadd.xlane.f32.xlu1 %v1244_v22 }
 0x6cd   : > { %v1246_v23 = vpop.xlane.xlu1 %1245 }
 0x6ce   : > { %v1247_v24 = vmul.f32 0.03125, %v1246_v23 }
 0x6d0   : > { %v1248_v25 = vadd.f32 1e-05, %v1247_v24 }
 0x6d2   : > { %1568 = vrsqrt.f32 %v1248_v25 }
 0x6dc   : > { %v1569_v6 = vpop.eup %1568 }
 0x6dd   : > { %v1250_v27 = vmul.f32 %v1569_v6, %v1242_v20 }
 0x6df   : > { %v1257_v29 = vmul.f32 %v1400_v26, %v1250_v27 }
 0x6e1   : > { %v1264_v30 = vadd.f32 %v1401_v28, %v1257_v29 }
 0x6e3   : > { %v1265_v32 = vpack.c.bf16 %v1264_v30, %v1264_v30 }
 0x6e5   : > { %v1270_v33 = vsel %vm1268_vm10, %v1265_v32, %v1269_v31 }
 0x6e6   : > { %1271 = vst [vmem:[%s497_s19] sm:$0xf] %v1270_v33 }
 0x6e7 PF: > { %s23_s27 = sadd.s32 1, %s1592_s27   ;;  %s1858_s25 = smov %s1588_s26 }
 0x6e8   : > { %p20_p5 = scmp.ge.s32.totalorder %s23_s27, 4   ;;  %s1859_s26 = smov %s1861_s28 }
 0x6ea   :  { %22 = sbr.rel (!%p20_p5) target bundleno = 2 (0x2), region = 108 }

// kernel: transformer_forward.24
= control target key start
LH: loop header
LB: loop body
LE: loop exit
PB: predicated region body
PF: predicated region fallthrough
CT: control target
= control target key end

     0   :  { %vm20_vm0 = vcmask 261120   ;;  %vm24_vm1 = vcmask 259072   ;;  %vm73_vm2 = vcmask 257024   ;;  %vm75_vm3 = vcmask 256000   ;;  %s131_s0 = inlined_call_operand.vmem [shape: bf16[14,32], index: 0, kind: input, shape index: {}]   ;;  %s132_s1 = inlined_call_operand.vmem [shape: f32[1,32], index: 1, kind: input, shape index: {}]   ;;  %s133_s2 = inlined_call_operand.vmem [shape: f32[1,32], index: 2, kind: input, shape index: {}]   ;;  %s134_s3 = inlined_call_operand.vmem [shape: bf16[14,32], index: 3, kind: output, shape index: {}]  }
   0x1   :  { %v14_v0 = vld [vmem:[%s131_s0] sm:$0xf]  ;;  %v15_v1 = vld [vmem:[%s131_s0 + $0x4] sm:$0x7] }
   0x2   :  { %v16_v2 = vunpack.c.l.bf16 %v14_v0  ;;  %v17_v3 = vunpack.c.l.bf16 %v15_v1  ;;  %v81_v23 = vld [vmem:[%s132_s1] ss:$0 sm:$0xff] }
   0x3   :  { %v82_v25 = vld [vmem:[%s133_s2] ss:$0 sm:$0xff] }
   0x4   :  { %v21_v4 = vsel %vm20_vm0, %v16_v2, 0.0  ;;  %v25_v5 = vsel %vm24_vm1, %v17_v3, 0.0 }
   0x5   :  { %22 = vadd.xlane.f32.xlu0 %v21_v4 }
   0x9   :  { %26 = vadd.xlane.f32.xlu0 %v25_v5 }
  0x92   :  { %v23_v6 = vpop.xlane.xlu0 %22 }
  0x93   :  { %v29_v7 = vmul.f32 0.03125, %v23_v6 }
  0x95   :  { %v31_v8 = vsub.f32 %v16_v2, %v29_v7 }
  0x96   :  { %v27_v9 = vpop.xlane.xlu0 %26 }
  0x97   :  { %v30_v10 = vmul.f32 0.03125, %v27_v9  ;;  %v33_v11 = vmul.f32 %v31_v8, %v31_v8 }
  0x99   :  { %v32_v12 = vsub.f32 %v17_v3, %v30_v10  ;;  %v35_v13 = vsel %vm20_vm0, %v33_v11, 0.0 }
  0x9a   :  { %36 = vadd.xlane.f32.xlu1 %v35_v13 }
  0x9b   :  { %v34_v14 = vmul.f32 %v32_v12, %v32_v12 }
  0x9d   :  { %v38_v15 = vsel %vm24_vm1, %v34_v14, 0.0 }
  0x9e   :  { %39 = vadd.xlane.f32.xlu1 %v38_v15 }
 0x127   :  { %v37_v16 = vpop.xlane.xlu1 %36 }
 0x128   :  { %v41_v17 = vmul.f32 0.03125, %v37_v16 }
 0x12a   :  { %v43_v18 = vadd.f32 1e-05, %v41_v17 }
 0x12b   :  { %v40_v19 = vpop.xlane.xlu1 %39 }
 0x12c   :  { %87 = vrsqrt.f32 %v43_v18  ;;  %v42_v20 = vmul.f32 0.03125, %v40_v19 }
 0x12e   :  { %v44_v21 = vadd.f32 1e-05, %v42_v20 }
 0x130   :  { %89 = vrsqrt.f32 %v44_v21 }
 0x136   :  { %v88_v22 = vpop.eup %87 }
 0x137   :  { %v47_v24 = vmul.f32 %v88_v22, %v31_v8 }
 0x139   :  { %v55_v26 = vmul.f32 %v81_v23, %v47_v24 }
 0x13a   :  { %v90_v27 = vpop.eup %89 }
 0x13b   :  { %v63_v28 = vadd.f32 %v82_v25, %v55_v26  ;;  %v48_v29 = vmul.f32 %v90_v27, %v32_v12 }
 0x13d   :  { %v85_v30 = vpack.c.bf16 %v63_v28, %v63_v28  ;;  %v56_v31 = vmul.f32 %v81_v23, %v48_v29 }
 0x13f   :  { %74 = vst.msk [vmem:[%s134_s3] sm:$0xf] %vm73_vm2, %v85_v30  ;;  %v64_v32 = vadd.f32 %v82_v25, %v56_v31 }
 0x141   :  { %v86_v33 = vpack.c.bf16 %v64_v32, %v64_v32 }
 0x143   :  { %76 = vst.msk [vmem:[%s134_s3 + $0x4] sm:$0x7] %vm75_vm3, %v86_v33 }

// kernel: transformer_forward.25
= control target key start
LH: loop header
LB: loop body
LE: loop exit
PB: predicated region body
PF: predicated region fallthrough
CT: control target
= control target key end

     0   :  { %v119_v0 = vmov 0.0   ;;  %vm120_vm0 = vmmov 0   ;;  %vm45_vm1 = vcmask 261120   ;;  %vm90_vm2 = vcmask 130048   ;;  %s159_s1 = inlined_call_operand.vmem [shape: bf16[32,16], index: 1, kind: input, shape index: {}]   ;;  %s160_s0 = inlined_call_operand.vmem [shape: bf16[14,32], index: 0, kind: input, shape index: {}]   ;;  %s161_s2 = inlined_call_operand.vmem [shape: f32[1,16], index: 2, kind: input, shape index: {}]   ;;  %s162_s3 = inlined_call_operand.vmem [shape: f32[14,16], index: 3, kind: output, shape index: {}]  }
   0x1   :  { %106 = vmatprep.subr.bf16.mxu0 %v119_v0  ;;  %v116_v1 = vld [vmem:[%s159_s1] sm:$0xff]   ;;  %110 = vmatprep.mubr.msk.bf16.mxu0 %vm120_vm0, %v119_v0  ;;  %v117_v2 = vld [vmem:[%s159_s1 + $0x8] sm:$0xff]   ;;  %vm92_vm3 = vcmask 128000  }
   0x2   :  { %107 = vmatpush3.bf16.msra.mxu0 %v116_v1  ;;  %v118_v3 = vld [vmem:[%s160_s0] sm:$0x7f]  }
   0x3   :  { %108 = vmatprep.subr.bf16.mxu0 %v119_v0  ;;  %v98_v4 = vld [vmem:[%s161_s2] ss:$0 sm:$0xff] }
   0x6   :  { %109 = vmatpush3.bf16.msra.mxu0 %v117_v2 }
   0x9   :  { %111 = vmatmul.mubr.msk.bf16.vlgmr.msra.gmra.mrb[0].mxu0 %vm45_vm1, %v118_v3 }
  0xdc   :  { %v83_v5 = vpop.f32.mrb[0].mxu0 }
  0xdd   :  { %v84_v6 = vadd.f32 %v98_v4, %v83_v5  ;;  %v112_v7 = vpop.f32.mrb[1].mxu0 }
  0xde   :  { %v86_v8 = vpop.f32.mrb[2].mxu0 }
  0xdf   :  { %91 = vst.msk [vmem:[%s162_s3] sm:$0xff] %vm90_vm2, %v84_v6  ;;  %v87_v9 = vadd.f32 %v98_v4, %v86_v8  ;;  %v113_v10 = vpop.f32.mrb[3].mxu0 }
  0xe1   :  { %93 = vst.msk [vmem:[%s162_s3 + $0x8] sm:$0x3f] %vm92_vm3, %v87_v9 }

</bundles_post_ra>
